<compile_context>
chip_gen: v7x
topology: tpu7x:2x2x1
jax: 0.10.0
libtpu: 0.0.40
codegen_flags: <defaults>
</compile_context>

<pallas_src>
import functools

import jax
import jax.numpy as jnp
from jax import lax
from jax.experimental import pallas as pl
from jax.experimental.pallas import tpu as pltpu


# ----------------------------------------------------------------- utilities
def _round_up(x, m):
    return ((x + m - 1) // m) * m


def _pick_tile(dim_pad, pref):
    """Largest multiple of 128 that divides dim_pad and is <= pref (>= 128)."""
    t = max(128, (min(pref, dim_pad) // 128) * 128)
    while dim_pad % t:
        t -= 128
    return t


# -----------------------------------------------------------------------------
# Kernel 1: fused Chebyshev conv + cl + ReLU + multi-head GAT + ReLU + max-pool.
#   Grid = (B,) ("parallel" -> shards across TensorCores on multi-TC chips).
#   x_col : (B, V, 1)        input signal (Fin = 1), column form per batch
#   L     : (V, V)           rescaled Laplacian (constant-index BlockSpec)
#   Wcl   : (K, nfeat)       cl weight rows (= torch cl.weight.T)
#   bcl   : (1, nfeat)
#   W_all : (nfeat, H*nhid)  head weights concatenated along columns (bf16)
#   A1    : (H*nhid, H)      block-diagonal a1 halves
#   A2T   : (H, H*nhid)      block-diagonal a2 halves, transposed
#   adj   : (V, V)
#   out   : (B, V//pool, H*nhid)
# -----------------------------------------------------------------------------
def _gat_fused_kernel(x_ref, l_ref, wcl_ref, bcl_ref, wall_ref, a1_ref, a2t_ref,
                      adj_ref, o_ref, hp_ref, *, K, alpha, nhid, nheads, poolsize):
    V = l_ref.shape[0]
    L = l_ref[...]                                    # (V, V)

    # ---- Chebyshev graph conv (Fin = 1), per-batch, column form -------------
    x0 = x_ref[0]                                     # (V, 1)
    xs = [x0]
    x1 = x0
    if K > 1:
        x1 = jnp.dot(L, x0, preferred_element_type=jnp.float32)
        xs.append(x1)
    for _ in range(2, K):
        x2 = 2.0 * jnp.dot(L, x1, preferred_element_type=jnp.float32) - x0
        xs.append(x2)
        x0, x1 = x1, x2

    # cl linear as K VPU broadcast-MACs (avoids a lane-3 stack + thin-K MXU op).
    h = bcl_ref[...]                                  # (1, nfeat) broadcasts
    for k in range(K):
        h = h + xs[k] * wcl_ref[k:k + 1, :]           # (V,1)*(1,nfeat)->(V,nfeat)
    h = jnp.maximum(h, 0.0)                           # ReLU (dropout = identity)

    # ---- all attention heads: one bf16 MXU matmul ----------------------------
    Wh_all = jnp.dot(h.astype(jnp.bfloat16), wall_ref[...],
                     preferred_element_type=jnp.float32)          # (V, H*nhid)

    # attention-vector pieces for ALL heads at once (block-diagonal a1/a2):
    col_all = jnp.dot(Wh_all, a1_ref[...],
                      preferred_element_type=jnp.float32)         # (V, H)
    rowT_all = lax.dot_general(a2t_ref[...], Wh_all, (((1,), (1,)), ((), ())),
                               preferred_element_type=jnp.float32)  # (H, V)

    adj_pos = adj_ref[...] > 0                        # hoisted out of head loop
    neg = jnp.float32(-9e15)
    Wh_bf = Wh_all.astype(jnp.bfloat16)

    for hd in range(nheads):
        e = col_all[:, hd:hd + 1] + rowT_all[hd:hd + 1, :]        # (V, V)
        e = jnp.where(e > 0, e, alpha * e)                         # LeakyReLU
        masked = jnp.where(adj_pos, e, neg)
        m = jnp.max(masked, axis=-1, keepdims=True)
        p = jnp.exp(masked - m)
        attn = p * pl.reciprocal(jnp.sum(p, axis=-1, keepdims=True), approx=True)
        # Write each head directly into its scratch slice: no list+concat and
        # the (V,V) temporaries die at the end of each head.
        hp_ref[:, hd * nhid:(hd + 1) * nhid] = jnp.dot(
            attn.astype(jnp.bfloat16), Wh_bf[:, hd * nhid:(hd + 1) * nhid],
            preferred_element_type=jnp.float32)

    # ReLU(ELU(x)) == ReLU(x) -> skip ELU.  Graph max-pool over the node axis.
    hp = jnp.maximum(hp_ref[...], 0.0)                # (V, C)
    C = hp.shape[1]
    pooled = jnp.max(hp.reshape(V // poolsize, poolsize, C), axis=1)
    o_ref[0] = pooled.astype(o_ref.dtype)
    # TODO(synk): for V in the thousands, tile the (V,V) logits over KV-column
    #             blocks with an online softmax (flash-style); and for B == 1 on
    #             v7x add a second parallel grid axis so both TCs have work.


def gat_fused(x_col, L, Wcl_rows, bcl, W_all, A1, A2T, adj, *,
              K, alpha, nhid, nheads, poolsize):
    B, V, _ = x_col.shape
    C = nheads * nhid
    nfeat = W_all.shape[0]
    kernel = functools.partial(_gat_fused_kernel, K=K, alpha=alpha, nhid=nhid,
                               nheads=nheads, poolsize=poolsize)
    return pl.pallas_call(
        kernel,
        out_shape=jax.ShapeDtypeStruct((B, V // poolsize, C), jnp.float32),
        grid=(B,),
        in_specs=[
            pl.BlockSpec((1, V, 1), lambda b: (b, 0, 0)),
            pl.BlockSpec((V, V), lambda b: (0, 0)),
            pl.BlockSpec((K, nfeat), lambda b: (0, 0)),
            pl.BlockSpec((1, nfeat), lambda b: (0, 0)),
            pl.BlockSpec((nfeat, C), lambda b: (0, 0)),
            pl.BlockSpec((C, nheads), lambda b: (0, 0)),
            pl.BlockSpec((nheads, C), lambda b: (0, 0)),
            pl.BlockSpec((V, V), lambda b: (0, 0)),
        ],
        out_specs=pl.BlockSpec((1, V // poolsize, C), lambda b: (b, 0, 0)),
        scratch_shapes=[pltpu.VMEM((V, C), jnp.float32)],
        compiler_params=pltpu.CompilerParams(
            dimension_semantics=("parallel",),
            vmem_limit_bytes=48 * 1024 * 1024),
    )(x_col, L, Wcl_rows, bcl, W_all, A1, A2T, adj)


# -----------------------------------------------------------------------------
# Kernel 2: dense layer  y = act(x @ Wt + b), tiled over (Dout, Din).
#   Accumulates directly into the resident f32 output block (no scratch).
#   Weights are pre-padded to 128-multiples and stored bf16; x is cast to bf16.
#   activation in {"none", "relu", "relu_logsoftmax"}
# -----------------------------------------------------------------------------
def _linear_kernel(x_ref, wt_ref, b_ref, o_ref, *, activation, valid_n):
    k = pl.program_id(1)

    @pl.when(k == 0)
    def _():
        o_ref[...] = jnp.zeros_like(o_ref)

    o_ref[...] += jnp.dot(x_ref[...].astype(jnp.bfloat16), wt_ref[...],
                          preferred_element_type=jnp.float32)

    @pl.when(k == pl.num_programs(1) - 1)
    def _():
        y = o_ref[...] + b_ref[...]
        if activation in ("relu", "relu_logsoftmax"):
            y = jnp.maximum(y, 0.0)
        if activation == "relu_logsoftmax":
            # Mask padded output lanes out of the softmax normalization.
            col = lax.broadcasted_iota(jnp.int32, y.shape, 1)
            ym = jnp.where(col < valid_n, y, -jnp.inf)
            m = jnp.max(ym, axis=-1, keepdims=True)
            lse = m + jnp.log(jnp.sum(jnp.exp(ym - m), axis=-1, keepdims=True))
            y = y - lse
        o_ref[...] = y.astype(o_ref.dtype)


def linear(x, Wt, b2d, dout, activation="none", *, tn=256, tk=512):
    """x: (N, Din); Wt: (Din_pad, Dout_pad) bf16 pre-transposed/padded;
    b2d: (1, Dout_pad); dout: true (unpadded) output width."""
    N, Din = x.shape
    Din_p, Dout_p = Wt.shape
    if Din_p != Din:
        x = jnp.pad(x, ((0, 0), (0, Din_p - Din)))
    tk_ = _pick_tile(Din_p, tk)
    tn_ = Dout_p if activation == "relu_logsoftmax" else _pick_tile(Dout_p, tn)
    grid = (Dout_p // tn_, Din_p // tk_)
    kernel = functools.partial(_linear_kernel, activation=activation,
                               valid_n=dout)
    y = pl.pallas_call(
        kernel,
        out_shape=jax.ShapeDtypeStruct((N, Dout_p), jnp.float32),
        grid=grid,
        in_specs=[
            pl.BlockSpec((N, tk_), lambda j, k: (0, k)),
            # TODO(synk): add pipeline_mode=pl.Buffered(3) on this weight spec
            #             if profiles show exposed DMA (pure weight streaming).
            pl.BlockSpec((tk_, tn_), lambda j, k: (k, j)),
            pl.BlockSpec((1, tn_), lambda j, k: (0, j)),
        ],
        out_specs=pl.BlockSpec((N, tn_), lambda j, k: (0, j)),
        compiler_params=pltpu.CompilerParams(
            dimension_semantics=("parallel", "arbitrary"),
            vmem_limit_bytes=32 * 1024 * 1024),
    )(x, Wt, b2d)
    return y if dout == Dout_p else y[:, :dout]


# -----------------------------------------------------------------------------
# Glue: Laplacian, one-time parameter prep, parameter init, full forward.
# -----------------------------------------------------------------------------
def normalized_laplacian(adj):
    V = adj.shape[0]
    d = jnp.sum(adj, axis=1)
    d_inv_sqrt = jnp.where(d > 0, 1.0 / jnp.sqrt(d), 0.0)
    return jnp.eye(V, dtype=adj.dtype) - d_inv_sqrt[:, None] * adj * d_inv_sqrt[None, :]


def prepare_params(params, adj):
    """One-time prep (off the hot path): rescaled Chebyshev Laplacian (incl.
    the O(V^3) eigvalsh lmax bound), fused/block-diagonal attention weights,
    pre-transposed + 128-padded bf16 linear weights."""
    V = adj.shape[0]
    L = normalized_laplacian(adj)
    lmax = jnp.max(jnp.linalg.eigvalsh(L))
    L_res = (2.0 / lmax) * L - jnp.eye(V, dtype=L.dtype)

    att_W = params["att_W"]                       # (H, nfeat, nhid)
    att_a = params["att_a"]                       # (H, 2*nhid)
    nheads, nfeat, nhid = att_W.shape
    C = nheads * nhid
    a1 = att_a[:, :nhid]
    a2 = att_a[:, nhid:]
    eyeH = jnp.eye(nheads, dtype=jnp.float32)
    A1 = jnp.einsum("hd,hg->hdg", a1, eyeH).reshape(C, nheads)    # block-diag
    A2T = jnp.einsum("hd,hg->ghd", a2, eyeH).reshape(nheads, C)

    prep = {
        "cfg": dict(params["cfg"], nhid=nhid, nheads=nheads),
        "L": L_res,
        "cl_Wrows": params["cl_W"].T,             # (K, nfeat)
        "cl_b": params["cl_b"].reshape(1, -1),
        "att_W_all": jnp.transpose(att_W, (1, 0, 2)).reshape(nfeat, C)
                         .astype(jnp.bfloat16),
        "att_A1": A1,
        "att_A2T": A2T,
    }
    for name in ("fc1", "fc2", "dec", "nnfc1", "nnfc2"):
        Wt = params[name + "_W"].T                # (Din, Dout)
        Din, Dout = Wt.shape
        Din_p, Dout_p = _round_up(Din, 128), _round_up(Dout, 128)
        prep[name + "_Wt"] = jnp.pad(
            Wt, ((0, Din_p - Din), (0, Dout_p - Dout))).astype(jnp.bfloat16)
        prep[name + "_b"] = jnp.pad(
            params[name + "_b"], (0, Dout_p - Dout)).reshape(1, -1)
        prep[name + "_dout"] = Dout
    return prep


def gat_forward(prep, x, adj, conv_degree=3):
    cfg = prep["cfg"]
    B, V = x.shape
    x_nn = x  # deepcopy(x) in torch; functional here

    # fused: cheby conv + cl + ReLU + multi-head attention + ReLU + max-pool
    pooled = gat_fused(
        x.reshape(B, V, 1), prep["L"], prep["cl_Wrows"], prep["cl_b"],
        prep["att_W_all"], prep["att_A1"], prep["att_A2T"], adj,
        K=conv_degree, alpha=cfg["alpha"], nhid=cfg["nhid"],
        nheads=cfg["nheads"], poolsize=cfg["poolsize"])   # (B, V/p, H*nhid)
    flat = pooled.reshape(B, -1)

    x_enc = linear(flat, prep["fc1_Wt"], prep["fc1_b"], prep["fc1_dout"], "relu")
    x_rec = linear(x_enc, prep["dec_Wt"], prep["dec_b"], prep["dec_dout"], "none")

    x_nn = linear(x_nn, prep["nnfc1_Wt"], prep["nnfc1_b"], prep["nnfc1_dout"], "relu")
    x_nn = linear(x_nn, prep["nnfc2_Wt"], prep["nnfc2_b"], prep["nnfc2_dout"], "relu")

    cat = jnp.concatenate([x_enc, x_nn], axis=1)
    y_preds = linear(cat, prep["fc2_Wt"], prep["fc2_b"], prep["fc2_dout"],
                     "relu_logsoftmax")
    return x_rec, y_preds


def _init_linear(key, dout, din):
    k1, k2 = jax.random.split(key)
    bound = 1.0 / jnp.sqrt(din)
    W = jax.random.uniform(k1, (dout, din), jnp.float32, -bound, bound)
    b = jax.random.uniform(k2, (dout,), jnp.float32, -bound, bound)
    return W, b


def init_params(key, *, nfeat, nhid, nclass, alpha, nheads, n_gene,
                poolsize, nn_embed, conv_degree):
    embed_size = 256
    keys = jax.random.split(key, 8)
    cl_W, cl_b = _init_linear(keys[0], nfeat, conv_degree)
    fc1_W, fc1_b = _init_linear(keys[1], embed_size,
                                nhid * nheads * n_gene // poolsize)
    fc2_W, fc2_b = _init_linear(keys[2], nclass, embed_size + nn_embed)
    dec_W, dec_b = _init_linear(keys[3], n_gene, embed_size)
    nnfc1_W, nnfc1_b = _init_linear(keys[4], 512, n_gene)
    nnfc2_W, nnfc2_b = _init_linear(keys[5], nn_embed, 512)
    att_W = 0.1 * jax.random.normal(keys[6], (nheads, nfeat, nhid), jnp.float32)
    att_a = 0.1 * jax.random.normal(keys[7], (nheads, 2 * nhid), jnp.float32)
    return {
        "cfg": {"alpha": alpha, "poolsize": poolsize},
        "cl_W": cl_W, "cl_b": cl_b,
        "fc1_W": fc1_W, "fc1_b": fc1_b,
        "fc2_W": fc2_W, "fc2_b": fc2_b,
        "dec_W": dec_W, "dec_b": dec_b,
        "nnfc1_W": nnfc1_W, "nnfc1_b": nnfc1_b,
        "nnfc2_W": nnfc2_W, "nnfc2_b": nnfc2_b,
        "att_W": att_W, "att_a": att_a,
    }


if __name__ == "__main__":
    # Small, TPU-friendly shapes (C = nheads*nhid = 128 -> lane-dense output).
    B, n_gene = 2, 128
    nfeat, nhid, nheads = 16, 32, 4
    nclass, poolsize, nn_embed = 8, 8, 64
    alpha, conv_degree = 0.2, 3

    key = jax.random.PRNGKey(0)
    k_x, k_adj, k_p = jax.random.split(key, 3)

    x = jax.random.normal(k_x, (B, n_gene), jnp.float32)
    rnd = jax.random.uniform(k_adj, (n_gene, n_gene))
    adj = jnp.asarray(
        ((rnd > 0.9) | (rnd.T > 0.9) | jnp.eye(n_gene, dtype=bool)), jnp.float32)

    params = init_params(k_p, nfeat=nfeat, nhid=nhid, nclass=nclass, alpha=alpha,
                         nheads=nheads, n_gene=n_gene, poolsize=poolsize,
                         nn_embed=nn_embed, conv_degree=conv_degree)
    prep = prepare_params(params, adj)        # one-time: L_res, bf16 weights

    x_rec, y_preds = gat_forward(prep, x, adj, conv_degree=conv_degree)
    jax.block_until_ready((x_rec, y_preds))

    assert x_rec.shape == (B, n_gene)
    assert y_preds.shape == (B, nclass)
    print("KERNEL_OK")
</pallas_src>

<mosaic_0001>
module attributes {stable_mosaic.version = 11 : i64} {
  func.func @_gat_fused_kernel(%arg0: i32, %arg1: memref<1x128x1xf32, #tpu.memory_space<vmem>>, %arg2: memref<128x128xf32, #tpu.memory_space<vmem>>, %arg3: memref<3x16xf32, #tpu.memory_space<vmem>>, %arg4: memref<1x16xf32, #tpu.memory_space<vmem>>, %arg5: memref<16x128xbf16, #tpu.memory_space<vmem>>, %arg6: memref<128x4xf32, #tpu.memory_space<vmem>>, %arg7: memref<4x128xf32, #tpu.memory_space<vmem>>, %arg8: memref<128x128xf32, #tpu.memory_space<vmem>>, %arg9: memref<1x16x128xf32, #tpu.memory_space<vmem>>, %arg10: memref<128x128xf32, #tpu.memory_space<vmem>>) attributes {dimension_semantics = [#tpu.dimension_semantics<parallel>], iteration_bounds = array<i64: 2>, scalar_prefetch = 0 : i64, scratch_operands = 1 : i64, tpu.core_type = #tpu.core_type<tc>, window_params = [{transform_indices = @transform_0, window_bounds = array<i64: 1, 128, 1>}, {pipeline_mode = #tpu.pipeline_mode<synchronous>, transform_indices = @transform_1, window_bounds = array<i64: 128, 128>}, {pipeline_mode = #tpu.pipeline_mode<synchronous>, transform_indices = @transform_2, window_bounds = array<i64: 3, 16>}, {pipeline_mode = #tpu.pipeline_mode<synchronous>, transform_indices = @transform_3, window_bounds = array<i64: 1, 16>}, {pipeline_mode = #tpu.pipeline_mode<synchronous>, transform_indices = @transform_4, window_bounds = array<i64: 16, 128>}, {pipeline_mode = #tpu.pipeline_mode<synchronous>, transform_indices = @transform_5, window_bounds = array<i64: 128, 4>}, {pipeline_mode = #tpu.pipeline_mode<synchronous>, transform_indices = @transform_6, window_bounds = array<i64: 4, 128>}, {pipeline_mode = #tpu.pipeline_mode<synchronous>, transform_indices = @transform_7, window_bounds = array<i64: 128, 128>}, {transform_indices = @transform_8, window_bounds = array<i64: 1, 16, 128>}]} {
    %c0 = arith.constant 0 : index
    %c0_0 = arith.constant 0 : index
    %0 = vector.load %arg2[%c0, %c0_0] : memref<128x128xf32, #tpu.memory_space<vmem>>, vector<128x128xf32>
    %c0_1 = arith.constant 0 : index
    %c0_2 = arith.constant 0 : index
    %c0_3 = arith.constant 0 : index
    %1 = vector.load %arg1[%c0_1, %c0_2, %c0_3] : memref<1x128x1xf32, #tpu.memory_space<vmem>>, vector<1x128x1xf32>
    %2 = vector.shape_cast %1 : vector<1x128x1xf32> to vector<128x1xf32>
    %cst = arith.constant dense<0.000000e+00> : vector<128x1xf32>
    %3 = tpu.matmul %0, %2, %cst {dimension_numbers = #tpu.dot_dimension_numbers<[1], [0], [0], [1], [0, 0, 1, 1], [], []>} : vector<128x128xf32>, vector<128x1xf32>, vector<128x1xf32> -> vector<128x1xf32>
    %cst_4 = arith.constant dense<0.000000e+00> : vector<128x1xf32>
    %4 = tpu.matmul %0, %3, %cst_4 {dimension_numbers = #tpu.dot_dimension_numbers<[1], [0], [0], [1], [0, 0, 1, 1], [], []>} : vector<128x128xf32>, vector<128x1xf32>, vector<128x1xf32> -> vector<128x1xf32>
    %cst_5 = arith.constant 2.000000e+00 : f32
    %5 = vector.broadcast %cst_5 : f32 to vector<128x1xf32>
    %6 = arith.mulf %5, %4 : vector<128x1xf32>
    %7 = arith.subf %6, %2 : vector<128x1xf32>
    %c0_6 = arith.constant 0 : index
    %c0_7 = arith.constant 0 : index
    %8 = vector.load %arg4[%c0_6, %c0_7] : memref<1x16xf32, #tpu.memory_space<vmem>>, vector<1x16xf32>
    %c0_8 = arith.constant 0 : index
    %c0_9 = arith.constant 0 : index
    %9 = vector.load %arg3[%c0_8, %c0_9] : memref<3x16xf32, #tpu.memory_space<vmem>>, vector<1x16xf32>
    %10 = vector.broadcast %2 : vector<128x1xf32> to vector<128x16xf32>
    %11 = vector.broadcast %9 : vector<1x16xf32> to vector<128x16xf32>
    %12 = arith.mulf %10, %11 : vector<128x16xf32>
    %13 = vector.broadcast %8 : vector<1x16xf32> to vector<128x16xf32>
    %14 = arith.addf %13, %12 : vector<128x16xf32>
    %c1 = arith.constant 1 : index
    %c0_10 = arith.constant 0 : index
    %15 = vector.load %arg3[%c1, %c0_10] : memref<3x16xf32, #tpu.memory_space<vmem>>, vector<1x16xf32>
    %16 = vector.broadcast %3 : vector<128x1xf32> to vector<128x16xf32>
    %17 = vector.broadcast %15 : vector<1x16xf32> to vector<128x16xf32>
    %18 = arith.mulf %16, %17 : vector<128x16xf32>
    %19 = arith.addf %14, %18 : vector<128x16xf32>
    %c2 = arith.constant 2 : index
    %c0_11 = arith.constant 0 : index
    %20 = vector.load %arg3[%c2, %c0_11] : memref<3x16xf32, #tpu.memory_space<vmem>>, vector<1x16xf32>
    %21 = vector.broadcast %7 : vector<128x1xf32> to vector<128x16xf32>
    %22 = vector.broadcast %20 : vector<1x16xf32> to vector<128x16xf32>
    %23 = arith.mulf %21, %22 : vector<128x16xf32>
    %24 = arith.addf %19, %23 : vector<128x16xf32>
    %cst_12 = arith.constant 0.000000e+00 : f32
    %25 = vector.broadcast %cst_12 : f32 to vector<128x16xf32>
    %26 = arith.maximumf %24, %25 : vector<128x16xf32>
    %27 = arith.truncf %26 : vector<128x16xf32> to vector<128x16xbf16>
    %c0_13 = arith.constant 0 : index
    %c0_14 = arith.constant 0 : index
    %28 = vector.load %arg5[%c0_13, %c0_14] : memref<16x128xbf16, #tpu.memory_space<vmem>>, vector<16x128xbf16>
    %cst_15 = arith.constant dense<0.000000e+00> : vector<128x128xf32>
    %29 = tpu.matmul %27, %28, %cst_15 {dimension_numbers = #tpu.dot_dimension_numbers<[1], [0], [0], [1], [0, 0, 1, 1], [], []>} : vector<128x16xbf16>, vector<16x128xbf16>, vector<128x128xf32> -> vector<128x128xf32>
    %c0_16 = arith.constant 0 : index
    %c0_17 = arith.constant 0 : index
    %30 = vector.load %arg6[%c0_16, %c0_17] : memref<128x4xf32, #tpu.memory_space<vmem>>, vector<128x4xf32>
    %cst_18 = arith.constant dense<0.000000e+00> : vector<128x4xf32>
    %31 = tpu.matmul %29, %30, %cst_18 {dimension_numbers = #tpu.dot_dimension_numbers<[1], [0], [0], [1], [0, 0, 1, 1], [], []>} : vector<128x128xf32>, vector<128x4xf32>, vector<128x4xf32> -> vector<128x4xf32>
    %c0_19 = arith.constant 0 : index
    %c0_20 = arith.constant 0 : index
    %32 = vector.load %arg7[%c0_19, %c0_20] : memref<4x128xf32, #tpu.memory_space<vmem>>, vector<4x128xf32>
    %cst_21 = arith.constant dense<0.000000e+00> : vector<4x128xf32>
    %33 = tpu.matmul %32, %29, %cst_21 {dimension_numbers = #tpu.dot_dimension_numbers<[1], [1], [0], [0], [0, 0, 1, 0], [], []>} : vector<4x128xf32>, vector<128x128xf32>, vector<4x128xf32> -> vector<4x128xf32>
    %c0_22 = arith.constant 0 : index
    %c0_23 = arith.constant 0 : index
    %34 = vector.load %arg8[%c0_22, %c0_23] : memref<128x128xf32, #tpu.memory_space<vmem>>, vector<128x128xf32>
    %cst_24 = arith.constant 0.000000e+00 : f32
    %35 = vector.broadcast %cst_24 : f32 to vector<128x128xf32>
    %36 = arith.cmpf ogt, %34, %35 : vector<128x128xf32>
    %37 = arith.truncf %29 : vector<128x128xf32> to vector<128x128xbf16>
    %38 = vector.extract_strided_slice %31 {offsets = [0, 0], sizes = [128, 1], strides = [1, 1]} : vector<128x4xf32> to vector<128x1xf32>
    %39 = vector.extract_strided_slice %33 {offsets = [0, 0], sizes = [1, 128], strides = [1, 1]} : vector<4x128xf32> to vector<1x128xf32>
    %40 = vector.broadcast %38 : vector<128x1xf32> to vector<128x128xf32>
    %41 = vector.broadcast %39 : vector<1x128xf32> to vector<128x128xf32>
    %42 = arith.addf %40, %41 : vector<128x128xf32>
    %cst_25 = arith.constant 0.000000e+00 : f32
    %43 = vector.broadcast %cst_25 : f32 to vector<128x128xf32>
    %44 = arith.cmpf ogt, %42, %43 : vector<128x128xf32>
    %cst_26 = arith.constant 2.000000e-01 : f32
    %45 = vector.broadcast %cst_26 : f32 to vector<128x128xf32>
    %46 = arith.mulf %45, %42 : vector<128x128xf32>
    %47 = arith.select %44, %42, %46 : vector<128x128xi1>, vector<128x128xf32>
    %cst_27 = arith.constant -9.000000e+15 : f32
    %48 = vector.broadcast %cst_27 : f32 to vector<128x128xf32>
    %49 = arith.select %36, %47, %48 : vector<128x128xi1>, vector<128x128xf32>
    %cst_28 = arith.constant dense<0xFF800000> : vector<128xf32>
    %50 = vector.multi_reduction <maximumf>, %49, %cst_28 [1] : vector<128x128xf32> to vector<128xf32>
    %51 = vector.shape_cast %50 : vector<128xf32> to vector<128x1xf32>
    %52 = vector.broadcast %51 : vector<128x1xf32> to vector<128x128xf32>
    %53 = arith.subf %49, %52 : vector<128x128xf32>
    %54 = math.exp %53 : vector<128x128xf32>
    %cst_29 = arith.constant dense<0.000000e+00> : vector<128xf32>
    %55 = vector.multi_reduction <add>, %54, %cst_29 [1] : vector<128x128xf32> to vector<128xf32>
    %56 = vector.shape_cast %55 : vector<128xf32> to vector<128x1xf32>
    %57 = tpu.reciprocal %56 {approx = true} : vector<128x1xf32> -> vector<128x1xf32>
    %58 = vector.broadcast %57 : vector<128x1xf32> to vector<128x128xf32>
    %59 = arith.mulf %54, %58 : vector<128x128xf32>
    %60 = arith.truncf %59 : vector<128x128xf32> to vector<128x128xbf16>
    %61 = vector.extract_strided_slice %37 {offsets = [0, 0], sizes = [128, 32], strides = [1, 1]} : vector<128x128xbf16> to vector<128x32xbf16>
    %cst_30 = arith.constant dense<0.000000e+00> : vector<128x32xf32>
    %62 = tpu.matmul %60, %61, %cst_30 {dimension_numbers = #tpu.dot_dimension_numbers<[1], [0], [0], [1], [0, 0, 1, 1], [], []>} : vector<128x128xbf16>, vector<128x32xbf16>, vector<128x32xf32> -> vector<128x32xf32>
    %c0_31 = arith.constant 0 : index
    %c0_32 = arith.constant 0 : index
    %63 = vector.load %arg10[%c0_31, %c0_32] : memref<128x128xf32, #tpu.memory_space<vmem>>, vector<128x32xf32>
    tpu.vector_store %arg10[%c0_31, %c0_32], %62 {strides = array<i32>} : memref<128x128xf32, #tpu.memory_space<vmem>>, vector<128x32xf32>,
    %64 = vector.extract_strided_slice %31 {offsets = [0, 1], sizes = [128, 1], strides = [1, 1]} : vector<128x4xf32> to vector<128x1xf32>
    %65 = vector.extract_strided_slice %33 {offsets = [1, 0], sizes = [1, 128], strides = [1, 1]} : vector<4x128xf32> to vector<1x128xf32>
    %66 = vector.broadcast %64 : vector<128x1xf32> to vector<128x128xf32>
    %67 = vector.broadcast %65 : vector<1x128xf32> to vector<128x128xf32>
    %68 = arith.addf %66, %67 : vector<128x128xf32>
    %cst_33 = arith.constant 0.000000e+00 : f32
    %69 = vector.broadcast %cst_33 : f32 to vector<128x128xf32>
    %70 = arith.cmpf ogt, %68, %69 : vector<128x128xf32>
    %cst_34 = arith.constant 2.000000e-01 : f32
    %71 = vector.broadcast %cst_34 : f32 to vector<128x128xf32>
    %72 = arith.mulf %71, %68 : vector<128x128xf32>
    %73 = arith.select %70, %68, %72 : vector<128x128xi1>, vector<128x128xf32>
    %cst_35 = arith.constant -9.000000e+15 : f32
    %74 = vector.broadcast %cst_35 : f32 to vector<128x128xf32>
    %75 = arith.select %36, %73, %74 : vector<128x128xi1>, vector<128x128xf32>
    %cst_36 = arith.constant dense<0xFF800000> : vector<128xf32>
    %76 = vector.multi_reduction <maximumf>, %75, %cst_36 [1] : vector<128x128xf32> to vector<128xf32>
    %77 = vector.shape_cast %76 : vector<128xf32> to vector<128x1xf32>
    %78 = vector.broadcast %77 : vector<128x1xf32> to vector<128x128xf32>
    %79 = arith.subf %75, %78 : vector<128x128xf32>
    %80 = math.exp %79 : vector<128x128xf32>
    %cst_37 = arith.constant dense<0.000000e+00> : vector<128xf32>
    %81 = vector.multi_reduction <add>, %80, %cst_37 [1] : vector<128x128xf32> to vector<128xf32>
    %82 = vector.shape_cast %81 : vector<128xf32> to vector<128x1xf32>
    %83 = tpu.reciprocal %82 {approx = true} : vector<128x1xf32> -> vector<128x1xf32>
    %84 = vector.broadcast %83 : vector<128x1xf32> to vector<128x128xf32>
    %85 = arith.mulf %80, %84 : vector<128x128xf32>
    %86 = arith.truncf %85 : vector<128x128xf32> to vector<128x128xbf16>
    %87 = vector.extract_strided_slice %37 {offsets = [0, 32], sizes = [128, 32], strides = [1, 1]} : vector<128x128xbf16> to vector<128x32xbf16>
    %cst_38 = arith.constant dense<0.000000e+00> : vector<128x32xf32>
    %88 = tpu.matmul %86, %87, %cst_38 {dimension_numbers = #tpu.dot_dimension_numbers<[1], [0], [0], [1], [0, 0, 1, 1], [], []>} : vector<128x128xbf16>, vector<128x32xbf16>, vector<128x32xf32> -> vector<128x32xf32>
    %c0_39 = arith.constant 0 : index
    %c32 = arith.constant 32 : index
    %89 = vector.load %arg10[%c0_39, %c32] : memref<128x128xf32, #tpu.memory_space<vmem>>, vector<128x32xf32>
    tpu.vector_store %arg10[%c0_39, %c32], %88 {strides = array<i32>} : memref<128x128xf32, #tpu.memory_space<vmem>>, vector<128x32xf32>,
    %90 = vector.extract_strided_slice %31 {offsets = [0, 2], sizes = [128, 1], strides = [1, 1]} : vector<128x4xf32> to vector<128x1xf32>
    %91 = vector.extract_strided_slice %33 {offsets = [2, 0], sizes = [1, 128], strides = [1, 1]} : vector<4x128xf32> to vector<1x128xf32>
    %92 = vector.broadcast %90 : vector<128x1xf32> to vector<128x128xf32>
    %93 = vector.broadcast %91 : vector<1x128xf32> to vector<128x128xf32>
    %94 = arith.addf %92, %93 : vector<128x128xf32>
    %cst_40 = arith.constant 0.000000e+00 : f32
    %95 = vector.broadcast %cst_40 : f32 to vector<128x128xf32>
    %96 = arith.cmpf ogt, %94, %95 : vector<128x128xf32>
    %cst_41 = arith.constant 2.000000e-01 : f32
    %97 = vector.broadcast %cst_41 : f32 to vector<128x128xf32>
    %98 = arith.mulf %97, %94 : vector<128x128xf32>
    %99 = arith.select %96, %94, %98 : vector<128x128xi1>, vector<128x128xf32>
    %cst_42 = arith.constant -9.000000e+15 : f32
    %100 = vector.broadcast %cst_42 : f32 to vector<128x128xf32>
    %101 = arith.select %36, %99, %100 : vector<128x128xi1>, vector<128x128xf32>
    %cst_43 = arith.constant dense<0xFF800000> : vector<128xf32>
    %102 = vector.multi_reduction <maximumf>, %101, %cst_43 [1] : vector<128x128xf32> to vector<128xf32>
    %103 = vector.shape_cast %102 : vector<128xf32> to vector<128x1xf32>
    %104 = vector.broadcast %103 : vector<128x1xf32> to vector<128x128xf32>
    %105 = arith.subf %101, %104 : vector<128x128xf32>
    %106 = math.exp %105 : vector<128x128xf32>
    %cst_44 = arith.constant dense<0.000000e+00> : vector<128xf32>
    %107 = vector.multi_reduction <add>, %106, %cst_44 [1] : vector<128x128xf32> to vector<128xf32>
    %108 = vector.shape_cast %107 : vector<128xf32> to vector<128x1xf32>
    %109 = tpu.reciprocal %108 {approx = true} : vector<128x1xf32> -> vector<128x1xf32>
    %110 = vector.broadcast %109 : vector<128x1xf32> to vector<128x128xf32>
    %111 = arith.mulf %106, %110 : vector<128x128xf32>
    %112 = arith.truncf %111 : vector<128x128xf32> to vector<128x128xbf16>
    %113 = vector.extract_strided_slice %37 {offsets = [0, 64], sizes = [128, 32], strides = [1, 1]} : vector<128x128xbf16> to vector<128x32xbf16>
    %cst_45 = arith.constant dense<0.000000e+00> : vector<128x32xf32>
    %114 = tpu.matmul %112, %113, %cst_45 {dimension_numbers = #tpu.dot_dimension_numbers<[1], [0], [0], [1], [0, 0, 1, 1], [], []>} : vector<128x128xbf16>, vector<128x32xbf16>, vector<128x32xf32> -> vector<128x32xf32>
    %c0_46 = arith.constant 0 : index
    %c64 = arith.constant 64 : index
    %115 = vector.load %arg10[%c0_46, %c64] : memref<128x128xf32, #tpu.memory_space<vmem>>, vector<128x32xf32>
    tpu.vector_store %arg10[%c0_46, %c64], %114 {strides = array<i32>} : memref<128x128xf32, #tpu.memory_space<vmem>>, vector<128x32xf32>,
    %116 = vector.extract_strided_slice %31 {offsets = [0, 3], sizes = [128, 1], strides = [1, 1]} : vector<128x4xf32> to vector<128x1xf32>
    %117 = vector.extract_strided_slice %33 {offsets = [3, 0], sizes = [1, 128], strides = [1, 1]} : vector<4x128xf32> to vector<1x128xf32>
    %118 = vector.broadcast %116 : vector<128x1xf32> to vector<128x128xf32>
    %119 = vector.broadcast %117 : vector<1x128xf32> to vector<128x128xf32>
    %120 = arith.addf %118, %119 : vector<128x128xf32>
    %cst_47 = arith.constant 0.000000e+00 : f32
    %121 = vector.broadcast %cst_47 : f32 to vector<128x128xf32>
    %122 = arith.cmpf ogt, %120, %121 : vector<128x128xf32>
    %cst_48 = arith.constant 2.000000e-01 : f32
    %123 = vector.broadcast %cst_48 : f32 to vector<128x128xf32>
    %124 = arith.mulf %123, %120 : vector<128x128xf32>
    %125 = arith.select %122, %120, %124 : vector<128x128xi1>, vector<128x128xf32>
    %cst_49 = arith.constant -9.000000e+15 : f32
    %126 = vector.broadcast %cst_49 : f32 to vector<128x128xf32>
    %127 = arith.select %36, %125, %126 : vector<128x128xi1>, vector<128x128xf32>
    %cst_50 = arith.constant dense<0xFF800000> : vector<128xf32>
    %128 = vector.multi_reduction <maximumf>, %127, %cst_50 [1] : vector<128x128xf32> to vector<128xf32>
    %129 = vector.shape_cast %128 : vector<128xf32> to vector<128x1xf32>
    %130 = vector.broadcast %129 : vector<128x1xf32> to vector<128x128xf32>
    %131 = arith.subf %127, %130 : vector<128x128xf32>
    %132 = math.exp %131 : vector<128x128xf32>
    %cst_51 = arith.constant dense<0.000000e+00> : vector<128xf32>
    %133 = vector.multi_reduction <add>, %132, %cst_51 [1] : vector<128x128xf32> to vector<128xf32>
    %134 = vector.shape_cast %133 : vector<128xf32> to vector<128x1xf32>
    %135 = tpu.reciprocal %134 {approx = true} : vector<128x1xf32> -> vector<128x1xf32>
    %136 = vector.broadcast %135 : vector<128x1xf32> to vector<128x128xf32>
    %137 = arith.mulf %132, %136 : vector<128x128xf32>
    %138 = arith.truncf %137 : vector<128x128xf32> to vector<128x128xbf16>
    %139 = vector.extract_strided_slice %37 {offsets = [0, 96], sizes = [128, 32], strides = [1, 1]} : vector<128x128xbf16> to vector<128x32xbf16>
    %cst_52 = arith.constant dense<0.000000e+00> : vector<128x32xf32>
    %140 = tpu.matmul %138, %139, %cst_52 {dimension_numbers = #tpu.dot_dimension_numbers<[1], [0], [0], [1], [0, 0, 1, 1], [], []>} : vector<128x128xbf16>, vector<128x32xbf16>, vector<128x32xf32> -> vector<128x32xf32>
    %c0_53 = arith.constant 0 : index
    %c96 = arith.constant 96 : index
    %141 = vector.load %arg10[%c0_53, %c96] : memref<128x128xf32, #tpu.memory_space<vmem>>, vector<128x32xf32>
    tpu.vector_store %arg10[%c0_53, %c96], %140 {strides = array<i32>} : memref<128x128xf32, #tpu.memory_space<vmem>>, vector<128x32xf32>,
    %c0_54 = arith.constant 0 : index
    %c0_55 = arith.constant 0 : index
    %142 = vector.load %arg10[%c0_54, %c0_55] : memref<128x128xf32, #tpu.memory_space<vmem>>, vector<128x128xf32>
    %cst_56 = arith.constant 0.000000e+00 : f32
    %143 = vector.broadcast %cst_56 : f32 to vector<128x128xf32>
    %144 = arith.maximumf %142, %143 : vector<128x128xf32>
    %145 = vector.shape_cast %144 : vector<128x128xf32> to vector<16x8x128xf32>
    %cst_57 = arith.constant dense<0xFF800000> : vector<16x128xf32>
    %146 = vector.multi_reduction <maximumf>, %145, %cst_57 [1] : vector<16x8x128xf32> to vector<16x128xf32>
    %c0_58 = arith.constant 0 : index
    %c0_59 = arith.constant 0 : index
    %c0_60 = arith.constant 0 : index
    %147 = vector.load %arg9[%c0_58, %c0_59, %c0_60] : memref<1x16x128xf32, #tpu.memory_space<vmem>>, vector<1x16x128xf32>
    %148 = vector.shape_cast %147 : vector<1x16x128xf32> to vector<16x128xf32>
    %149 = vector.shape_cast %146 : vector<16x128xf32> to vector<1x16x128xf32>
    tpu.vector_store %arg9[%c0_58, %c0_59, %c0_60], %149 {strides = array<i32>} : memref<1x16x128xf32, #tpu.memory_space<vmem>>, vector<1x16x128xf32>,
    return
  }
  func.func @transform_0(%arg0: i32) -> (i32, i32, i32) {
    %c0_i32 = arith.constant 0 : i32
    %c0_i32_0 = arith.constant 0 : i32
    %c0_i32_1 = arith.constant 0 : i32
    return %arg0, %c0_i32, %c0_i32_0 : i32, i32, i32
  }
  func.func @transform_1(%arg0: i32) -> (i32, i32) {
    %c0_i32 = arith.constant 0 : i32
    %c0_i32_0 = arith.constant 0 : i32
    %c0_i32_1 = arith.constant 0 : i32
    return %c0_i32, %c0_i32_0 : i32, i32
  }
  func.func @transform_2(%arg0: i32) -> (i32, i32) {
    %c0_i32 = arith.constant 0 : i32
    %c0_i32_0 = arith.constant 0 : i32
    %c0_i32_1 = arith.constant 0 : i32
    return %c0_i32, %c0_i32_0 : i32, i32
  }
  func.func @transform_3(%arg0: i32) -> (i32, i32) {
    %c0_i32 = arith.constant 0 : i32
    %c0_i32_0 = arith.constant 0 : i32
    %c0_i32_1 = arith.constant 0 : i32
    return %c0_i32, %c0_i32_0 : i32, i32
  }
  func.func @transform_4(%arg0: i32) -> (i32, i32) {
    %c0_i32 = arith.constant 0 : i32
    %c0_i32_0 = arith.constant 0 : i32
    %c0_i32_1 = arith.constant 0 : i32
    return %c0_i32, %c0_i32_0 : i32, i32
  }
  func.func @transform_5(%arg0: i32) -> (i32, i32) {
    %c0_i32 = arith.constant 0 : i32
    %c0_i32_0 = arith.constant 0 : i32
    %c0_i32_1 = arith.constant 0 : i32
    return %c0_i32, %c0_i32_0 : i32, i32
  }
  func.func @transform_6(%arg0: i32) -> (i32, i32) {
    %c0_i32 = arith.constant 0 : i32
    %c0_i32_0 = arith.constant 0 : i32
    %c0_i32_1 = arith.constant 0 : i32
    return %c0_i32, %c0_i32_0 : i32, i32
  }
  func.func @transform_7(%arg0: i32) -> (i32, i32) {
    %c0_i32 = arith.constant 0 : i32
    %c0_i32_0 = arith.constant 0 : i32
    %c0_i32_1 = arith.constant 0 : i32
    return %c0_i32, %c0_i32_0 : i32, i32
  }
  func.func @transform_8(%arg0: i32) -> (i32, i32, i32) {
    %c0_i32 = arith.constant 0 : i32
    %c0_i32_0 = arith.constant 0 : i32
    %c0_i32_1 = arith.constant 0 : i32
    return %arg0, %c0_i32, %c0_i32_0 : i32, i32, i32
  }
}

</mosaic_0001>

<bundles_post_ra>
// kernel: tpu_custom_call.1
= control target key start
LH: loop header
LB: loop body
LE: loop exit
PB: predicated region body
PF: predicated region fallthrough
CT: control target
= control target key end

     0   :  { %13 = vsyncpa [#allocation4], 0  ;;  %s6778_s0 = inlined_call_operand.vmem [shape: f32[2,128,1], index: 0, kind: input, shape index: {}]   ;;  %s6779_s1 = inlined_call_operand.vmem [shape: f32[128,128], index: 1, kind: input, shape index: {}]   ;;  %s6780_s2 = inlined_call_operand.vmem [shape: f32[3,16], index: 2, kind: input, shape index: {}]   ;;  %s6781_s3 = inlined_call_operand.vmem [shape: f32[1,16], index: 3, kind: input, shape index: {}]   ;;  %s6782_s4 = inlined_call_operand.vmem [shape: bf16[16,128], index: 4, kind: input, shape index: {}]   ;;  %s6783_s5 = inlined_call_operand.vmem [shape: f32[128,4], index: 5, kind: input, shape index: {}]   ;;  %s6784_s6 = inlined_call_operand.vmem [shape: f32[4,128], index: 6, kind: input, shape index: {}]   ;;  %s6785_s7 = inlined_call_operand.vmem [shape: f32[128,128], index: 7, kind: input, shape index: {}]   ;;  %s6786_s8 = inlined_call_operand.hbm [shape: f32[2,16,128], index: 8, kind: output, shape index: {}]  }
   0x1   :  { %15 = vsyncpa [#allocation4 + $0x1], 0  ;;  %s4806_s27 = smov 0   ;;  %s4808_s28 = smov 0  }
   0x2   :  { %s4810_s29 = smov 0   ;;  %s4812_s30 = smov 0  }
   0x3 LB: > { %s4827_s9 = sadd.s32 4294967295, %s4746_s30   ;;  %s3632_s10 = sadd.s32 4294967294, %s4746_s30   ;;  %s4746_s30 = sphi %s4812_s30, %s6987_s30   ;;  %s4742_s29 = sphi %s4810_s29, %s6986_s29   ;;  %s4738_s28 = sphi %s4808_s28, %s6985_s28   ;;  %s4734_s27 = sphi %s4806_s27, %s6984_s27  }
   0x4   : > { %s4831_s11 = sadd.s32 1, %s4746_s30   ;;  %s201_s12 = sadd.s32 1, %s4742_s29 }
   0x5   : > { %s198_s13 = ssub.s32 %s4746_s30, %s4831_s11  ;;  %p211_p0 = scmp.ne.s32.totalorder %s4742_s29, %s4738_s28 }
   0x6   : > { %p199_p1 = scmp.eq.s32.totalorder %s198_s13, 0  ;;  %p212_p2 = scmp.eq.s32.totalorder %s4827_s9, 1 }
   0x7   : > { %p217_p3 = scmp.ne.s32.totalorder %s4738_s28, %s4734_s27  ;;  %p218_p4 = scmp.eq.s32.totalorder %s3632_s10, 1 }
   0x8   : > { %s4842_s14 = scalar_select %p199_p1, %s4742_s29, %s201_s12  }
   0x9   : > { %p4844_p5 = por %p212_p2, %p211_p0  ;;  %p4848_p6 = por %p218_p4, %p217_p3 }
   0xa   : > { %p3635_p7 = scmp.ge.s32.totalorder %s4746_s30, 1  ;;  %p265_p8 = scmp.lt.s32.totalorder %s4746_s30, 3 }
   0xc   : > { %p266_p9 = pnand %p3635_p7, %p265_p8 }
   0xe   : > { %269 = sbr.rel (%p266_p9) target bundleno = 2319 (0x90f), region = 52 }
  0x15   : > { %p299_p10 = scmp.lt.s32.totalorder %s4827_s9, 1  ;;  %v305_v0 = vld [vmem:[%s6779_s1] sm:$0xff]  ;;  %v4748_v1 = vmov 0   ;;  %v4949_v26 = vld [vmem:[%s6779_s1 + $0x8] sm:$0xff]  ;;  %v4954_v27 = vld [vmem:[%s6779_s1 + $0x10] sm:$0xff]  ;;  %vm1049_vm0 = vcmask 130048  }
  0x16   : > { %3877 = vmatprep.mubr.f32.mxu0 %v305_v0  ;;  %4366 = vset.pattern.permute.xlu1 %v4748_v1  ;;  %v4961_v28 = vld [vmem:[%s6779_s1 + $0x18] sm:$0xff]  ;;  %v4966_v29 = vld [vmem:[%s6779_s1 + $0x20] sm:$0xff]  ;;  %v4973_v30 = vld [vmem:[%s6779_s1 + $0x28] sm:$0xff]  ;;  %vm4750_vm1 = vmmov 0   ;;  %s4752_s18 = smov 64   ;;  %s3658_s25 = sshll.u32 %s4827_s9, 8 }
  0x17   : > { %s300_s19 = scalar_select %p299_p10, %s4827_s9, 1  ;;  %4365 = vset.pattern.permute.xlu0 %v4748_v1  ;;  %3933 = vmatprep.mubr.f32.mxu1 %v305_v0  ;;  %v4978_v31 = vld [vmem:[%s6779_s1 + $0x30] sm:$0xff]  ;;  %v4985_v32 = vld [vmem:[%s6779_s1 + $0x38] sm:$0xff]  ;;  %v4990_v33 = vld [vmem:[%s6779_s1 + $0x40] sm:$0xff] }
  0x18   : > { %v4997_v34 = vld [vmem:[%s6779_s1 + $0x48] sm:$0xff]  ;;  %v5002_v35 = vld [vmem:[%s6779_s1 + $0x50] sm:$0xff]  ;;  %v5009_v36 = vld [vmem:[%s6779_s1 + $0x58] sm:$0xff]  ;;  %s6728_s13 = scalar_lea.hbm %s6786_s8, %s3658_s25  ;;  %s4758_s21 = smov [#allocation3]  }
  0x19   : > { %s3657_s20 = sshll.u32 %s300_s19, 7  ;;  %v5014_v37 = vld [vmem:[%s6779_s1 + $0x60] sm:$0xff]  ;;  %v5021_v38 = vld [vmem:[%s6779_s1 + $0x68] sm:$0xff]  ;;  %v5026_v39 = vld [vmem:[%s6779_s1 + $0x70] sm:$0xff]  ;;  %s4753_s19 = smov 96  }
  0x1a   : > { %s4864_s23 = scalar_lea.vmem %s6778_s0, %s3657_s20  ;;  %v5033_v40 = vld [vmem:[%s6779_s1 + $0x78] sm:$0xff]  ;;  %s4754_s20 = smov 32  }
  0x1b   : > { %v4867_v2 = vld [vmem:[%s4864_s23] sm:$0xff]  ;;  %v4870_v3 = vld [vmem:[%s4864_s23 + $0x8] sm:$0xff]  ;;  %v4873_v4 = vld [vmem:[%s4864_s23 + $0x10] sm:$0xff]  ;;  %s4688_s22 = sshll.u32 %s4758_s21, 4  ;;  %s4689_s22 = int_to_ptr.vmem [resolvable:$false] %s4688_s22 }
  0x1c   : > { %v4194_v5 = vpack.c.bf16 %v4870_v3, %v4867_v2  ;;  %v4878_v6 = vld [vmem:[%s4864_s23 + $0x18] sm:$0xff]  ;;  %673 = vperm.xlu1 %4366, %v4873_v4   ;;  %663 = vperm.xlu0 %4365, %v4867_v2   ;;  %v4885_v8 = vld [vmem:[%s4864_s23 + $0x20] sm:$0xff]  ;;  %v4888_v9 = vld [vmem:[%s4864_s23 + $0x28] sm:$0xff] }
  0x1d   : > { %v4198_v7 = vpack.c.bf16 %v4878_v6, %v4873_v4  ;;  %v4202_v10 = vpack.c.bf16 %v4888_v9, %v4885_v8  ;;  %v4894_v11 = vld [vmem:[%s4864_s23 + $0x30] sm:$0xff]  ;;  %v4897_v12 = vld [vmem:[%s4864_s23 + $0x38] sm:$0xff]  ;;  %v4904_v14 = vld [vmem:[%s4864_s23 + $0x40] sm:$0xff] }
  0x1e   : > { %4195 = vmatprep.subr.bf16.mxu0 %v4194_v5  ;;  %v4206_v13 = vpack.c.bf16 %v4897_v12, %v4894_v11  ;;  %v4907_v15 = vld [vmem:[%s4864_s23 + $0x48] sm:$0xff]  ;;  %v4914_v17 = vld [vmem:[%s4864_s23 + $0x50] sm:$0xff]  ;;  %v4917_v18 = vld [vmem:[%s4864_s23 + $0x58] sm:$0xff] }
  0x1f   : > { %4197 = vmatpush3.bf16.msra.mxu0 %v4194_v5  ;;  %v4210_v16 = vpack.c.bf16 %v4907_v15, %v4904_v14  ;;  %v4214_v19 = vpack.c.bf16 %v4917_v18, %v4914_v17  ;;  %v4924_v20 = vld [vmem:[%s4864_s23 + $0x60] sm:$0xff]  ;;  %v4927_v21 = vld [vmem:[%s4864_s23 + $0x68] sm:$0xff]  ;;  %v4934_v23 = vld [vmem:[%s4864_s23 + $0x70] sm:$0xff] }
  0x20   : > { %4199 = vmatprep.subr.bf16.mxu0 %v4198_v7  ;;  %678 = vperm.xlu1 %4366, %v4878_v6   ;;  %v4218_v22 = vpack.c.bf16 %v4927_v21, %v4924_v20  ;;  %v4937_v24 = vld [vmem:[%s4864_s23 + $0x78] sm:$0xff]  ;;  %v4427_v5 = vld [vmem:[%s6782_s4] sm:$0xff]   ;;  %s4690_s23 = scalar_lea.vmem %s4689_s22, 512 }
  0x21   : > { %668 = vperm.xlu0 %4365, %v4870_v3   ;;  %v4222_v25 = vpack.c.bf16 %v4937_v24, %v4934_v23 }
  0x23   : > { %4201 = vmatpush3.bf16.msra.mxu0 %v4198_v7 }
  0x24   : > { %4203 = vmatprep.subr.bf16.mxu0 %v4202_v10  ;;  %688 = vperm.xlu1 %4366, %v4888_v9  }
  0x25   : > { %683 = vperm.xlu0 %4365, %v4885_v8  }
  0x27   : > { %4205 = vmatpush3.bf16.msra.mxu0 %v4202_v10 }
  0x28   : > { %4207 = vmatprep.subr.bf16.mxu0 %v4206_v13  ;;  %698 = vperm.xlu1 %4366, %v4897_v12  }
  0x29   : > { %693 = vperm.xlu0 %4365, %v4894_v11  }
  0x2b   : > { %4209 = vmatpush3.bf16.msra.mxu0 %v4206_v13 }
  0x2c   : > { %4211 = vmatprep.subr.bf16.mxu0 %v4210_v16  ;;  %708 = vperm.xlu1 %4366, %v4907_v15  }
  0x2d   : > { %703 = vperm.xlu0 %4365, %v4904_v14  }
  0x2f   : > { %4213 = vmatpush3.bf16.msra.mxu0 %v4210_v16 }
  0x30   : > { %4215 = vmatprep.subr.bf16.mxu0 %v4214_v19  ;;  %718 = vperm.xlu1 %4366, %v4917_v18  }
  0x31   : > { %713 = vperm.xlu0 %4365, %v4914_v17  }
  0x33   : > { %4217 = vmatpush3.bf16.msra.mxu0 %v4214_v19 }
  0x34   : > { %4219 = vmatprep.subr.bf16.mxu0 %v4218_v22  ;;  %728 = vperm.xlu1 %4366, %v4927_v21  }
  0x35   : > { %723 = vperm.xlu0 %4365, %v4924_v20  }
  0x37   : > { %4221 = vmatpush3.bf16.msra.mxu0 %v4218_v22 }
  0x38   : > { %4223 = vmatprep.subr.bf16.mxu0 %v4222_v25  ;;  %738 = vperm.xlu1 %4366, %v4937_v24  }
  0x39   : > { %733 = vperm.xlu0 %4365, %v4934_v23  }
  0x3b   : > { %4225 = vmatpush3.bf16.msra.mxu0 %v4222_v25 }
  0x3c   : > { %3957 = vmatprep.subr.bf16.mxu0 %v4427_v5 }
  0x3e   : > { %3878 = vmatmul.mubr.f32.vlgmr.msra.gmra.mrb[0].mxu0 %v4949_v26 }
  0x3f   : > { %3880 = vmatprep.mubr.f32.mxu0 %v4954_v27  ;;  %3958 = vmatpush3.bf16.msra.mxu0 %v4427_v5  ;;  %v1178_v5 = vld [vmem:[%s6783_s5 + $0x38] sm:$0xff] }
  0x42   : > { %3881 = vmatmul.mubr.f32.gmra.mrb[2].mxu0 %v4961_v28 }
  0x43   : > { %3883 = vmatprep.mubr.f32.mxu0 %v4966_v29 }
  0x46   : > { %3884 = vmatmul.mubr.f32.gmra.mrb[4].mxu0 %v4973_v30 }
  0x47   : > { %3886 = vmatprep.mubr.f32.mxu0 %v4978_v31 }
  0x4a   : > { %3887 = vmatmul.mubr.f32.gmra.mrb[6].mxu0 %v4985_v32 }
  0x4b   : > { %3889 = vmatprep.mubr.f32.mxu0 %v4990_v33 }
  0x4e   : > { %3890 = vmatmul.mubr.f32.gmra.mrb[8].mxu0 %v4997_v34 }
  0x4f   : > { %3892 = vmatprep.mubr.f32.mxu0 %v5002_v35 }
  0x52   : > { %3893 = vmatmul.mubr.f32.gmra.mrb[10].mxu0 %v5009_v36 }
  0x53   : > { %3895 = vmatprep.mubr.f32.mxu0 %v5014_v37 }
  0x56   : > { %3896 = vmatmul.mubr.f32.gmra.mrb[12].mxu0 %v5021_v38 }
  0x57   : > { %3898 = vmatprep.mubr.f32.mxu0 %v5026_v39 }
  0x5a   : > { %3899 = vmatmul.mubr.f32.gmra.mrb[14].mxu0 %v5033_v40 }
 0x111   : > { %v3879_v41 = vpop.f32.mrb[0].mxu0 }
 0x112   : > { %791 = vperm.xlu1 %4366, %v3879_v41   ;;  %v403_v42 = vpop.f32.mrb[1].mxu0 }
 0x113   : > { %786 = vperm.xlu0 %4365, %v403_v42   ;;  %v4226_v43 = vpack.c.bf16 %v3879_v41, %v403_v42 }
 0x115   : > { %v3882_v44 = vpop.f32.mrb[2].mxu0  ;;  %4227 = vmatprep.subr.bf16.mxu1 %v4226_v43 }
 0x116   : > { %4229 = vmatpush3.bf16.msra.mxu1 %v4226_v43  ;;  %801 = vperm.xlu1 %4366, %v3882_v44   ;;  %v413_v45 = vpop.f32.mrb[3].mxu0 }
 0x117   : > { %v4230_v46 = vpack.c.bf16 %v3882_v44, %v413_v45  ;;  %796 = vperm.xlu0 %4365, %v413_v45  }
 0x119   : > { %v3885_v47 = vpop.f32.mrb[4].mxu0  ;;  %4231 = vmatprep.subr.bf16.mxu1 %v4230_v46 }
 0x11a   : > { %4233 = vmatpush3.bf16.msra.mxu1 %v4230_v46  ;;  %811 = vperm.xlu1 %4366, %v3885_v47   ;;  %v423_v48 = vpop.f32.mrb[5].mxu0 }
 0x11b   : > { %v4234_v49 = vpack.c.bf16 %v3885_v47, %v423_v48  ;;  %806 = vperm.xlu0 %4365, %v423_v48  }
 0x11d   : > { %v3888_v50 = vpop.f32.mrb[6].mxu0  ;;  %4235 = vmatprep.subr.bf16.mxu1 %v4234_v49 }
 0x11e   : > { %4237 = vmatpush3.bf16.msra.mxu1 %v4234_v49  ;;  %821 = vperm.xlu1 %4366, %v3888_v50   ;;  %v433_v51 = vpop.f32.mrb[7].mxu0 }
 0x11f   : > { %v4238_v52 = vpack.c.bf16 %v3888_v50, %v433_v51  ;;  %816 = vperm.xlu0 %4365, %v433_v51  }
 0x121   : > { %v3891_v53 = vpop.f32.mrb[8].mxu0  ;;  %4239 = vmatprep.subr.bf16.mxu1 %v4238_v52 }
 0x122   : > { %4241 = vmatpush3.bf16.msra.mxu1 %v4238_v52  ;;  %831 = vperm.xlu1 %4366, %v3891_v53   ;;  %v443_v54 = vpop.f32.mrb[9].mxu0 }
 0x123   : > { %v4242_v55 = vpack.c.bf16 %v3891_v53, %v443_v54  ;;  %826 = vperm.xlu0 %4365, %v443_v54  }
 0x125   : > { %v3894_v56 = vpop.f32.mrb[10].mxu0  ;;  %4243 = vmatprep.subr.bf16.mxu1 %v4242_v55 }
 0x126   : > { %4245 = vmatpush3.bf16.msra.mxu1 %v4242_v55  ;;  %841 = vperm.xlu1 %4366, %v3894_v56   ;;  %v453_v57 = vpop.f32.mrb[11].mxu0  ;;  %v5070_v55 = vpop.permute.xlu1 %673 }
 0x127   : > { %v4246_v58 = vpack.c.bf16 %v3894_v56, %v453_v57  ;;  %836 = vperm.xlu0 %4365, %v453_v57   ;;  %v5072_v56 = vpop.permute.xlu0 %663 }
 0x129   : > { %v3897_v59 = vpop.f32.mrb[12].mxu0  ;;  %4247 = vmatprep.subr.bf16.mxu1 %v4246_v58 }
 0x12a   : > { %4249 = vmatpush3.bf16.msra.mxu1 %v4246_v58  ;;  %851 = vperm.xlu1 %4366, %v3897_v59   ;;  %v463_v60 = vpop.f32.mrb[13].mxu0  ;;  %v5086_v58 = vpop.permute.xlu1 %678 }
 0x12b   : > { %v4250_v61 = vpack.c.bf16 %v3897_v59, %v463_v60  ;;  %846 = vperm.xlu0 %4365, %v463_v60   ;;  %v1175_v60 = vld [vmem:[%s6783_s5 + $0x20] sm:$0xff] }
 0x12d   : > { %v3900_v62 = vpop.f32.mrb[14].mxu0  ;;  %4251 = vmatprep.subr.bf16.mxu1 %v4250_v61 }
 0x12e   : > { %4253 = vmatpush3.bf16.msra.mxu1 %v4250_v61  ;;  %861 = vperm.xlu1 %4366, %v3900_v62   ;;  %v473_v63 = vpop.f32.mrb[15].mxu0  ;;  %v1176_v61 = vld [vmem:[%s6783_s5 + $0x28] sm:$0xff] }
 0x12f   : > { %v4254_v0 = vpack.c.bf16 %v3900_v62, %v473_v63  ;;  %856 = vperm.xlu0 %4365, %v473_v63   ;;  %v669_v62 = vpop.permute.xlu0 %668  ;;  %v4266_v63 = vpack.c.bf16 %v1176_v61, %v1175_v60 }
 0x131   : > { %4255 = vmatprep.subr.bf16.mxu1 %v4254_v0 }
 0x132   : > { %4257 = vmatpush3.bf16.msra.mxu1 %v4254_v0  ;;  %v1177_v0 = vld [vmem:[%s6783_s5 + $0x30] sm:$0xff] }
 0x135   : > { %3934 = vmatmul.mubr.f32.vlgmr.msra.gmra.mrb[0].mxu1 %v4949_v26 }
 0x136   : > { %3936 = vmatprep.mubr.f32.mxu1 %v4954_v27 }
 0x139   : > { %3937 = vmatmul.mubr.f32.gmra.mrb[2].mxu1 %v4961_v28 }
 0x13a   : > { %3939 = vmatprep.mubr.f32.mxu1 %v4966_v29 }
 0x13d   : > { %3940 = vmatmul.mubr.f32.gmra.mrb[4].mxu1 %v4973_v30 }
 0x13e   : > { %3942 = vmatprep.mubr.f32.mxu1 %v4978_v31 }
 0x141   : > { %3943 = vmatmul.mubr.f32.gmra.mrb[6].mxu1 %v4985_v32 }
 0x142   : > { %3945 = vmatprep.mubr.f32.mxu1 %v4990_v33 }
 0x145   : > { %3946 = vmatmul.mubr.f32.gmra.mrb[8].mxu1 %v4997_v34 }
 0x146   : > { %3948 = vmatprep.mubr.f32.mxu1 %v5002_v35 }
 0x149   : > { %3949 = vmatmul.mubr.f32.gmra.mrb[10].mxu1 %v5009_v36 }
 0x14a   : > { %3951 = vmatprep.mubr.f32.mxu1 %v5014_v37 }
 0x14d   : > { %3952 = vmatmul.mubr.f32.gmra.mrb[12].mxu1 %v5021_v38 }
 0x14e   : > { %3954 = vmatprep.mubr.f32.mxu1 %v5026_v39 }
 0x151   : > { %3955 = vmatmul.mubr.f32.gmra.mrb[14].mxu1 %v5033_v40 }
 0x208   : > { %v3935_v7 = vpop.f32.mrb[0].mxu1 }
 0x209   : > { %v628_v10 = vmul.f32 2.0, %v3935_v7  ;;  %v548_v13 = vpop.f32.mrb[1].mxu1  ;;  %v5100_v7 = vpop.permute.xlu1 %688 }
 0x20a   : > { %v627_v16 = vmul.f32 2.0, %v548_v13  ;;  %v4270_v13 = vpack.c.bf16 %v1178_v5, %v1177_v0 }
 0x20b   : > { %v644_v19 = vsub.f32 %v628_v10, %v4870_v3  ;;  %v5102_v10 = vpop.permute.xlu0 %683 }
 0x20c   : > { %v643_v22 = vsub.f32 %v627_v16, %v4867_v2  ;;  %v3938_v25 = vpop.f32.mrb[2].mxu1  ;;  %v1179_v16 = vld [vmem:[%s6783_s5 + $0x40] sm:$0xff] }
 0x20d   : > { %v630_v26 = vmul.f32 2.0, %v3938_v25  ;;  %908 = vperm.xlu1 %4366, %v644_v19   ;;  %v558_v27 = vpop.f32.mrb[3].mxu1  ;;  %v1180_v19 = vld [vmem:[%s6783_s5 + $0x48] sm:$0xff]  ;;  %v5110_v25 = vpop.permute.xlu1 %698 }
 0x20e   : > { %v629_v28 = vmul.f32 2.0, %v558_v27  ;;  %903 = vperm.xlu0 %4365, %v643_v22   ;;  %v4274_v22 = vpack.c.bf16 %v1180_v19, %v1179_v16  ;;  %v1182_v27 = vld [vmem:[%s6783_s5 + $0x58] sm:$0xff] }
 0x20f   : > { %v646_v29 = vsub.f32 %v630_v26, %v4878_v6  ;;  %v1181_v26 = vld [vmem:[%s6783_s5 + $0x50] sm:$0xff] }
 0x210   : > { %v645_v30 = vsub.f32 %v629_v28, %v4873_v4  ;;  %v3941_v31 = vpop.f32.mrb[4].mxu1  ;;  %v5118_v28 = vpop.permute.xlu0 %693 }
 0x211   : > { %v632_v32 = vmul.f32 2.0, %v3941_v31  ;;  %918 = vperm.xlu1 %4366, %v646_v29   ;;  %v568_v33 = vpop.f32.mrb[5].mxu1  ;;  %v4278_v29 = vpack.c.bf16 %v1182_v27, %v1181_v26  ;;  %v1184_v31 = vld [vmem:[%s6783_s5 + $0x68] sm:$0xff] }
 0x212   : > { %v631_v34 = vmul.f32 2.0, %v568_v33  ;;  %913 = vperm.xlu0 %4365, %v645_v30   ;;  %v1183_v30 = vld [vmem:[%s6783_s5 + $0x60] sm:$0xff] }
 0x213   : > { %v648_v3 = vsub.f32 %v632_v32, %v4888_v9  ;;  %v5126_v32 = vpop.permute.xlu1 %708 }
 0x214   : > { %v647_v2 = vsub.f32 %v631_v34, %v4885_v8  ;;  %v3944_v35 = vpop.f32.mrb[6].mxu1  ;;  %v5128_v33 = vpop.permute.xlu0 %703  ;;  %v4282_v34 = vpack.c.bf16 %v1184_v31, %v1183_v30 }
 0x215   : > { %v634_v36 = vmul.f32 2.0, %v3944_v35  ;;  %928 = vperm.xlu1 %4366, %v648_v3   ;;  %v578_v37 = vpop.f32.mrb[7].mxu1  ;;  %v1185_v3 = vld [vmem:[%s6783_s5 + $0x70] sm:$0xff] }
 0x216   : > { %v633_v38 = vmul.f32 2.0, %v578_v37  ;;  %923 = vperm.xlu0 %4365, %v647_v2   ;;  %v1186_v2 = vld [vmem:[%s6783_s5 + $0x78] sm:$0xff] }
 0x217   : > { %v650_v6 = vsub.f32 %v634_v36, %v4897_v12  ;;  %v4286_v35 = vpack.c.bf16 %v1186_v2, %v1185_v3  ;;  %v5136_v36 = vpop.permute.xlu1 %718 }
 0x218   : > { %v649_v4 = vsub.f32 %v633_v38, %v4894_v11  ;;  %v3947_v39 = vpop.f32.mrb[8].mxu1  ;;  %v5138_v37 = vpop.permute.xlu0 %713 }
 0x219   : > { %v636_v40 = vmul.f32 2.0, %v3947_v39  ;;  %938 = vperm.xlu1 %4366, %v650_v6   ;;  %v588_v41 = vpop.f32.mrb[9].mxu1 }
 0x21a   : > { %v635_v42 = vmul.f32 2.0, %v588_v41  ;;  %933 = vperm.xlu0 %4365, %v649_v4  }
 0x21b   : > { %v652_v9 = vsub.f32 %v636_v40, %v4907_v15  ;;  %v5140_v38 = vpop.permute.xlu1 %728 }
 0x21c   : > { %v651_v8 = vsub.f32 %v635_v42, %v4904_v14  ;;  %v3950_v43 = vpop.f32.mrb[10].mxu1  ;;  %v5142_v6 = vpop.permute.xlu0 %723 }
 0x21d   : > { %v638_v44 = vmul.f32 2.0, %v3950_v43  ;;  %948 = vperm.xlu1 %4366, %v652_v9   ;;  %v598_v45 = vpop.f32.mrb[11].mxu1 }
 0x21e   : > { %v637_v46 = vmul.f32 2.0, %v598_v45  ;;  %943 = vperm.xlu0 %4365, %v651_v8  }
 0x21f   : > { %v654_v12 = vsub.f32 %v638_v44, %v4917_v18  ;;  %v5144_v4 = vpop.permute.xlu1 %738 }
 0x220   : > { %v653_v11 = vsub.f32 %v637_v46, %v4914_v17  ;;  %v3953_v47 = vpop.f32.mrb[12].mxu1  ;;  %v5146_v39 = vpop.permute.xlu0 %733 }
 0x221   : > { %v640_v48 = vmul.f32 2.0, %v3953_v47  ;;  %958 = vperm.xlu1 %4366, %v654_v12   ;;  %v608_v49 = vpop.f32.mrb[13].mxu1 }
 0x222   : > { %v639_v50 = vmul.f32 2.0, %v608_v49  ;;  %953 = vperm.xlu0 %4365, %v653_v11  }
 0x223   : > { %v656_v15 = vsub.f32 %v640_v48, %v4927_v21  ;;  %v1172_v21 = vld [vmem:[%s6783_s5 + $0x8] sm:$0xff]  ;;  %v792_v40 = vpop.permute.xlu1 %791  ;;  %v5161_v48 = vld [vmem:[%s6780_s2] ss:$0 sm:$0xff] }
 0x224   : > { %v655_v14 = vsub.f32 %v639_v50, %v4924_v20  ;;  %v3956_v51 = vpop.f32.mrb[14].mxu1  ;;  %v1171_v20 = vld [vmem:[%s6783_s5] sm:$0xff]  ;;  %v787_v41 = vpop.permute.xlu0 %786  ;;  %v751_v26 = vmul.f32 %v5161_v48, %v5118_v28  ;;  %v753_v28 = vmul.f32 %v5161_v48, %v5128_v33 }
 0x225   : > { %v642_v52 = vmul.f32 2.0, %v3956_v51  ;;  %968 = vperm.xlu1 %4366, %v656_v15   ;;  %v618_v53 = vpop.f32.mrb[15].mxu1  ;;  %v4258_v57 = vpack.c.bf16 %v1172_v21, %v1171_v20  ;;  %v746_v15 = vmul.f32 %v5161_v48, %v669_v62  ;;  %v745_v51 = vmul.f32 %v5161_v48, %v5072_v56 }
 0x226   : > { %v641_v54 = vmul.f32 2.0, %v618_v53  ;;  %963 = vperm.xlu0 %4365, %v655_v14   ;;  %v5171_v14 = vld [vmem:[%s6781_s3] ss:$0 sm:$0xff]  ;;  %v747_v21 = vmul.f32 %v5161_v48, %v5070_v55 }
 0x227   : > { %v658_v18 = vsub.f32 %v642_v52, %v4937_v24  ;;  %v1173_v24 = vld [vmem:[%s6783_s5 + $0x10] sm:$0xff]  ;;  %4259 = vmatprep.subr.bf16.mxu1 %v4258_v57  ;;  %v802_v42 = vpop.permute.xlu1 %801  ;;  %v5178_v52 = vld [vmem:[%s6780_s2 + $0x1] ss:$0 sm:$0xff]  ;;  %v767_v56 = vadd.f32 %v5171_v14, %v745_v51 }
 0x228   : > { %v657_v17 = vsub.f32 %v641_v54, %v4934_v23  ;;  %v1174_v23 = vld [vmem:[%s6783_s5 + $0x18] sm:$0xff]  ;;  %4261 = vmatpush3.bf16.msra.mxu1 %v4258_v57  ;;  %v797_v9 = vpop.permute.xlu0 %796  ;;  %v748_v54 = vmul.f32 %v5161_v48, %v5086_v58  ;;  %v5195_v57 = vld [vmem:[%s6780_s2 + $0x2] ss:$0 sm:$0xff]  ;;  %v749_v58 = vmul.f32 %v5161_v48, %v5102_v10  ;;  %v871_v55 = vmul.f32 %v5178_v52, %v802_v42 }
 0x229   : > { %978 = vperm.xlu1 %4366, %v658_v18   ;;  %v4262_v59 = vpack.c.bf16 %v1174_v23, %v1173_v24  ;;  %v768_v18 = vadd.f32 %v5171_v14, %v746_v15  ;;  %v868_v24 = vmul.f32 %v5178_v52, %v787_v41  ;;  %v750_v23 = vmul.f32 %v5161_v48, %v5100_v7 }
 0x22a   : > { %973 = vperm.xlu0 %4365, %v657_v17   ;;  %v869_v17 = vmul.f32 %v5178_v52, %v792_v40  ;;  %v770_v60 = vadd.f32 %v5171_v14, %v748_v54  ;;  %v769_v0 = vadd.f32 %v5171_v14, %v747_v21  ;;  %v771_v10 = vadd.f32 %v5171_v14, %v749_v58 }
 0x22b   : > { %4263 = vmatprep.subr.bf16.mxu1 %v4262_v59  ;;  %v812_v8 = vpop.permute.xlu1 %811  ;;  %v884_v5 = vadd.f32 %v868_v24, %v767_v56  ;;  %v772_v7 = vadd.f32 %v5171_v14, %v750_v23  ;;  %v773_v15 = vadd.f32 %v5171_v14, %v751_v26  ;;  %v757_v26 = vmul.f32 %v5161_v48, %v5142_v6 }
 0x22c   : > { %4265 = vmatpush3.bf16.msra.mxu1 %v4262_v59  ;;  %v807_v43 = vpop.permute.xlu0 %806  ;;  %v885_v61 = vadd.f32 %v869_v17, %v768_v18  ;;  %v887_v30 = vadd.f32 %v871_v55, %v770_v60  ;;  %v873_v31 = vmul.f32 %v5178_v52, %v812_v8  ;;  %v775_v60 = vadd.f32 %v5171_v14, %v753_v28 }
 0x22d   : > { %4267 = vmatprep.subr.bf16.mxu1 %v4266_v63  ;;  %v872_v40 = vmul.f32 %v5178_v52, %v807_v43  ;;  %v755_v55 = vmul.f32 %v5161_v48, %v5138_v37  ;;  %v758_v37 = vmul.f32 %v5161_v48, %v5140_v38  ;;  %v779_v28 = vadd.f32 %v5171_v14, %v757_v26 }
 0x22e   : > { %v889_v17 = vadd.f32 %v873_v31, %v772_v7 }
 0x22f   : > { %v822_v44 = vpop.permute.xlu1 %821 }
 0x230   : > { %4269 = vmatpush3.bf16.msra.mxu1 %v4266_v63  ;;  %v5148_v45 = vpop.permute.xlu0 %816  ;;  %v875_v43 = vmul.f32 %v5178_v52, %v822_v44  ;;  %v756_v44 = vmul.f32 %v5161_v48, %v5136_v36 }
 0x231   : > { %4271 = vmatprep.subr.bf16.mxu1 %v4270_v13  ;;  %v874_v33 = vmul.f32 %v5178_v52, %v5148_v45 }
 0x233   : > { %v5150_v46 = vpop.permute.xlu1 %831 }
 0x234   : > { %4273 = vmatpush3.bf16.msra.mxu1 %v4270_v13  ;;  %v5152_v12 = vpop.permute.xlu0 %826  ;;  %v870_v13 = vmul.f32 %v5178_v52, %v797_v9 }
 0x235   : > { %4275 = vmatprep.subr.bf16.mxu1 %v4274_v22 }
 0x237   : > { %v5154_v11 = vpop.permute.xlu1 %841 }
 0x238   : > { %4277 = vmatpush3.bf16.msra.mxu1 %v4274_v22  ;;  %v5156_v47 = vpop.permute.xlu0 %836  ;;  %v752_v22 = vmul.f32 %v5161_v48, %v5110_v25  ;;  %v754_v25 = vmul.f32 %v5161_v48, %v5126_v32  ;;  %v888_v32 = vadd.f32 %v872_v40, %v771_v10  ;;  %v876_v10 = vmul.f32 %v5178_v52, %v5152_v12 }
 0x239   : > { %4279 = vmatprep.subr.bf16.mxu1 %v4278_v29  ;;  %v878_v6 = vmul.f32 %v5178_v52, %v5156_v47 }
 0x23a   : > { %v774_v8 = vadd.f32 %v5171_v14, %v752_v22  ;;  %v892_v38 = vadd.f32 %v876_v10, %v775_v60 }
 0x23b   : > { %v5163_v49 = vpop.permute.xlu1 %851 }
 0x23c   : > { %4281 = vmatpush3.bf16.msra.mxu1 %v4278_v29  ;;  %v5165_v50 = vpop.permute.xlu0 %846  ;;  %v891_v45 = vadd.f32 %v875_v43, %v774_v8  ;;  %v759_v8 = vmul.f32 %v5161_v48, %v5146_v39 }
 0x23d   : > { %4283 = vmatprep.subr.bf16.mxu1 %v4282_v34 }
 0x23f   : > { %v5180_v53 = vpop.permute.xlu1 %861 }
 0x240   : > { %4285 = vmatpush3.bf16.msra.mxu1 %v4282_v34  ;;  %v5186_v20 = vpop.permute.xlu0 %856  ;;  %v883_v60 = vmul.f32 %v5178_v52, %v5180_v53 }
 0x241   : > { %4287 = vmatprep.subr.bf16.mxu1 %v4286_v35 }
 0x244   : > { %4289 = vmatpush3.bf16.msra.mxu1 %v4286_v35  ;;  %v886_v35 = vadd.f32 %v870_v13, %v769_v0 }
 0x28c   : > { %v909_v59 = vpop.permute.xlu1 %908 }
 0x28d   : > { %v986_v62 = vmul.f32 %v5195_v57, %v909_v59  ;;  %v904_v63 = vpop.permute.xlu0 %903  ;;  %v776_v59 = vadd.f32 %v5171_v14, %v754_v25  ;;  %v780_v25 = vadd.f32 %v5171_v14, %v758_v37 }
 0x28e   : > { %v985_v16 = vmul.f32 %v5195_v57, %v904_v63 }
 0x28f   : > { %v1002_v19 = vadd.f32 %v986_v62, %v885_v61 }
 0x290   : > { %v1001_v27 = vadd.f32 %v985_v16, %v884_v5  ;;  %v919_v29 = vpop.permute.xlu1 %918  ;;  %v877_v5 = vmul.f32 %v5178_v52, %v5150_v46 }
 0x291   : > { %v1018_v34 = vmax.f32 %v1002_v19, 0.0  ;;  %v988_v3 = vmul.f32 %v5195_v57, %v919_v29  ;;  %v914_v2 = vpop.permute.xlu0 %913  ;;  %v890_v19 = vadd.f32 %v874_v33, %v773_v15  ;;  %v777_v29 = vadd.f32 %v5171_v14, %v755_v55 }
 0x292   : > { %v1017_v41 = vmax.f32 %v1001_v27, 0.0  ;;  %v987_v42 = vmul.f32 %v5195_v57, %v914_v2  ;;  %v778_v27 = vadd.f32 %v5171_v14, %v756_v44  ;;  %v893_v12 = vadd.f32 %v877_v5, %v776_v59 }
 0x293   : > { %v1004_v9 = vadd.f32 %v988_v3, %v887_v30  ;;  %v879_v3 = vmul.f32 %v5178_v52, %v5154_v11  ;;  %v760_v11 = vmul.f32 %v5161_v48, %v5144_v4  ;;  %v781_v33 = vadd.f32 %v5171_v14, %v759_v8 }
 0x294   : > { %v1033_v51 = vpack.c.bf16 %v1018_v34, %v1017_v41  ;;  %v1003_v54 = vadd.f32 %v987_v42, %v886_v35  ;;  %v929_v18 = vpop.permute.xlu1 %928 }
 0x295   : > { %v1020_v21 = vmax.f32 %v1004_v9, 0.0  ;;  %v990_v56 = vmul.f32 %v5195_v57, %v929_v18  ;;  %v924_v24 = vpop.permute.xlu0 %923  ;;  %v895_v47 = vadd.f32 %v879_v3, %v778_v27  ;;  %v881_v18 = vmul.f32 %v5178_v52, %v5163_v49 }
 0x296   : > { %v1019_v23 = vmax.f32 %v1003_v54, 0.0  ;;  %v989_v58 = vmul.f32 %v5195_v57, %v924_v24  ;;  %3959 = vmatprep.mubr.msk.bf16.mxu0 %vm1049_vm0, %v1033_v51  ;;  %v880_v24 = vmul.f32 %v5178_v52, %v5165_v50  ;;  %v782_v48 = vadd.f32 %v5171_v14, %v760_v11 }
 0x297   : > { %v1006_v61 = vadd.f32 %v990_v56, %v889_v17  ;;  %v894_v56 = vadd.f32 %v878_v6, %v777_v29  ;;  %v897_v59 = vadd.f32 %v881_v18, %v780_v25  ;;  %v4749_v29 = vmov 0.0|0.0  }
 0x298   : > { %v1034_v62 = vpack.c.bf16 %v1020_v21, %v1019_v23  ;;  %v1005_v63 = vadd.f32 %v989_v58, %v888_v32  ;;  %v939_v0 = vpop.permute.xlu1 %938  ;;  %v896_v55 = vadd.f32 %v880_v24, %v779_v28  ;;  %4290 = vmatprep.subr.bf16.mxu0 %v4749_v29 }
 0x299   : > { %v1022_v13 = vmax.f32 %v1006_v61, 0.0  ;;  %v992_v16 = vmul.f32 %v5195_v57, %v939_v0  ;;  %v934_v7 = vpop.permute.xlu0 %933 }
 0x29a   : > { %v1021_v22 = vmax.f32 %v1005_v63, 0.0  ;;  %v991_v36 = vmul.f32 %v5195_v57, %v934_v7  ;;  %3960 = vmatmul.mubr.msk.bf16.vlgmr.msra.gmra.mrb[16].mxu0 %vm1049_vm0, %v1034_v62  ;;  %v882_v62 = vmul.f32 %v5178_v52, %v5186_v20 }
 0x29b   : > { %v1008_v46 = vadd.f32 %v992_v16, %v891_v45  ;;  %v899_v16 = vadd.f32 %v883_v60, %v782_v48 }
 0x29c   : > { %v1035_v30 = vpack.c.bf16 %v1022_v13, %v1021_v22  ;;  %v1007_v31 = vadd.f32 %v991_v36, %v890_v19  ;;  %v949_v34 = vpop.permute.xlu1 %948  ;;  %v898_v10 = vadd.f32 %v882_v62, %v781_v33  ;;  %v4757_v62 = vmov 2  }
 0x29d   : > { %v1024_v2 = vmax.f32 %v1008_v46, 0.0  ;;  %v994_v35 = vmul.f32 %v5195_v57, %v949_v34  ;;  %v944_v40 = vpop.permute.xlu0 %943 }
 0x29e   : > { %v1023_v41 = vmax.f32 %v1007_v31, 0.0  ;;  %v993_v42 = vmul.f32 %v5195_v57, %v944_v40  ;;  %3963 = vmatprep.mubr.msk.bf16.mxu0 %vm1049_vm0, %v1035_v30 }
 0x29f   : > { %v1010_v9 = vadd.f32 %v994_v35, %v893_v12 }
 0x2a0   : > { %v1036_v15 = vpack.c.bf16 %v1024_v2, %v1023_v41  ;;  %v1009_v51 = vadd.f32 %v993_v42, %v892_v38  ;;  %v959_v54 = vpop.permute.xlu1 %958 }
 0x2a1   : > { %v1026_v17 = vmax.f32 %v1010_v9, 0.0  ;;  %v996_v43 = vmul.f32 %v5195_v57, %v959_v54  ;;  %v954_v21 = vpop.permute.xlu0 %953 }
 0x2a2   : > { %v1025_v32 = vmax.f32 %v1009_v51, 0.0  ;;  %v995_v4 = vmul.f32 %v5195_v57, %v954_v21  ;;  %3964 = vmatmul.mubr.msk.bf16.gmra.mrb[20].mxu0 %vm1049_vm0, %v1036_v15  ;;  %v1332_v21 = vld [vmem:[%s6784_s6] sm:$0xf] }
 0x2a3   : > { %v1012_v39 = vadd.f32 %v996_v43, %v895_v47 }
 0x2a4   : > { %v1037_v23 = vpack.c.bf16 %v1026_v17, %v1025_v32  ;;  %v1011_v49 = vadd.f32 %v995_v4, %v894_v56  ;;  %v969_v58 = vpop.permute.xlu1 %968  ;;  %v4755_v56 = vmov 1  }
 0x2a5   : > { %v1028_v61 = vmax.f32 %v1012_v39, 0.0  ;;  %v998_v50 = vmul.f32 %v5195_v57, %v969_v58  ;;  %v964_v44 = vpop.permute.xlu0 %963  ;;  %4367 = vset.pattern.permute.xlu0 %v4755_v56 }
 0x2a6   : > { %v1027_v63 = vmax.f32 %v1011_v49, 0.0  ;;  %v997_v0 = vmul.f32 %v5195_v57, %v964_v44  ;;  %3967 = vmatprep.mubr.msk.bf16.mxu0 %vm1049_vm0, %v1037_v23 }
 0x2a7   : > { %v1014_v14 = vadd.f32 %v998_v50, %v897_v59 }
 0x2a8   : > { %v1038_v45 = vpack.c.bf16 %v1028_v61, %v1027_v63  ;;  %v1013_v5 = vadd.f32 %v997_v0, %v896_v55  ;;  %v979_v13 = vpop.permute.xlu1 %978  ;;  %v4756_v55 = vmov 3  }
 0x2a9   : > { %v1030_v7 = vmax.f32 %v1014_v14, 0.0  ;;  %v1000_v53 = vmul.f32 %v5195_v57, %v979_v13  ;;  %v974_v19 = vpop.permute.xlu0 %973 }
 0x2aa   : > { %v1029_v22 = vmax.f32 %v1013_v5, 0.0  ;;  %v999_v36 = vmul.f32 %v5195_v57, %v974_v19  ;;  %3968 = vmatmul.mubr.msk.bf16.gmra.mrb[24].mxu0 %vm1049_vm0, %v1038_v45  ;;  %v4751_v57 = vmov 0.0  }
 0x2ab   : > { %v1016_v52 = vadd.f32 %v1000_v53, %v899_v16 }
 0x2ac   : > { %v1039_v20 = vpack.c.bf16 %v1030_v7, %v1029_v22  ;;  %v1015_v37 = vadd.f32 %v999_v36, %v898_v10 }
 0x2ad   : > { %v1032_v26 = vmax.f32 %v1016_v52, 0.0 }
 0x2ae   : > { %v1031_v46 = vmax.f32 %v1015_v37, 0.0  ;;  %3971 = vmatprep.mubr.msk.bf16.mxu0 %vm1049_vm0, %v1039_v20 }
 0x2b0   : > { %v1040_v27 = vpack.c.bf16 %v1032_v26, %v1031_v46 }
 0x2b2   : > { %3972 = vmatmul.mubr.msk.bf16.gmra.mrb[28].mxu0 %vm1049_vm0, %v1040_v27 }
 0x2b3   : > { %4063 = vmatprep.mubr.msk.f32.mxu0 %vm4750_vm1, %v4751_v57 }
 0x36d   : > { %v3961_v30 = vpop.f32.mrb[16].mxu0 }
 0x36e   : > { %v1108_v31 = vpop.f32.mrb[17].mxu0 }
 0x36f   : > { %v3962_v34 = vpop.f32.mrb[18].mxu0  ;;  %4007 = vmatprep.mubr.f32.mxu1 %v1108_v31 }
 0x370   : > { %v4294_v12 = vpack.c.bf16 %v3962_v34, %v3961_v30  ;;  %v1111_v3 = vpop.f32.mrb[19].mxu0 }
 0x371   : > { %v4291_v2 = vpack.c.bf16 %v1111_v3, %v1108_v31  ;;  %4008 = vmatmul.mubr.f32.vlgmr.msra.gmra.mrb[16].mxu1 %v1111_v3  ;;  %v1523_v31 = vlaneseq }
 0x372   : > { %4010 = vmatprep.mubr.f32.mxu1 %v3961_v30  ;;  %2685 = vrot.lane.b32.xlu1 %v4294_v12, %s4752_s18 }
 0x373   : > { %2183 = vrot.lane.b32.xlu0 %v4294_v12, %s4753_s19  ;;  %4292 = vmatpush3.bf16.xpose.msra.mxu0 %v4291_v2 }
 0x374   : > { %4066 = vmatprep.subr.bf16.mxu1 %v4291_v2  ;;  %4293 = vmatprep.subr.bf16.mxu0 %v4749_v29 }
 0x375   : > { %4067 = vmatpush3.bf16.msra.mxu1 %v4291_v2  ;;  %v3965_v35 = vpop.f32.mrb[20].mxu0 }
 0x376   : > { %4011 = vmatmul.mubr.f32.gmra.mrb[18].mxu1 %v3962_v34  ;;  %4068 = vmatprep.subr.bf16.mxu1 %v4294_v12  ;;  %v1124_v40 = vpop.f32.mrb[21].mxu0 }
 0x377   : > { %2181 = vrot.lane.b32.xlu1 %v4291_v2, %s4753_s19  ;;  %3187 = vrot.lane.b32.xlu0 %v4294_v12, %s4754_s20  ;;  %v3966_v38 = vpop.f32.mrb[22].mxu0 }
 0x378   : > { %v4300_v6 = vpack.c.bf16 %v3966_v38, %v3965_v35  ;;  %4013 = vmatprep.mubr.f32.mxu1 %v1124_v40  ;;  %v1127_v41 = vpop.f32.mrb[23].mxu0 }
 0x379   : > { %v4297_v42 = vpack.c.bf16 %v1127_v41, %v1124_v40  ;;  %4069 = vmatpush3.bf16.msra.mxu1 %v4294_v12 }
 0x37a   : > { %4014 = vmatmul.mubr.f32.gmra.mrb[20].mxu1 %v1127_v41 }
 0x37b   : > { %4016 = vmatprep.mubr.f32.mxu1 %v3965_v35  ;;  %2683 = vrot.lane.b32.xlu1 %v4291_v2, %s4752_s18 }
 0x37c   : > { %3191 = vrot.lane.b32.xlu0 %v4300_v6, %s4754_s20  ;;  %4295 = vmatpush3.bf16.xpose.msra.mxu0 %v4294_v12  ;;  %v1524_v12 = vshrl.u32 %v1523_v31, 7  ;;  %v1406_v31 = vld [vmem:[%s6785_s7 + $0x18] sm:$0xff] }
 0x37d   : > { %4070 = vmatprep.subr.bf16.mxu1 %v4297_v42  ;;  %v3969_v25 = vpop.f32.mrb[24].mxu0  ;;  %4296 = vmatprep.subr.bf16.mxu0 %v4749_v29  ;;  %vm1422_vm9 = vcmp.gt.f32.partialorder %v1406_v31, 0.0 }
 0x37e   : > { %4071 = vmatpush3.bf16.msra.mxu1 %v4297_v42  ;;  %v1140_v28 = vpop.f32.mrb[25].mxu0  ;;  %v2449_v3 = vsub.s32 2, %v1524_v12  ;;  %v1525_v41 = vsub.s32 0, %v1524_v12 }
 0x37f   : > { %4017 = vmatmul.mubr.f32.gmra.mrb[22].mxu1 %v3966_v38  ;;  %4072 = vmatprep.subr.bf16.mxu1 %v4300_v6  ;;  %v3970_v9 = vpop.f32.mrb[26].mxu0 }
 0x380   : > { %3185 = vrot.lane.b32.xlu1 %v4291_v2, %s4754_s20  ;;  %v5292_v11 = vpack.c.bf16 %v3970_v9, %v3969_v25  ;;  %4019 = vmatprep.mubr.f32.mxu1 %v1140_v28  ;;  %v1143_v8 = vpop.f32.mrb[27].mxu0  ;;  %v2951_v2 = vsub.s32 3, %v1524_v12 }
 0x381   : > { %v4303_v15 = vpack.c.bf16 %v1143_v8, %v1140_v28 }
 0x382   : > { %6852 = vst [vmem:[#allocation6_spill] sm:$0xff] %v5292_v11  ;;  %4073 = vmatpush3.bf16.msra.mxu1 %v4300_v6  ;;  %2191 = vrot.lane.b32.xlu0 %v5292_v11, %s4753_s19 }
 0x383   : > { %4020 = vmatmul.mubr.f32.gmra.mrb[24].mxu1 %v1143_v8  ;;  %4074 = vmatprep.subr.bf16.mxu1 %v4303_v15 }
 0x384   : > { %4022 = vmatprep.mubr.f32.mxu1 %v3969_v25  ;;  %2187 = vrot.lane.b32.xlu1 %v4300_v6, %s4753_s19 }
 0x385   : > { %4298 = vmatpush3.bf16.xpose.msra.mxu0 %v4297_v42  ;;  %v3973_v51 = vpop.f32.mrb[28].mxu0 }
 0x386   : > { %4075 = vmatpush3.bf16.msra.mxu1 %v4303_v15  ;;  %2189 = vrot.lane.b32.xlu0 %v4303_v15, %s4753_s19  ;;  %v1156_v54 = vpop.f32.mrb[29].mxu0 }
 0x387   : > { %4023 = vmatmul.mubr.f32.gmra.mrb[26].mxu1 %v3970_v9  ;;  %4076 = vmatprep.subr.bf16.mxu1 %v5292_v11  ;;  %v3974_v47 = vpop.f32.mrb[30].mxu0 }
 0x388   : > { %2689 = vrot.lane.b32.xlu1 %v4300_v6, %s4752_s18  ;;  %v5300_v18 = vpack.c.bf16 %v3974_v47, %v3973_v51  ;;  %4025 = vmatprep.mubr.f32.mxu1 %v1156_v54  ;;  %v1159_v17 = vpop.f32.mrb[31].mxu0 }
 0x389   : > { %v5302_v43 = vpack.c.bf16 %v1159_v17, %v1156_v54  ;;  %4299 = vmatprep.subr.bf16.mxu0 %v4749_v29 }
 0x38a   : > { %6853 = vst [vmem:[#allocation7_spill] sm:$0xff] %v5300_v18  ;;  %4077 = vmatpush3.bf16.msra.mxu1 %v5292_v11  ;;  %2195 = vrot.lane.b32.xlu0 %v5300_v18, %s4753_s19 }
 0x38b   : > { %6854 = vst [vmem:[#allocation8_spill] sm:$0xff] %v5302_v43  ;;  %4026 = vmatmul.mubr.f32.gmra.mrb[28].mxu1 %v1159_v17  ;;  %4078 = vmatprep.subr.bf16.mxu1 %v5302_v43  ;;  %v5474_v17 = vld [vmem:[%s6785_s7 + $0x8] sm:$0xff] }
 0x38c   : > { %2185 = vrot.lane.b32.xlu1 %v4297_v42, %s4753_s19  ;;  %4028 = vmatprep.mubr.f32.mxu1 %v3973_v51  ;;  %v1939_v51 = vsub.s32 1, %v1524_v12  ;;  %vm1420_vm4 = vcmp.gt.f32.partialorder %v5474_v17, 0.0 }
 0x38d   : > { %4301 = vmatpush3.bf16.xpose.msra.mxu0 %v4300_v6 }
 0x38e   : > { %4079 = vmatpush3.bf16.msra.mxu1 %v5302_v43  ;;  %4302 = vmatprep.subr.bf16.mxu0 %v4749_v29 }
 0x38f   : > { %4029 = vmatmul.mubr.f32.gmra.mrb[30].mxu1 %v3974_v47  ;;  %4080 = vmatprep.subr.bf16.mxu1 %v5300_v18 }
 0x390   : > { %2687 = vrot.lane.b32.xlu1 %v4297_v42, %s4752_s18 }
 0x392   : > { %4081 = vmatpush3.bf16.msra.mxu1 %v5300_v18 }
 0x394   : > { %3189 = vrot.lane.b32.xlu1 %v4297_v42, %s4754_s20 }
 0x395   : > { %4304 = vmatpush3.bf16.xpose.msra.mxu0 %v4303_v15 }
 0x396   : > { %4305 = vmatprep.subr.bf16.mxu0 %v4749_v29 }
 0x398   : > { %2693 = vrot.lane.b32.xlu1 %v5292_v11, %s4752_s18 }
 0x39c   : > { %2691 = vrot.lane.b32.xlu1 %v4303_v15, %s4752_s18 }
 0x39d   : > { %4307 = vmatpush3.bf16.xpose.msra.mxu0 %v5292_v11 }
 0x39e   : > { %4308 = vmatprep.subr.bf16.mxu0 %v4749_v29 }
 0x3a0   : > { %3193 = vrot.lane.b32.xlu1 %v4303_v15, %s4754_s20 }
 0x3a4   : > { %2193 = vrot.lane.b32.xlu1 %v5302_v43, %s4753_s19 }
 0x3a5   : > { %4310 = vmatpush3.bf16.xpose.msra.mxu0 %v5302_v43 }
 0x3a6   : > { %4311 = vmatprep.subr.bf16.mxu0 %v4749_v29 }
 0x3ad   : > { %4313 = vmatpush3.bf16.xpose.msra.mxu0 %v5300_v18 }
 0x3b4   : > { %4064 = vmatmul.mubr.f32.vlgmr.msra.gmra.mrb[32].mxu0 %v1332_v21 }
 0x3e4   : > { %v2686_v24 = vpop.permute.xlu1 %2685 }
 0x3e5   : > { %v5415_v37 = vpop.permute.xlu0 %2183 }
 0x3e6   : > { %6860 = vst [vmem:[#allocation14_spill] sm:$0xff] %v5415_v37  ;;  %v1409_v37 = vld [vmem:[%s6785_s7 + $0x30] sm:$0xff] }
 0x3e9   : > { %v5332_v32 = vpop.permute.xlu1 %2181  ;;  %v5422_v26 = vpop.permute.xlu0 %3187 }
 0x3ea   : > { %6855 = vst [vmem:[#allocation9_spill] sm:$0xff] %v5332_v32  ;;  %4098 = vmatprep.subr.bf16.mxu1 %v5332_v32  ;;  %6861 = vst [vmem:[#allocation15_spill] sm:$0xff] %v5422_v26 }
 0x3ed   : > { %v2684_v4 = vpop.permute.xlu1 %2683 }
 0x3ee   : > { %4130 = vmatprep.subr.bf16.mxu0 %v2684_v4  ;;  %v5429_v46 = vpop.permute.xlu0 %3191 }
 0x3ef   : > { %4131 = vmatpush3.bf16.msra.mxu0 %v2684_v4  ;;  %6862 = vst [vmem:[#allocation16_spill] sm:$0xff] %v5429_v46 }
 0x3f0   : > { %4132 = vmatprep.subr.bf16.mxu0 %v2686_v24 }
 0x3f2   : > { %v5335_v39 = vpop.permute.xlu1 %3185 }
 0x3f3   : > { %6856 = vst [vmem:[#allocation10_spill] sm:$0xff] %v5335_v39  ;;  %4133 = vmatpush3.bf16.msra.mxu0 %v2686_v24 }
 0x3f4   : > { %v5434_v27 = vpop.permute.xlu0 %2191 }
 0x3f5   : > { %6863 = vst [vmem:[#allocation17_spill] sm:$0xff] %v5434_v27 }
 0x3f6   : > { %v5337_v48 = vpop.permute.xlu1 %2187 }
 0x3f7   : > { %6857 = vst [vmem:[#allocation11_spill] sm:$0xff] %v5337_v48 }
 0x3f8   : > { %v5440_v29 = vpop.permute.xlu0 %2189 }
 0x3f9   : > { %6864 = vst [vmem:[#allocation18_spill] sm:$0xff] %v5440_v29 }
 0x3fa   : > { %v2690_v33 = vpop.permute.xlu1 %2689 }
 0x3fc   : > { %v5446_v34 = vpop.permute.xlu0 %2195 }
 0x3fd   : > { %6866 = vst [vmem:[#allocation20_spill] sm:$0xff] %v5446_v34 }
 0x3fe   : > { %v5339_v23 = vpop.permute.xlu1 %2185 }
 0x3ff   : > { %6858 = vst [vmem:[#allocation12_spill] sm:$0xff] %v5339_v23 }
 0x402   : > { %v2688_v49 = vpop.permute.xlu1 %2687 }
 0x403   : > { %4134 = vmatprep.subr.bf16.mxu0 %v2688_v49 }
 0x404   : > { %4135 = vmatpush3.bf16.msra.mxu0 %v2688_v49 }
 0x405   : > { %4136 = vmatprep.subr.bf16.mxu0 %v2690_v33 }
 0x406   : > { %v5341_v58 = vpop.permute.xlu1 %3189 }
 0x407   : > { %6859 = vst [vmem:[#allocation13_spill] sm:$0xff] %v5341_v58 }
 0x408   : > { %4137 = vmatpush3.bf16.msra.mxu0 %v2690_v33 }
 0x40a   : > { %v2694_v59 = vpop.permute.xlu1 %2693 }
 0x40e   : > { %v2692_v60 = vpop.permute.xlu1 %2691 }
 0x40f   : > { %4138 = vmatprep.subr.bf16.mxu0 %v2692_v60 }
 0x410   : > { %4139 = vmatpush3.bf16.msra.mxu0 %v2692_v60 }
 0x411   : > { %4140 = vmatprep.subr.bf16.mxu0 %v2694_v59 }
 0x412   : > { %v5442_v30 = vpop.permute.xlu1 %3193 }
 0x413   : > { %6865 = vst [vmem:[#allocation19_spill] sm:$0xff] %v5442_v30 }
 0x414   : > { %4141 = vmatpush3.bf16.msra.mxu0 %v2694_v59 }
 0x416   : > { %v5448_v57 = vpop.permute.xlu1 %2193 }
 0x417   : > { %6867 = vst [vmem:[#allocation21_spill] sm:$0xff] %v5448_v57 }
 0x444   : > { %v4009_v61 = vpop.f32.mrb[16].mxu1 }
 0x445   : > { %v1253_v50 = vpop.f32.mrb[17].mxu1  ;;  %1878 = vperm.xlu0 %4367, %v4009_v61   ;;  %1450 = vperm.xlu1 %4366, %v4009_v61  }
 0x449   : > { %v4012_v44 = vpop.f32.mrb[18].mxu1  ;;  %4369 = vset.pattern.permute.xlu0 %v4756_v55  ;;  %4368 = vset.pattern.permute.xlu1 %v4757_v62 }
 0x44a   : > { %v1263_v63 = vpop.f32.mrb[19].mxu1  ;;  %2890 = vperm.xlu0 %4369, %v4009_v61   ;;  %2388 = vperm.xlu1 %4368, %v4009_v61  }
 0x44d   : > { %v4015_v0 = vpop.f32.mrb[20].mxu1 }
 0x44e   : > { %v1273_v14 = vpop.f32.mrb[21].mxu1  ;;  %4370 = vset.pattern.permute.xlu0 %v4748_v1  ;;  %4371 = vset.pattern.permute.xlu1 %v4755_v56 }
 0x44f   : > { %1445 = vperm.xlu0 %4370, %v1253_v50   ;;  %1874 = vperm.xlu1 %4371, %v1253_v50  }
 0x452   : > { %v5347_v45 = vpop.f32.mrb[22].mxu1 }
 0x453   : > { %v5349_v5 = vpop.f32.mrb[23].mxu1  ;;  %4372 = vset.pattern.permute.xlu0 %v4757_v62  ;;  %4373 = vset.pattern.permute.xlu1 %v4756_v55 }
 0x454   : > { %2384 = vperm.xlu0 %4372, %v1253_v50   ;;  %2886 = vperm.xlu1 %4373, %v1253_v50  }
 0x456   : > { %v5353_v13 = vpop.f32.mrb[24].mxu1 }
 0x457   : > { %v5355_v16 = vpop.f32.mrb[25].mxu1 }
 0x458   : > { %2396 = vperm.xlu0 %4372, %v4012_v44   ;;  %4374 = vset.pattern.permute.xlu1 %v4748_v1 }
 0x459   : > { %1460 = vperm.xlu1 %4374, %v4012_v44  }
 0x45a   : > { %v5358_v7 = vpop.f32.mrb[26].mxu1 }
 0x45b   : > { %v5360_v53 = vpop.f32.mrb[27].mxu1 }
 0x45c   : > { %4377 = vset.pattern.permute.xlu0 %v4748_v1 }
 0x45d   : > { %1455 = vperm.xlu0 %4377, %v1263_v63   ;;  %4375 = vset.pattern.permute.xlu1 %v4755_v56 }
 0x45e   : > { %v5364_v19 = vpop.f32.mrb[28].mxu1  ;;  %1886 = vperm.xlu1 %4375, %v4012_v44  }
 0x45f   : > { %v5366_v10 = vpop.f32.mrb[29].mxu1 }
 0x461   : > { %4384 = vset.pattern.permute.xlu0 %v4756_v55 }
 0x462   : > { %v5369_v22 = vpop.f32.mrb[30].mxu1  ;;  %2906 = vperm.xlu0 %4384, %v4015_v0   ;;  %4376 = vset.pattern.permute.xlu1 %v4756_v55 }
 0x463   : > { %v5372_v36 = vpop.f32.mrb[31].mxu1  ;;  %2898 = vperm.xlu1 %4376, %v4012_v44   ;;  %v5494_v44 = vld [vmem:[%s6785_s7] sm:$0xff] }
 0x464   : > { %vm1419_vm6 = vcmp.gt.f32.partialorder %v5494_v44, 0.0 }
 0x466   : > { %4385 = vset.pattern.permute.xlu0 %v4748_v1 }
 0x467   : > { %1465 = vperm.xlu0 %4385, %v1273_v14   ;;  %4378 = vset.pattern.permute.xlu1 %v4755_v56 }
 0x468   : > { %1882 = vperm.xlu1 %4378, %v1263_v63  }
 0x46b   : > { %4387 = vset.pattern.permute.xlu0 %v4757_v62 }
 0x46c   : > { %2400 = vperm.xlu0 %4387, %v1273_v14   ;;  %4379 = vset.pattern.permute.xlu1 %v4757_v62 }
 0x46d   : > { %2392 = vperm.xlu1 %4379, %v1263_v63  }
 0x470   : > { %2412 = vperm.xlu0 %4387, %v5347_v45  }
 0x471   : > { %4380 = vset.pattern.permute.xlu1 %v4756_v55 }
 0x472   : > { %2894 = vperm.xlu1 %4380, %v1263_v63  }
 0x474   : > { %4392 = vset.pattern.permute.xlu0 %v4748_v1 }
 0x475   : > { %1475 = vperm.xlu0 %4392, %v5349_v5  }
 0x476   : > { %4381 = vset.pattern.permute.xlu1 %v4748_v1 }
 0x477   : > { %1470 = vperm.xlu1 %4381, %v4015_v0  }
 0x479   : > { %4399 = vset.pattern.permute.xlu0 %v4756_v55 }
 0x47a   : > { %2922 = vperm.xlu0 %4399, %v5353_v13  }
 0x47b   : > { %4382 = vset.pattern.permute.xlu1 %v4755_v56 }
 0x47c   : > { %1894 = vperm.xlu1 %4382, %v4015_v0  }
 0x47e   : > { %4400 = vset.pattern.permute.xlu0 %v4748_v1 }
 0x47f   : > { %1485 = vperm.xlu0 %4400, %v5355_v16  }
 0x480   : > { %4383 = vset.pattern.permute.xlu1 %v4757_v62 }
 0x481   : > { %2404 = vperm.xlu1 %4383, %v4015_v0  }
 0x483   : > { %4402 = vset.pattern.permute.xlu0 %v4757_v62 }
 0x484   : > { %2416 = vperm.xlu0 %4402, %v5355_v16  }
 0x485   : > { %4386 = vset.pattern.permute.xlu1 %v4755_v56 }
 0x486   : > { %1890 = vperm.xlu1 %4386, %v1273_v14  }
 0x487   : > { %v5392_v52 = vpop.f32.mrb[32].mxu0 }
 0x488   : > { %2428 = vperm.xlu0 %4402, %v5358_v7   ;;  %v4065_v20 = vpop.f32.mrb[33].mxu0  ;;  %v5457_v38 = vrot.slane %v5392_v52, %v2449_v3  ;;  %v5461_v6 = vrot.slane %v5392_v52, %v2951_v2  ;;  %v5469_v15 = vrot.slane %v5392_v52, %v1525_v41  ;;  %v5479_v33 = vrot.slane %v5392_v52, %v1939_v51 }
 0x48a   : > { %4388 = vset.pattern.permute.xlu1 %v4756_v55 }
 0x48b   : > { %2902 = vperm.xlu1 %4388, %v1273_v14  }
 0x48c   : > { %4407 = vset.pattern.permute.xlu0 %v4748_v1 }
 0x48d   : > { %1495 = vperm.xlu0 %4407, %v5360_v53  }
 0x48f   : > { %4389 = vset.pattern.permute.xlu1 %v4748_v1 }
 0x490   : > { %1480 = vperm.xlu1 %4389, %v5347_v45  }
 0x491   : > { %4408 = vset.pattern.permute.xlu0 %v4755_v56 }
 0x492   : > { %1914 = vperm.xlu0 %4408, %v5360_v53  }
 0x494   : > { %4390 = vset.pattern.permute.xlu1 %v4755_v56 }
 0x495   : > { %1902 = vperm.xlu1 %4390, %v5347_v45  }
 0x496   : > { %4414 = vset.pattern.permute.xlu0 %v4756_v55 }
 0x497   : > { %2938 = vperm.xlu0 %4414, %v5364_v19  }
 0x499   : > { %4391 = vset.pattern.permute.xlu1 %v4756_v55 }
 0x49a   : > { %2914 = vperm.xlu1 %4391, %v5347_v45  }
 0x49b   : > { %4415 = vset.pattern.permute.xlu0 %v4748_v1 }
 0x49c   : > { %1505 = vperm.xlu0 %4415, %v5366_v10  }
 0x49e   : > { %4393 = vset.pattern.permute.xlu1 %v4755_v56 }
 0x49f   : > { %1898 = vperm.xlu1 %4393, %v5349_v5  }
 0x4a0   : > { %4416 = vset.pattern.permute.xlu0 %v4755_v56 }
 0x4a1   : > { %1922 = vperm.xlu0 %4416, %v5366_v10  }
 0x4a3   : > { %4394 = vset.pattern.permute.xlu1 %v4757_v62 }
 0x4a4   : > { %2408 = vperm.xlu1 %4394, %v5349_v5  }
 0x4a5   : > { %4417 = vset.pattern.permute.xlu0 %v4757_v62 }
 0x4a6   : > { %2432 = vperm.xlu0 %4417, %v5366_v10  }
 0x4a8   : > { %4395 = vset.pattern.permute.xlu1 %v4756_v55 }
 0x4a9   : > { %2910 = vperm.xlu1 %4395, %v5349_v5  }
 0x4aa   : > { %2444 = vperm.xlu0 %4417, %v5369_v22  }
 0x4ad   : > { %4396 = vset.pattern.permute.xlu1 %v4748_v1 }
 0x4ae   : > { %1490 = vperm.xlu1 %4396, %v5353_v13   ;;  %4422 = vset.pattern.permute.xlu0 %v4748_v1 }
 0x4af   : > { %1515 = vperm.xlu0 %4422, %v5372_v36  }
 0x4b2   : > { %4397 = vset.pattern.permute.xlu1 %v4755_v56 }
 0x4b3   : > { %1910 = vperm.xlu1 %4397, %v5353_v13   ;;  %4423 = vset.pattern.permute.xlu0 %v4755_v56 }
 0x4b4   : > { %1930 = vperm.xlu0 %4423, %v5372_v36  }
 0x4b7   : > { %4398 = vset.pattern.permute.xlu1 %v4757_v62 }
 0x4b8   : > { %2420 = vperm.xlu1 %4398, %v5353_v13   ;;  %4426 = vset.pattern.permute.xlu0 %v4756_v55 }
 0x4bc   : > { %4401 = vset.pattern.permute.xlu1 %v4755_v56 }
 0x4bd   : > { %1906 = vperm.xlu1 %4401, %v5355_v16  }
 0x4c1   : > { %4403 = vset.pattern.permute.xlu1 %v4756_v55 }
 0x4c2   : > { %2918 = vperm.xlu1 %4403, %v5355_v16  }
 0x4c4   : > { %v5452_v35 = vpop.permute.xlu1 %1450  ;;  %v5454_v40 = vpop.permute.xlu0 %1878 }
 0x4c6   : > { %4404 = vset.pattern.permute.xlu1 %v4748_v1 }
 0x4c7   : > { %1500 = vperm.xlu1 %4404, %v5358_v7  }
 0x4c9   : > { %v2389_v42 = vpop.permute.xlu1 %2388  ;;  %v2891_v25 = vpop.permute.xlu0 %2890 }
 0x4ca   : > { %v2452_v28 = vadd.f32 %v5457_v38, %v2389_v42  ;;  %v2954_v9 = vadd.f32 %v5461_v6, %v2891_v25 }
 0x4cb   : > { %4405 = vset.pattern.permute.xlu1 %v4755_v56 }
 0x4cc   : > { %v2484_v8 = vmul.f32 0.2, %v2452_v28  ;;  %1918 = vperm.xlu1 %4405, %v5358_v7   ;;  %vm2468_vm2 = vcmp.gt.f32.partialorder %v2452_v28, 0.0  ;;  %v2986_v21 = vmul.f32 0.2, %v2954_v9  ;;  %vm2970_vm3 = vcmp.gt.f32.partialorder %v2954_v9, 0.0 }
 0x4ce   : > { %v1875_v54 = vpop.permute.xlu1 %1874  ;;  %v1446_v47 = vpop.permute.xlu0 %1445  ;;  %v2500_v4 = vsel %vm2468_vm2, %v2452_v28, %v2484_v8  ;;  %v3002_v50 = vsel %vm2970_vm3, %v2954_v9, %v2986_v21 }
 0x4cf   : > { %v1527_v24 = vadd.f32 %v5469_v15, %v1446_v47  ;;  %v5485_v49 = vsel %vm1420_vm4, %v2500_v4, -9e+15  ;;  %v1941_v59 = vadd.f32 %v5479_v33, %v1875_v54  ;;  %v5502_v0 = vsel %vm1420_vm4, %v3002_v50, -9e+15 }
 0x4d0   : > { %4406 = vset.pattern.permute.xlu1 %v4756_v55 }
 0x4d1   : > { %2930 = vperm.xlu1 %4406, %v5358_v7   ;;  %v1559_v60 = vmul.f32 0.2, %v1527_v24  ;;  %vm1543_vm5 = vcmp.gt.f32.partialorder %v1527_v24, 0.0  ;;  %v1973_v14 = vmul.f32 0.2, %v1941_v59  ;;  %vm1957_vm7 = vcmp.gt.f32.partialorder %v1941_v59, 0.0 }
 0x4d3   : > { %v5488_v61 = vpop.permute.xlu1 %2886  ;;  %2533 = vmax.xlane.f32.xlu0 %v5485_v49  ;;  %v5497_v63 = vpop.permute.xlu0 %2384  ;;  %v1575_v45 = vsel %vm1543_vm5, %v1527_v24, %v1559_v60  ;;  %v1989_v52 = vsel %vm1957_vm7, %v1941_v59, %v1973_v14 }
 0x4d4   : > { %v5510_v16 = vsel %vm1419_vm6, %v1575_v45, -9e+15  ;;  %v5520_v2 = vsel %vm1419_vm6, %v1989_v52, -9e+15 }
 0x4d5   : > { %4409 = vset.pattern.permute.xlu1 %v4757_v62 }
 0x4d6   : > { %2424 = vperm.xlu1 %4409, %v5360_v53  }
 0x4d7   : > { %3035 = vmax.xlane.f32.xlu0 %v5502_v0  ;;  %v2397_v20 = vpop.permute.xlu0 %2396 }
 0x4d8   : > { %v1461_v5 = vpop.permute.xlu1 %1460  ;;  %v2454_v41 = vadd.f32 %v5457_v38, %v2397_v20 }
 0x4d9   : > { %v1530_v13 = vadd.f32 %v5469_v15, %v1461_v5 }
 0x4da   : > { %4410 = vset.pattern.permute.xlu1 %v4756_v55  ;;  %v2486_v9 = vmul.f32 0.2, %v2454_v41  ;;  %vm2470_vm11 = vcmp.gt.f32.partialorder %v2454_v41, 0.0 }
 0x4db   : > { %v1562_v7 = vmul.f32 0.2, %v1530_v13  ;;  %2926 = vperm.xlu1 %4410, %v5360_v53   ;;  %1607 = vmax.xlane.f32.xlu0 %v5510_v16  ;;  %vm1546_vm8 = vcmp.gt.f32.partialorder %v1530_v13, 0.0 }
 0x4dc   : > { %v1456_v54 = vpop.permute.xlu0 %1455  ;;  %v2502_v59 = vsel %vm2470_vm11, %v2454_v41, %v2486_v9 }
 0x4dd   : > { %v1887_v12 = vpop.permute.xlu1 %1886  ;;  %v1578_v53 = vsel %vm1546_vm8, %v1530_v13, %v1562_v7  ;;  %v1529_v21 = vadd.f32 %v5469_v15, %v1456_v54  ;;  %v5541_v60 = vsel %vm1422_vm9, %v2502_v59, -9e+15  ;;  %v5550_v13 = vld [vmem:[%s6785_s7 + $0x10] sm:$0xff] }
 0x4de   : > { %v1944_v3 = vadd.f32 %v5479_v33, %v1887_v12  ;;  %v5527_v28 = vsel %vm1422_vm9, %v1578_v53, -9e+15  ;;  %vm1421_vm14 = vcmp.gt.f32.partialorder %v5550_v13, 0.0 }
 0x4df   : > { %4411 = vset.pattern.permute.xlu1 %v4748_v1  ;;  %2021 = vmax.xlane.f32.xlu0 %v5520_v2  ;;  %v1561_v50 = vmul.f32 0.2, %v1529_v21  ;;  %vm1545_vm13 = vcmp.gt.f32.partialorder %v1529_v21, 0.0 }
 0x4e0   : > { %v1976_v42 = vmul.f32 0.2, %v1944_v3  ;;  %1510 = vperm.xlu1 %4411, %v5364_v19   ;;  %vm1960_vm10 = vcmp.gt.f32.partialorder %v1944_v3, 0.0 }
 0x4e1   : > { %v1577_v52 = vsel %vm1545_vm13, %v1529_v21, %v1561_v50  ;;  %v2907_v9 = vpop.permute.xlu0 %2906 }
 0x4e2   : > { %v2899_v25 = vpop.permute.xlu1 %2898  ;;  %v1992_v51 = vsel %vm1960_vm10, %v1944_v3, %v1976_v42  ;;  %v5563_v12 = vsel %vm1421_vm14, %v1577_v52, -9e+15  ;;  %v2958_v54 = vadd.f32 %v5461_v6, %v2907_v9 }
 0x4e3   : > { %v2956_v8 = vadd.f32 %v5461_v6, %v2899_v25  ;;  %1613 = vmax.xlane.f32.xlu0 %v5527_v28  ;;  %v5534_v47 = vsel %vm1422_vm9, %v1992_v51, -9e+15 }
 0x4e4   : > { %4412 = vset.pattern.permute.xlu1 %v4755_v56  ;;  %v2990_v50 = vmul.f32 0.2, %v2958_v54  ;;  %vm2974_vm5 = vcmp.gt.f32.partialorder %v2958_v54, 0.0 }
 0x4e5   : > { %1926 = vperm.xlu1 %4412, %v5364_v19   ;;  %v2988_v24 = vmul.f32 0.2, %v2956_v8  ;;  %vm2972_vm12 = vcmp.gt.f32.partialorder %v2956_v8, 0.0 }
 0x4e7   : > { %v1883_v4 = vpop.permute.xlu1 %1882  ;;  %2027 = vmax.xlane.f32.xlu0 %v5534_v47  ;;  %v3004_v45 = vsel %vm2972_vm12, %v2956_v8, %v2988_v24 }
 0x4e8   : > { %v1943_v14 = vadd.f32 %v5479_v33, %v1883_v4 }
 0x4e9   : > { %4413 = vset.pattern.permute.xlu1 %v4757_v62 }
 0x4ea   : > { %2436 = vperm.xlu1 %4413, %v5364_v19   ;;  %v5554_v19 = vsel %vm1422_vm9, %v3004_v45, -9e+15  ;;  %v1975_v7 = vmul.f32 0.2, %v1943_v14  ;;  %vm1959_vm15 = vcmp.gt.f32.partialorder %v1943_v14, 0.0 }
 0x4eb   : > { %2537 = vmax.xlane.f32.xlu0 %v5541_v60 }
 0x4ec   : > { %v5545_v5 = vpop.permute.xlu1 %2392  ;;  %v1991_v31 = vsel %vm1959_vm15, %v1943_v14, %v1975_v7 }
 0x4ed   : > { %v5570_v3 = vsel %vm1421_vm14, %v1991_v31, -9e+15 }
 0x4ee   : > { %4418 = vset.pattern.permute.xlu1 %v4756_v55 }
 0x4ef   : > { %2934 = vperm.xlu1 %4418, %v5366_v10   ;;  %3039 = vmax.xlane.f32.xlu0 %v5554_v19 }
 0x4f1   : > { %v5559_v20 = vpop.permute.xlu1 %2894 }
 0x4f3   : > { %4419 = vset.pattern.permute.xlu1 %v4748_v1  ;;  %1611 = vmax.xlane.f32.xlu0 %v5563_v12  ;;  %v1408_v1 = vld [vmem:[%s6785_s7 + $0x28] sm:$0xff] }
 0x4f4   : > { %1520 = vperm.xlu1 %4419, %v5369_v22   ;;  %vm1424_vm1 = vcmp.gt.f32.partialorder %v1408_v1, 0.0 }
 0x4f6   : > { %v1471_v10 = vpop.permute.xlu1 %1470 }
 0x4f7   : > { %v1532_v41 = vadd.f32 %v5469_v15, %v1471_v10  ;;  %2025 = vmax.xlane.f32.xlu0 %v5570_v3 }
 0x4f8   : > { %4420 = vset.pattern.permute.xlu1 %v4755_v56 }
 0x4f9   : > { %v1564_v53 = vmul.f32 0.2, %v1532_v41  ;;  %1934 = vperm.xlu1 %4420, %v5369_v22   ;;  %vm1548_vm0 = vcmp.gt.f32.partialorder %v1532_v41, 0.0 }
 0x4fb   : > { %v1895_v42 = vpop.permute.xlu1 %1894  ;;  %v1580_v25 = vsel %vm1548_vm0, %v1532_v41, %v1564_v53 }
 0x4fc   : > { %v1946_v8 = vadd.f32 %v5479_v33, %v1895_v42  ;;  %v5581_v51 = vsel %vm1424_vm1, %v1580_v25, -9e+15 }
 0x4fd   : > { %4421 = vset.pattern.permute.xlu1 %v4756_v55  ;;  %1617 = vmax.xlane.f32.xlu0 %v5581_v51 }
 0x4fe   : > { %v1978_v56 = vmul.f32 0.2, %v1946_v8  ;;  %2946 = vperm.xlu1 %4421, %v5369_v22   ;;  %vm1962_vm2 = vcmp.gt.f32.partialorder %v1946_v8, 0.0  ;;  %v5594_v22 = vpop.permute.xlu0 %1465 }
 0x500   : > { %v2405_v21 = vpop.permute.xlu1 %2404  ;;  %v1994_v24 = vsel %vm1962_vm2, %v1946_v8, %v1978_v56 }
 0x501   : > { %v2456_v4 = vadd.f32 %v5457_v38, %v2405_v21  ;;  %v5589_v59 = vsel %vm1424_vm1, %v1994_v24, -9e+15 }
 0x502   : > { %4424 = vset.pattern.permute.xlu1 %v4757_v62  ;;  %2031 = vmax.xlane.f32.xlu0 %v5589_v59  ;;  %v3006_v62 = vsel %vm2974_vm5, %v2958_v54, %v2990_v50  ;;  %v5604_v31 = vpop.permute.xlu0 %2400 }
 0x503   : > { %v2488_v14 = vmul.f32 0.2, %v2456_v4  ;;  %2440 = vperm.xlu1 %4424, %v5372_v36   ;;  %vm2472_vm3 = vcmp.gt.f32.partialorder %v2456_v4, 0.0  ;;  %v5609_v41 = vsel %vm1424_vm1, %v3006_v62, -9e+15 }
 0x505   : > { %v5596_v45 = vpop.permute.xlu1 %1890  ;;  %v2504_v7 = vsel %vm2472_vm3, %v2456_v4, %v2488_v14 }
 0x506   : > { %v5599_v52 = vsel %vm1424_vm1, %v2504_v7, -9e+15  ;;  %v2413_v42 = vpop.permute.xlu0 %2412 }
 0x507   : > { %4425 = vset.pattern.permute.xlu1 %v4756_v55  ;;  %2541 = vmax.xlane.f32.xlu0 %v5599_v52  ;;  %v1410_v55 = vld [vmem:[%s6785_s7 + $0x38] sm:$0xff] }
 0x508   : > { %2942 = vperm.xlu1 %4425, %v5372_v36   ;;  %v2458_v36 = vadd.f32 %v5457_v38, %v2413_v42  ;;  %vm1426_vm8 = vcmp.gt.f32.partialorder %v1410_v55, 0.0  ;;  %v2953_v55 = vadd.f32 %v5461_v6, %v5488_v61  ;;  %v1412_v61 = vld [vmem:[%s6785_s7 + $0x48] sm:$0xff] }
 0x509   : > { %vm1428_vm2 = vcmp.gt.f32.partialorder %v1412_v61, 0.0 }
 0x50a   : > { %v5606_v10 = vpop.permute.xlu1 %2902  ;;  %v2490_v21 = vmul.f32 0.2, %v2458_v36  ;;  %vm2474_vm10 = vcmp.gt.f32.partialorder %v2458_v36, 0.0  ;;  %v2985_v46 = vmul.f32 0.2, %v2953_v55  ;;  %vm2969_vm1 = vcmp.gt.f32.partialorder %v2953_v55, 0.0 }
 0x50b   : > { %3043 = vmax.xlane.f32.xlu0 %v5609_v41 }
 0x50c   : > { %v2506_v62 = vsel %vm2474_vm10, %v2458_v36, %v2490_v21  ;;  %v1942_v21 = vadd.f32 %v5479_v33, %v5454_v40 }
 0x50e   : > { %vm1958_vm13 = vcmp.gt.f32.partialorder %v1942_v21, 0.0 }
 0x50f   : > { %v1481_v53 = vpop.permute.xlu1 %1480 }
 0x510   : > { %v1534_v25 = vadd.f32 %v5469_v15, %v1481_v53 }
 0x512   : > { %v1566_v9 = vmul.f32 0.2, %v1534_v25  ;;  %vm1550_vm7 = vcmp.gt.f32.partialorder %v1534_v25, 0.0 }
 0x514   : > { %v1903_v8 = vpop.permute.xlu1 %1902  ;;  %v1582_v56 = vsel %vm1550_vm7, %v1534_v25, %v1566_v9  ;;  %v5630_v25 = vsel %vm1426_vm8, %v2506_v62, -9e+15 }
 0x515   : > { %v1948_v1 = vadd.f32 %v5479_v33, %v1903_v8  ;;  %v5619_v54 = vsel %vm1426_vm8, %v1582_v56, -9e+15  ;;  %v1528_v8 = vadd.f32 %v5469_v15, %v5452_v35 }
 0x516   : > { %1621 = vmax.xlane.f32.xlu0 %v5619_v54 }
 0x517   : > { %v1980_v24 = vmul.f32 0.2, %v1948_v1  ;;  %vm1964_vm9 = vcmp.gt.f32.partialorder %v1948_v1, 0.0  ;;  %v1560_v36 = vmul.f32 0.2, %v1528_v8  ;;  %vm1544_vm12 = vcmp.gt.f32.partialorder %v1528_v8, 0.0 }
 0x519   : > { %v2915_v4 = vpop.permute.xlu1 %2914  ;;  %v1996_v50 = vsel %vm1964_vm9, %v1948_v1, %v1980_v24  ;;  %v5643_v24 = vpop.permute.xlu0 %1475  ;;  %v1576_v35 = vsel %vm1544_vm12, %v1528_v8, %v1560_v36  ;;  %v2453_v36 = vadd.f32 %v5457_v38, %v5545_v5 }
 0x51a   : > { %v2960_v14 = vadd.f32 %v5461_v6, %v2915_v4  ;;  %v5624_v7 = vsel %vm1426_vm8, %v1996_v50, -9e+15  ;;  %v1974_v4 = vmul.f32 0.2, %v1942_v21  ;;  %v2451_v50 = vadd.f32 %v5457_v38, %v5497_v63 }
 0x51b   : > { %2035 = vmax.xlane.f32.xlu0 %v5624_v7  ;;  %v5653_v62 = vsel %vm1420_vm4, %v1576_v35, -9e+15  ;;  %v2485_v5 = vmul.f32 0.2, %v2453_v36  ;;  %vm2469_vm3 = vcmp.gt.f32.partialorder %v2453_v36, 0.0  ;;  %v1533_v61 = vadd.f32 %v5469_v15, %v5643_v24 }
 0x51c   : > { %v2992_v53 = vmul.f32 0.2, %v2960_v14  ;;  %vm2976_vm11 = vcmp.gt.f32.partialorder %v2960_v14, 0.0  ;;  %v1990_v40 = vsel %vm1958_vm13, %v1942_v21, %v1974_v4  ;;  %vm2467_vm15 = vcmp.gt.f32.partialorder %v2451_v50, 0.0 }
 0x51d   : > { %v5659_v8 = vsel %vm1420_vm4, %v1990_v40, -9e+15  ;;  %v1565_v29 = vmul.f32 0.2, %v1533_v61 }
 0x51e   : > { %v5627_v42 = vpop.permute.xlu1 %1898  ;;  %v3008_v9 = vsel %vm2976_vm11, %v2960_v14, %v2992_v53  ;;  %v2483_v53 = vmul.f32 0.2, %v2451_v50 }
 0x51f   : > { %2545 = vmax.xlane.f32.xlu0 %v5630_v25  ;;  %v5636_v56 = vsel %vm1426_vm8, %v3008_v9, -9e+15  ;;  %v2923_v9 = vpop.permute.xlu0 %2922 }
 0x520   : > { %v2499_v21 = vsel %vm2467_vm15, %v2451_v50, %v2483_v53  ;;  %v2955_v50 = vadd.f32 %v5461_v6, %v5559_v20  ;;  %v3001_v53 = vsel %vm2969_vm1, %v2953_v55, %v2985_v46  ;;  %v2501_v55 = vsel %vm2469_vm3, %v2453_v36, %v2485_v5 }
 0x521   : > { %v5672_v40 = vsel %vm1419_vm6, %v2499_v21, -9e+15  ;;  %v1531_v21 = vadd.f32 %v5469_v15, %v5594_v22  ;;  %v5698_v44 = vsel %vm1421_vm14, %v2501_v55, -9e+15  ;;  %vm1549_vm15 = vcmp.gt.f32.partialorder %v1533_v61, 0.0 }
 0x522   : > { %v2987_v20 = vmul.f32 0.2, %v2955_v50  ;;  %vm2971_vm5 = vcmp.gt.f32.partialorder %v2955_v50, 0.0  ;;  %vm1425_vm1 = vcmp.gt.f32.partialorder %v1409_v37, 0.0 }
 0x523   : > { %v5638_v1 = vpop.permute.xlu1 %2408  ;;  %3047 = vmax.xlane.f32.xlu0 %v5636_v56  ;;  %v5667_v58 = vpop.permute.xlu0 %1485  ;;  %vm1547_vm8 = vcmp.gt.f32.partialorder %v1531_v21, 0.0 }
 0x524   : > { %v3003_v5 = vsel %vm2971_vm5, %v2955_v50, %v2987_v20 }
 0x527   : > { %v5693_v34 = vpop.permute.xlu0 %2416 }
 0x528   : > { %v5647_v14 = vpop.permute.xlu1 %2910 }
 0x52b   : > { %v2429_v57 = vpop.permute.xlu0 %2428 }
 0x52c   : > { %1609 = vmax.xlane.f32.xlu1 %v5653_v62 }
 0x52d   : > { %v1491_v30 = vpop.permute.xlu1 %1490 }
 0x52e   : > { %v1536_v63 = vadd.f32 %v5469_v15, %v1491_v30 }
 0x530   : > { %v1568_v35 = vmul.f32 0.2, %v1536_v63  ;;  %2023 = vmax.xlane.f32.xlu1 %v5659_v8  ;;  %vm1552_vm0 = vcmp.gt.f32.partialorder %v1536_v63, 0.0 }
 0x532   : > { %v1911_v4 = vpop.permute.xlu1 %1910  ;;  %v1584_v30 = vsel %vm1552_vm0, %v1536_v63, %v1568_v35  ;;  %v2962_v35 = vadd.f32 %v5461_v6, %v2923_v9 }
 0x533   : > { %v1950_v17 = vadd.f32 %v5479_v33, %v1911_v4  ;;  %v5675_v26 = vsel %vm1428_vm2, %v1584_v30, -9e+15  ;;  %v5686_v30 = vsel %vm1419_vm6, %v3001_v53, -9e+15  ;;  %v1945_v53 = vadd.f32 %v5479_v33, %v5596_v45 }
 0x534   : > { %6868 = vst [vmem:[#allocation22_spill] sm:$0xff] %v5675_v26  ;;  %2531 = vmax.xlane.f32.xlu1 %v5672_v40  ;;  %1625 = vmax.xlane.f32.xlu0 %v5675_v26  ;;  %v2994_v22 = vmul.f32 0.2, %v2962_v35  ;;  %vm2978_vm6 = vcmp.gt.f32.partialorder %v2962_v35, 0.0  ;;  %v5714_v45 = vsel %vm1421_vm14, %v3003_v5, -9e+15  ;;  %v5731_v5 = vpop.permute.xlu0 %1495 }
 0x535   : > { %v1982_v63 = vmul.f32 0.2, %v1950_v17  ;;  %vm1966_vm4 = vcmp.gt.f32.partialorder %v1950_v17, 0.0  ;;  %v1977_v50 = vmul.f32 0.2, %v1945_v53  ;;  %vm1961_vm10 = vcmp.gt.f32.partialorder %v1945_v53, 0.0 }
 0x536   : > { %v3010_v55 = vsel %vm2978_vm6, %v2962_v35, %v2994_v22 }
 0x537   : > { %v2421_v4 = vpop.permute.xlu1 %2420  ;;  %v1998_v18 = vsel %vm1966_vm4, %v1950_v17, %v1982_v63  ;;  %v1563_v17 = vmul.f32 0.2, %v1531_v21  ;;  %v1993_v22 = vsel %vm1961_vm10, %v1945_v53, %v1977_v50  ;;  %v2462_v50 = vadd.f32 %v5457_v38, %v2429_v57 }
 0x538   : > { %v2460_v39 = vadd.f32 %v5457_v38, %v2421_v4  ;;  %3033 = vmax.xlane.f32.xlu1 %v5686_v30  ;;  %v5691_v46 = vsel %vm1428_vm2, %v1998_v18, -9e+15  ;;  %v1407_v4 = vld [vmem:[%s6785_s7 + $0x20] sm:$0xff]  ;;  %v5744_v24 = vpop.permute.xlu0 %1914 }
 0x539   : > { %6869 = vst [vmem:[#allocation23_spill] sm:$0xff] %v5691_v46  ;;  %2039 = vmax.xlane.f32.xlu0 %v5691_v46  ;;  %vm1423_vm9 = vcmp.gt.f32.partialorder %v1407_v4, 0.0  ;;  %v1579_v20 = vsel %vm1547_vm8, %v1531_v21, %v1563_v17 }
 0x53a   : > { %v2492_v9 = vmul.f32 0.2, %v2460_v39  ;;  %vm2476_vm7 = vcmp.gt.f32.partialorder %v2460_v39, 0.0  ;;  %v5726_v13 = vsel %vm1423_vm9, %v1579_v20, -9e+15 }
 0x53c   : > { %v5702_v18 = vpop.permute.xlu1 %1906  ;;  %2535 = vmax.xlane.f32.xlu1 %v5698_v44  ;;  %v2508_v36 = vsel %vm2476_vm7, %v2460_v39, %v2492_v9  ;;  %v2455_v39 = vadd.f32 %v5457_v38, %v5604_v31  ;;  %v2957_v31 = vadd.f32 %v5461_v6, %v5606_v10  ;;  %v1414_v10 = vld [vmem:[%s6785_s7 + $0x58] sm:$0xff]  ;;  %v5766_v32 = vpop.permute.xlu0 %2938 }
 0x53d   : > { %v5706_v63 = vsel %vm1428_vm2, %v2508_v36, -9e+15  ;;  %v5722_v36 = vsel %vm1428_vm2, %v3010_v55, -9e+15  ;;  %v5737_v55 = vsel %vm1423_vm9, %v1993_v22, -9e+15 }
 0x53e   : > { %6870 = vst [vmem:[#allocation24_spill] sm:$0xff] %v5706_v63  ;;  %2549 = vmax.xlane.f32.xlu0 %v5706_v63  ;;  %6871 = vst [vmem:[#allocation25_spill] sm:$0xff] %v5722_v36  ;;  %v2487_v35 = vmul.f32 0.2, %v2455_v39  ;;  %vm2471_vm14 = vcmp.gt.f32.partialorder %v2455_v39, 0.0  ;;  %vm2973_vm12 = vcmp.gt.f32.partialorder %v2957_v31, 0.0 }
 0x53f   : > { %v2989_v20 = vmul.f32 0.2, %v2957_v31  ;;  %vm1430_vm13 = vcmp.gt.f32.partialorder %v1414_v10, 0.0  ;;  %vm2478_vm2 = vcmp.gt.f32.partialorder %v2462_v50, 0.0  ;;  %v1411_v10 = vld [vmem:[%s6785_s7 + $0x40] sm:$0xff] }
 0x540   : > { %3037 = vmax.xlane.f32.xlu1 %v5714_v45  ;;  %v2503_v27 = vsel %vm2471_vm14, %v2455_v39, %v2487_v35  ;;  %v1947_v39 = vadd.f32 %v5479_v33, %v5627_v42  ;;  %vm1427_vm8 = vcmp.gt.f32.partialorder %v1411_v10, 0.0 }
 0x541   : > { %v5719_v9 = vpop.permute.xlu1 %2918  ;;  %v5747_v22 = vsel %vm1423_vm9, %v2503_v27, -9e+15  ;;  %v3005_v57 = vsel %vm2973_vm12, %v2957_v31, %v2989_v20  ;;  %v2494_v27 = vmul.f32 0.2, %v2462_v50 }
 0x542   : > { %3051 = vmax.xlane.f32.xlu0 %v5722_v36  ;;  %v5761_v42 = vsel %vm1423_vm9, %v3005_v57, -9e+15  ;;  %vm1963_vm4 = vcmp.gt.f32.partialorder %v1947_v39, 0.0 }
 0x543   : > { %v2510_v4 = vsel %vm2478_vm2, %v2462_v50, %v2494_v27  ;;  %v5785_v27 = vpop.permute.xlu0 %1505 }
 0x544   : > { %1615 = vmax.xlane.f32.xlu1 %v5726_v13 }
 0x546   : > { %v1501_v21 = vpop.permute.xlu1 %1500 }
 0x547   : > { %v1538_v17 = vadd.f32 %v5469_v15, %v1501_v21 }
 0x548   : > { %2029 = vmax.xlane.f32.xlu1 %v5737_v55 }
 0x549   : > { %v1570_v53 = vmul.f32 0.2, %v1538_v17  ;;  %vm1554_vm11 = vcmp.gt.f32.partialorder %v1538_v17, 0.0 }
 0x54b   : > { %v1919_v21 = vpop.permute.xlu1 %1918  ;;  %v1586_v48 = vsel %vm1554_vm11, %v1538_v17, %v1570_v53  ;;  %v1979_v53 = vmul.f32 0.2, %v1947_v39 }
 0x54c   : > { %v1952_v35 = vadd.f32 %v5479_v33, %v1919_v21  ;;  %2539 = vmax.xlane.f32.xlu1 %v5747_v22  ;;  %v5754_v23 = vsel %vm1430_vm13, %v1586_v48, -9e+15  ;;  %v2457_v48 = vadd.f32 %v5457_v38, %v5638_v1  ;;  %v1581_v21 = vsel %vm1549_vm15, %v1533_v61, %v1565_v29 }
 0x54d   : > { %6872 = vst [vmem:[#allocation26_spill] sm:$0xff] %v5754_v23  ;;  %1629 = vmax.xlane.f32.xlu0 %v5754_v23  ;;  %v5774_v23 = vsel %vm1425_vm1, %v1581_v21, -9e+15  ;;  %v2959_v29 = vadd.f32 %v5461_v6, %v5647_v14  ;;  %v1995_v61 = vsel %vm1963_vm4, %v1947_v39, %v1979_v53  ;;  %v1535_v14 = vadd.f32 %v5469_v15, %v5667_v58 }
 0x54e   : > { %v1984_v17 = vmul.f32 0.2, %v1952_v35  ;;  %vm1968_vm0 = vcmp.gt.f32.partialorder %v1952_v35, 0.0  ;;  %v2489_v1 = vmul.f32 0.2, %v2457_v48  ;;  %vm2473_vm5 = vcmp.gt.f32.partialorder %v2457_v48, 0.0 }
 0x54f   : > { %vm2975_vm7 = vcmp.gt.f32.partialorder %v2959_v29, 0.0  ;;  %vm1551_vm6 = vcmp.gt.f32.partialorder %v1535_v14, 0.0 }
 0x550   : > { %v2931_v31 = vpop.permute.xlu1 %2930  ;;  %3041 = vmax.xlane.f32.xlu1 %v5761_v42  ;;  %v2000_v20 = vsel %vm1968_vm0, %v1952_v35, %v1984_v17  ;;  %v5782_v17 = vsel %vm1430_vm13, %v2510_v4, -9e+15  ;;  %v2505_v39 = vsel %vm2473_vm5, %v2457_v48, %v2489_v1  ;;  %v1567_v4 = vmul.f32 0.2, %v1535_v14  ;;  %v5808_v48 = vpop.permute.xlu0 %1922 }
 0x551   : > { %v2964_v11 = vadd.f32 %v5461_v6, %v2931_v31  ;;  %v5770_v43 = vsel %vm1430_vm13, %v2000_v20, -9e+15  ;;  %6874 = vst [vmem:[#allocation28_spill] sm:$0xff] %v5782_v17  ;;  %v5788_v31 = vsel %vm1425_vm1, %v1995_v61, -9e+15 }
 0x552   : > { %6873 = vst [vmem:[#allocation27_spill] sm:$0xff] %v5770_v43  ;;  %2043 = vmax.xlane.f32.xlu0 %v5770_v43  ;;  %v2991_v20 = vmul.f32 0.2, %v2959_v29 }
 0x553   : > { %v2996_v57 = vmul.f32 0.2, %v2964_v11  ;;  %vm2980_vm3 = vcmp.gt.f32.partialorder %v2964_v11, 0.0 }
 0x554   : > { %1619 = vmax.xlane.f32.xlu1 %v5774_v23  ;;  %v3007_v58 = vsel %vm2975_vm7, %v2959_v29, %v2991_v20  ;;  %v1583_v29 = vsel %vm1551_vm6, %v1535_v14, %v1567_v4  ;;  %v1416_v20 = vld [vmem:[%s6785_s7 + $0x68] sm:$0xff]  ;;  %v5820_v37 = vpop.permute.xlu0 %2432 }
 0x555   : > { %v5779_v35 = vpop.permute.xlu1 %2424  ;;  %v3012_v50 = vsel %vm2980_vm3, %v2964_v11, %v2996_v57  ;;  %v5800_v11 = vsel %vm1425_vm1, %v2505_v39, -9e+15  ;;  %v1949_v57 = vadd.f32 %v5479_v33, %v5702_v18  ;;  %v5811_v61 = vsel %vm1425_vm1, %v3007_v58, -9e+15 }
 0x556   : > { %2553 = vmax.xlane.f32.xlu0 %v5782_v17  ;;  %v5794_v53 = vsel %vm1430_vm13, %v3012_v50, -9e+15  ;;  %6876 = vst [vmem:[#allocation30_spill] sm:$0xff] %v5811_v61  ;;  %v2459_v50 = vadd.f32 %v5457_v38, %v5693_v34  ;;  %v5823_v58 = vsel %vm1427_vm8, %v1583_v29, -9e+15  ;;  %vm1432_vm14 = vcmp.gt.f32.partialorder %v1416_v20, 0.0 }
 0x557   : > { %6875 = vst [vmem:[#allocation29_spill] sm:$0xff] %v5794_v53  ;;  %v1981_v39 = vmul.f32 0.2, %v1949_v57  ;;  %vm1965_vm9 = vcmp.gt.f32.partialorder %v1949_v57, 0.0  ;;  %v1537_v29 = vadd.f32 %v5469_v15, %v5731_v5 }
 0x558   : > { %2033 = vmax.xlane.f32.xlu1 %v5788_v31  ;;  %v2491_v34 = vmul.f32 0.2, %v2459_v50  ;;  %vm2475_vm11 = vcmp.gt.f32.partialorder %v2459_v50, 0.0 }
 0x559   : > { %v1997_v4 = vsel %vm1965_vm9, %v1949_v57, %v1981_v39  ;;  %v2445_v57 = vpop.permute.xlu0 %2444  ;;  %vm1553_vm0 = vcmp.gt.f32.partialorder %v1537_v29, 0.0 }
 0x55a   : > { %v5796_v21 = vpop.permute.xlu1 %2926  ;;  %3055 = vmax.xlane.f32.xlu0 %v5794_v53  ;;  %v5836_v26 = vsel %vm1427_vm8, %v1997_v4, -9e+15  ;;  %v1951_v4 = vadd.f32 %v5479_v33, %v5744_v24  ;;  %v2466_v20 = vadd.f32 %v5457_v38, %v2445_v57 }
 0x55c   : > { %2543 = vmax.xlane.f32.xlu1 %v5800_v11  ;;  %vm1967_vm4 = vcmp.gt.f32.partialorder %v1951_v4, 0.0  ;;  %vm2482_vm9 = vcmp.gt.f32.partialorder %v2466_v20, 0.0 }
 0x55f   : > { %v1511_v1 = vpop.permute.xlu1 %1510 }
 0x560   : > { %v1540_v18 = vadd.f32 %v5469_v15, %v1511_v1  ;;  %3045 = vmax.xlane.f32.xlu1 %v5811_v61  ;;  %v2961_v1 = vadd.f32 %v5461_v6, %v5719_v9  ;;  %v2966_v9 = vadd.f32 %v5461_v6, %v5766_v32 }
 0x562   : > { %v1572_v53 = vmul.f32 0.2, %v1540_v18  ;;  %vm1556_vm10 = vcmp.gt.f32.partialorder %v1540_v18, 0.0  ;;  %vm2977_vm13 = vcmp.gt.f32.partialorder %v2961_v1, 0.0  ;;  %v2998_v61 = vmul.f32 0.2, %v2966_v9 }
 0x563   : > { %vm2982_vm1 = vcmp.gt.f32.partialorder %v2966_v9, 0.0 }
 0x564   : > { %v1927_v17 = vpop.permute.xlu1 %1926  ;;  %1623 = vmax.xlane.f32.xlu1 %v5823_v58  ;;  %v1588_v14 = vsel %vm1556_vm10, %v1540_v18, %v1572_v53  ;;  %v2993_v53 = vmul.f32 0.2, %v2961_v1  ;;  %v3014_v43 = vsel %vm2982_vm1, %v2966_v9, %v2998_v61 }
 0x565   : > { %v1954_v36 = vadd.f32 %v5479_v33, %v1927_v17  ;;  %v5830_v63 = vsel %vm1432_vm14, %v1588_v14, -9e+15  ;;  %v2507_v17 = vsel %vm2475_vm11, %v2459_v50, %v2491_v34 }
 0x566   : > { %6877 = vst [vmem:[#allocation31_spill] sm:$0xff] %v5830_v63  ;;  %1633 = vmax.xlane.f32.xlu0 %v5830_v63  ;;  %v1569_v63 = vmul.f32 0.2, %v1537_v29  ;;  %v5849_v32 = vsel %vm1427_vm8, %v2507_v17, -9e+15 }
 0x567   : > { %v1986_v46 = vmul.f32 0.2, %v1954_v36  ;;  %vm1970_vm12 = vcmp.gt.f32.partialorder %v1954_v36, 0.0 }
 0x568   : > { %2037 = vmax.xlane.f32.xlu1 %v5836_v26 }
 0x569   : > { %v2437_v39 = vpop.permute.xlu1 %2436  ;;  %v2002_v18 = vsel %vm1970_vm12, %v1954_v36, %v1986_v46  ;;  %v3009_v46 = vsel %vm2977_vm13, %v2961_v1, %v2993_v53  ;;  %v1413_v36 = vld [vmem:[%s6785_s7 + $0x50] sm:$0xff]  ;;  %v1983_v1 = vmul.f32 0.2, %v1951_v4  ;;  %v2461_v53 = vadd.f32 %v5457_v38, %v5779_v35 }
 0x56a   : > { %v2464_v14 = vadd.f32 %v5457_v38, %v2437_v39  ;;  %v5843_v5 = vsel %vm1432_vm14, %v2002_v18, -9e+15  ;;  %v5857_v39 = vpop.permute.xlu0 %1515  ;;  %v5860_v17 = vsel %vm1427_vm8, %v3009_v46, -9e+15  ;;  %vm1429_vm2 = vcmp.gt.f32.partialorder %v1413_v36, 0.0 }
 0x56b   : > { %6878 = vst [vmem:[#allocation32_spill] sm:$0xff] %v5843_v5  ;;  %2047 = vmax.xlane.f32.xlu0 %v5843_v5  ;;  %6879 = vst [vmem:[#allocation33_spill] sm:$0xff] %v5860_v17  ;;  %v1585_v5 = vsel %vm1553_vm0, %v1537_v29, %v1569_v63  ;;  %v2493_v46 = vmul.f32 0.2, %v2461_v53  ;;  %v1999_v63 = vsel %vm1967_vm4, %v1951_v4, %v1983_v1  ;;  %v1418_v29 = vld [vmem:[%s6785_s7 + $0x78] sm:$0xff]  ;;  %vm2477_vm3 = vcmp.gt.f32.partialorder %v2461_v53, 0.0 }
 0x56c   : > { %v2496_v50 = vmul.f32 0.2, %v2464_v14  ;;  %2547 = vmax.xlane.f32.xlu1 %v5849_v32  ;;  %vm2480_vm15 = vcmp.gt.f32.partialorder %v2464_v14, 0.0  ;;  %v5870_v10 = vsel %vm1429_vm2, %v1585_v5, -9e+15  ;;  %vm1434_vm7 = vcmp.gt.f32.partialorder %v1418_v29, 0.0 }
 0x56d   : > { %6881 = vst [vmem:[#allocation35_spill] sm:$0xff] %v5870_v10  ;;  %v5889_v9 = vsel %vm1429_vm2, %v1999_v63, -9e+15  ;;  %v2509_v1 = vsel %vm2477_vm3, %v2461_v53, %v2493_v46  ;;  %v1953_v53 = vadd.f32 %v5479_v33, %v5808_v48 }
 0x56e   : > { %v5855_v34 = vpop.permute.xlu1 %2934  ;;  %v2512_v24 = vsel %vm2480_vm15, %v2464_v14, %v2496_v50  ;;  %v5873_v50 = vsel %vm1432_vm14, %v3014_v43, -9e+15  ;;  %v5880_v61 = vpop.permute.xlu0 %1930  ;;  %v1539_v43 = vadd.f32 %v5469_v15, %v5785_v27  ;;  %6883 = vst [vmem:[#allocation37_spill] sm:$0xff] %v5889_v9 }
 0x56f   : > { %v5863_v18 = vsel %vm1432_vm14, %v2512_v24, -9e+15  ;;  %6882 = vst [vmem:[#allocation36_spill] sm:$0xff] %v5873_v50  ;;  %v2963_v24 = vadd.f32 %v5461_v6, %v5796_v21  ;;  %vm1969_vm12 = vcmp.gt.f32.partialorder %v1953_v53, 0.0 }
 0x570   : > { %6880 = vst [vmem:[#allocation34_spill] sm:$0xff] %v5863_v18  ;;  %3049 = vmax.xlane.f32.xlu1 %v5860_v17  ;;  %2557 = vmax.xlane.f32.xlu0 %v5863_v18  ;;  %v1571_v57 = vmul.f32 0.2, %v1539_v43  ;;  %v5900_v17 = vsel %vm1429_vm2, %v2509_v1, -9e+15  ;;  %vm1555_vm10 = vcmp.gt.f32.partialorder %v1539_v43, 0.0 }
 0x571   : > { %v2995_v5 = vmul.f32 0.2, %v2963_v24  ;;  %vm2979_vm6 = vcmp.gt.f32.partialorder %v2963_v24, 0.0  ;;  %6885 = vst [vmem:[#allocation39_spill] sm:$0xff] %v5900_v17 }
 0x573   : > { %v1521_v14 = vpop.permute.xlu1 %1520  ;;  %v3011_v46 = vsel %vm2979_vm6, %v2963_v24, %v2995_v5  ;;  %v1587_v5 = vsel %vm1555_vm10, %v1539_v43, %v1571_v57  ;;  %v2965_v43 = vadd.f32 %v5461_v6, %v5855_v34  ;;  %vm2868_vm6 = vcmask 785920  }
 0x574   : > { %v1542_v35 = vadd.f32 %v5469_v15, %v1521_v14  ;;  %1627 = vmax.xlane.f32.xlu1 %v5870_v10  ;;  %3059 = vmax.xlane.f32.xlu0 %v5873_v50  ;;  %v5892_v50 = vpop.xlane.xlu0 %2533  ;;  %v2498_v10 = vmul.f32 0.2, %v2466_v20  ;;  %v5916_v48 = vsel %vm1429_vm2, %v3011_v46, -9e+15  ;;  %vm3533_vm10 = vcmask 1042434  }
 0x575   : > { %vm2981_vm15 = vcmp.gt.f32.partialorder %v2965_v43, 0.0 }
 0x576   : > { %v1574_v21 = vmul.f32 0.2, %v1542_v35  ;;  %vm1558_vm5 = vcmp.gt.f32.partialorder %v1542_v35, 0.0  ;;  %v2514_v24 = vsel %vm2482_vm9, %v2466_v20, %v2498_v10  ;;  %vm3531_vm9 = vcmask 1041409  }
 0x578   : > { %v1935_v14 = vpop.permute.xlu1 %1934  ;;  %2041 = vmax.xlane.f32.xlu1 %v5889_v9  ;;  %v1590_v4 = vsel %vm1558_vm5, %v1542_v35, %v1574_v21  ;;  %v1415_v35 = vld [vmem:[%s6785_s7 + $0x60] sm:$0xff]  ;;  %v2463_v9 = vadd.f32 %v5457_v38, %v5820_v37  ;;  %vm1856_vm5 = vcmask 261120  }
 0x579   : > { %v1956_v18 = vadd.f32 %v5479_v33, %v1935_v14  ;;  %v5896_v27 = vsel %vm1434_vm7, %v1590_v4, -9e+15  ;;  %vm1431_vm14 = vcmp.gt.f32.partialorder %v1415_v35, 0.0 }
 0x57a   : > { %6884 = vst [vmem:[#allocation38_spill] sm:$0xff] %v5896_v27  ;;  %1637 = vmax.xlane.f32.xlu0 %v5896_v27  ;;  %v5912_v27 = vpop.xlane.xlu0 %3035  ;;  %v5926_v36 = vsel %vm1431_vm14, %v1587_v5, -9e+15  ;;  %v2495_v20 = vmul.f32 0.2, %v2463_v9  ;;  %vm2479_vm13 = vcmp.gt.f32.partialorder %v2463_v9, 0.0  ;;  %v1955_v5 = vadd.f32 %v5479_v33, %v5880_v61 }
 0x57b   : > { %v1988_v63 = vmul.f32 0.2, %v1956_v18  ;;  %vm1972_vm8 = vcmp.gt.f32.partialorder %v1956_v18, 0.0  ;;  %v2564_v33 = vsub.f32 %v5485_v49, %v5892_v50 }
 0x57c   : > { %2551 = vmax.xlane.f32.xlu1 %v5900_v17  ;;  %v1985_v17 = vmul.f32 0.2, %v1953_v53  ;;  %v2511_v34 = vsel %vm2479_vm13, %v2463_v9, %v2495_v20  ;;  %v1987_v9 = vmul.f32 0.2, %v1955_v5  ;;  %vm1971_vm2 = vcmp.gt.f32.partialorder %v1955_v5, 0.0 }
 0x57d   : > { %v2947_v21 = vpop.permute.xlu1 %2946  ;;  %v2004_v14 = vsel %vm1972_vm8, %v1956_v18, %v1988_v63  ;;  %v5922_v63 = vsel %vm1434_vm7, %v2514_v24, -9e+15  ;;  %v5944_v29 = vsel %vm1431_vm14, %v2511_v34, -9e+15  ;;  %v2581_v34 = vmul.f32 1.442695, %v2564_v33 }
 0x57e   : > { %v2968_v4 = vadd.f32 %v5461_v6, %v2947_v21  ;;  %v5910_v1 = vsel %vm1434_vm7, %v2004_v14, -9e+15  ;;  %v2001_v37 = vsel %vm1969_vm12, %v1953_v53, %v1985_v17  ;;  %v1608_v57 = vpop.xlane.xlu0 %1607  ;;  %v1541_v14 = vadd.f32 %v5469_v15, %v5857_v39  ;;  %6886 = vst [vmem:[#allocation40_spill] sm:$0xff] %v5944_v29  ;;  %v1417_v15 = vld [vmem:[%s6785_s7 + $0x70] sm:$0xff] }
 0x57f   : > { %2051 = vmax.xlane.f32.xlu0 %v5910_v1  ;;  %v5936_v21 = vsel %vm1431_vm14, %v2001_v37, -9e+15  ;;  %vm1433_vm1 = vcmp.gt.f32.partialorder %v1417_v15, 0.0  ;;  %4428 = vpow2.f32 %v2581_v34  ;;  %vm3370_vm8 = vcmask 1048320  }
 0x580   : > { %v3000_v18 = vmul.f32 0.2, %v2968_v4  ;;  %3053 = vmax.xlane.f32.xlu1 %v5916_v48  ;;  %vm2984_vm11 = vcmp.gt.f32.partialorder %v2968_v4, 0.0  ;;  %v1573_v53 = vmul.f32 0.2, %v1541_v14  ;;  %vm1557_vm0 = vcmp.gt.f32.partialorder %v1541_v14, 0.0 }
 0x581   : > { %vm3539_vm12 = vcmask 1045509   ;;  %vm3541_vm13 = vcmask 1046534  }
 0x582   : > { %v3016_v10 = vsel %vm2984_vm11, %v2968_v4, %v3000_v18  ;;  %v2997_v4 = vmul.f32 0.2, %v2965_v43  ;;  %v5941_v24 = vpop.xlane.xlu0 %2021  ;;  %v2441_v17 = vpop.permute.xlu1 %2440  ;;  %v1589_v20 = vsel %vm1557_vm0, %v1541_v14, %v1573_v53  ;;  %vm3537_vm11 = vcmask 1044484  }
 0x583   : > { %2561 = vmax.xlane.f32.xlu0 %v5922_v63  ;;  %v5932_v46 = vsel %vm1434_vm7, %v3016_v10, -9e+15  ;;  %v2465_v10 = vadd.f32 %v5457_v38, %v2441_v17  ;;  %v5962_v37 = vsel %vm1433_vm1, %v1589_v20, -9e+15  ;;  %v2003_v38 = vsel %vm1971_vm2, %v1955_v5, %v1987_v9 }
 0x584   : > { %1631 = vmax.xlane.f32.xlu1 %v5926_v36  ;;  %v3013_v18 = vsel %vm2981_vm15, %v2965_v43, %v2997_v4  ;;  %v1639_v17 = vsub.f32 %v5510_v16, %v1608_v57  ;;  %v5970_v49 = vsel %vm1433_vm1, %v2003_v38, -9e+15  ;;  %vm2366_vm7 = vcmask 523520  }
 0x585   : > { %v5953_v39 = vsel %vm1431_vm14, %v3013_v18, -9e+15  ;;  %v2497_v35 = vmul.f32 0.2, %v2465_v10  ;;  %vm2481_vm4 = vcmp.gt.f32.partialorder %v2465_v10, 0.0  ;;  %vm3535_vm14 = vcmask 1043459  }
 0x586   : > { %6887 = vst [vmem:[#allocation41_spill] sm:$0xff] %v5953_v39  ;;  %v5959_v61 = vpop.xlane.xlu0 %1613  ;;  %v1655_v18 = vmul.f32 1.442695, %v1639_v17  ;;  %vm3543_vm15 = vcmask 1047559  }
 0x587   : > { %3063 = vmax.xlane.f32.xlu0 %v5932_v46  ;;  %v2943_v43 = vpop.permute.xlu1 %2942  ;;  %v2513_v53 = vsel %vm2481_vm4, %v2465_v10, %v2497_v35 }
 0x588   : > { %2045 = vmax.xlane.f32.xlu1 %v5936_v21  ;;  %v2967_v4 = vadd.f32 %v5461_v6, %v2943_v43  ;;  %v5974_v6 = vsel %vm1433_vm1, %v2513_v53, -9e+15  ;;  %4430 = vpow2.f32 %v1655_v18 }
 0x589   : > { %6888 = vst [vmem:[#allocation42_spill] sm:$0xff] %v5974_v6  ;;  %v5981_v9 = vpop.eup %4428 }
 0x58a   : > { %v5967_v14 = vpop.xlane.xlu0 %2027  ;;  %v2999_v50 = vmul.f32 0.2, %v2967_v4  ;;  %vm2983_vm3 = vcmp.gt.f32.partialorder %v2967_v4, 0.0 }
 0x58c   : > { %2555 = vmax.xlane.f32.xlu1 %v5944_v29  ;;  %v3015_v5 = vsel %vm2983_vm3, %v2967_v4, %v2999_v50  ;;  %v3066_v50 = vsub.f32 %v5502_v0, %v5912_v27 }
 0x58d   : > { %v5978_v57 = vsel %vm1433_vm1, %v3015_v5, -9e+15 }
 0x58e   : > { %v2538_v16 = vpop.xlane.xlu0 %2537  ;;  %6889 = vst [vmem:[#allocation43_spill] sm:$0xff] %v5978_v57  ;;  %v3083_v29 = vmul.f32 1.442695, %v3066_v50 }
 0x590   : > { %3057 = vmax.xlane.f32.xlu1 %v5953_v39 }
 0x592   : > { %v5983_v20 = vpop.xlane.xlu0 %3039  ;;  %v5986_v10 = vpop.eup %4430 }
 0x594   : > { %1635 = vmax.xlane.f32.xlu1 %v5962_v37 }
 0x596   : > { %v1612_v33 = vpop.xlane.xlu0 %1611 }
 0x598   : > { %2049 = vmax.xlane.f32.xlu1 %v5970_v49 }
 0x59a   : > { %v5989_v43 = vpop.xlane.xlu0 %2025 }
 0x59c   : > { %2559 = vmax.xlane.f32.xlu1 %v5974_v6  ;;  %v2053_v6 = vsub.f32 %v5520_v2, %v5941_v24 }
 0x59e   : > { %v5991_v35 = vpop.xlane.xlu0 %1617 }
 0x5a0   : > { %3061 = vmax.xlane.f32.xlu1 %v5978_v57  ;;  %v2069_v57 = vmul.f32 1.442695, %v2053_v6 }
 0x5a2   : > { %v5993_v15 = vpop.xlane.xlu0 %2031 }
 0x5a4   : > { %2613 = vadd.xlane.f32.xlu1 %v5981_v9 }
 0x5a6   : > { %v5999_v18 = vpop.xlane.xlu0 %2541 }
 0x5a8   : > { %1687 = vadd.xlane.f32.xlu1 %v5986_v10 }
 0x5b9   : > { %v1610_v4 = vpop.xlane.xlu1 %1609 }
 0x5ba   : > { %v1640_v38 = vsub.f32 %v5653_v62, %v1610_v4  ;;  %v1641_v62 = vsub.f32 %v5563_v12, %v1612_v33  ;;  %v6004_v4 = vpop.xlane.xlu0 %3043  ;;  %v1642_v12 = vsub.f32 %v5527_v28, %v5959_v61  ;;  %v2566_v28 = vsub.f32 %v5541_v60, %v2538_v16 }
 0x5bc   : > { %v1657_v34 = vmul.f32 1.442695, %v1640_v38 }
 0x5bd   : > { %v2024_v17 = vpop.xlane.xlu1 %2023 }
 0x5be   : > { %4432 = vpow2.f32 %v1657_v34  ;;  %v2054_v53 = vsub.f32 %v5659_v8, %v2024_v17  ;;  %v1659_v17 = vmul.f32 1.442695, %v1641_v62  ;;  %v6010_v2 = vpop.xlane.xlu0 %1621  ;;  %v2585_v62 = vmul.f32 1.442695, %v2566_v28 }
 0x5c0   : > { %v2071_v5 = vmul.f32 1.442695, %v2054_v53 }
 0x5c1   : > { %v2532_v39 = vpop.xlane.xlu1 %2531 }
 0x5c2   : > { %4434 = vpow2.f32 %v2071_v5  ;;  %v2563_v0 = vsub.f32 %v5672_v40, %v2532_v39  ;;  %v2056_v40 = vsub.f32 %v5534_v47, %v5967_v14  ;;  %v1661_v39 = vmul.f32 1.442695, %v1642_v12 }
 0x5c3   : > { %4436 = vpow2.f32 %v3083_v29 }
 0x5c4   : > { %4438 = vpow2.f32 %v2069_v57  ;;  %v2579_v6 = vmul.f32 1.442695, %v2563_v0  ;;  %v2036_v57 = vpop.xlane.xlu0 %2035  ;;  %v2075_v50 = vmul.f32 1.442695, %v2056_v40 }
 0x5c5   : > { %v3034_v38 = vpop.xlane.xlu1 %3033 }
 0x5c6   : > { %v3065_v8 = vsub.f32 %v5686_v30, %v3034_v38  ;;  %v3068_v38 = vsub.f32 %v5554_v19, %v5983_v20  ;;  %v2055_v19 = vsub.f32 %v5570_v3, %v5989_v43 }
 0x5c8   : > { %v6008_v27 = vpop.eup %4432  ;;  %v3081_v34 = vmul.f32 1.442695, %v3065_v8  ;;  %v6035_v0 = vpop.xlane.xlu0 %2545 }
 0x5c9   : > { %v6012_v24 = vpop.xlane.xlu1 %2535  ;;  %1689 = vadd.xlane.f32.xlu0 %v6008_v27 }
 0x5ca   : > { %4440 = vpow2.f32 %v3081_v34  ;;  %v2565_v3 = vsub.f32 %v5698_v44, %v6012_v24 }
 0x5cb   : > { %4442 = vpow2.f32 %v1659_v17  ;;  %v3087_v17 = vmul.f32 1.442695, %v3068_v38 }
 0x5cc   : > { %v6017_v29 = vpop.eup %4434  ;;  %4444 = vpow2.f32 %v2579_v6  ;;  %v6049_v6 = vpop.xlane.xlu0 %3047  ;;  %v2583_v44 = vmul.f32 1.442695, %v2565_v3 }
 0x5cd   : > { %6890 = vst [vmem:[#allocation44_spill] sm:$0xff] %v6017_v29  ;;  %v6021_v30 = vpop.xlane.xlu1 %3037  ;;  %2103 = vadd.xlane.f32.xlu0 %v6017_v29  ;;  %v6024_v33 = vpop.eup %4436  ;;  %4446 = vpow2.f32 %v1661_v39  ;;  %v2073_v39 = vmul.f32 1.442695, %v2055_v19 }
 0x5ce   : > { %6891 = vst [vmem:[#allocation45_spill] sm:$0xff] %v6024_v33  ;;  %v6029_v47 = vpop.eup %4438  ;;  %4448 = vpow2.f32 %v2075_v50  ;;  %v2060_v50 = vsub.f32 %v5624_v7, %v2036_v57  ;;  %v3067_v7 = vsub.f32 %v5714_v45, %v6021_v30 }
 0x5cf   : > { %6892 = vst [vmem:[#allocation46_spill] sm:$0xff] %v6029_v47 }
 0x5d0   : > { %v3085_v45 = vmul.f32 1.442695, %v3067_v7 }
 0x5d1   : > { %v1616_v61 = vpop.xlane.xlu1 %1615  ;;  %3115 = vadd.xlane.f32.xlu0 %v6024_v33 }
 0x5d2   : > { %v1643_v53 = vsub.f32 %v5726_v13, %v1616_v61 }
 0x5d4   : > { %v6031_v14 = vpop.eup %4440  ;;  %v1663_v5 = vmul.f32 1.442695, %v1643_v53 }
 0x5d5   : > { %6893 = vst [vmem:[#allocation47_spill] sm:$0xff] %v6031_v14  ;;  %v2030_v8 = vpop.xlane.xlu1 %2029  ;;  %3113 = vadd.xlane.f32.xlu1 %v6031_v14  ;;  %2101 = vadd.xlane.f32.xlu0 %v6029_v47  ;;  %v6040_v13 = vpop.eup %4442 }
 0x5d6   : > { %4450 = vpow2.f32 %v1663_v5  ;;  %v2057_v60 = vsub.f32 %v5737_v55, %v2030_v8  ;;  %v6042_v16 = vpop.eup %4444  ;;  %v1644_v8 = vsub.f32 %v5581_v51, %v5991_v35  ;;  %v2058_v51 = vsub.f32 %v5589_v59, %v5993_v15 }
 0x5d7   : > { %4452 = vpow2.f32 %v2585_v62  ;;  %v6051_v55 = vpop.eup %4446  ;;  %v2083_v62 = vmul.f32 1.442695, %v2060_v50  ;;  %v2568_v59 = vsub.f32 %v5599_v52, %v5999_v18 }
 0x5d8   : > { %v2077_v34 = vmul.f32 1.442695, %v2057_v60  ;;  %v6058_v61 = vpop.eup %4448 }
 0x5d9   : > { %v2540_v20 = vpop.xlane.xlu1 %2539  ;;  %2611 = vadd.xlane.f32.xlu0 %v6042_v16  ;;  %1691 = vadd.xlane.f32.xlu1 %v6040_v13  ;;  %6894 = vst [vmem:[#allocation48_spill] sm:$0xff] %v6058_v61 }
 0x5da   : > { %4454 = vpow2.f32 %v2077_v34  ;;  %v2567_v12 = vsub.f32 %v5747_v22, %v2540_v20  ;;  %v6060_v22 = vpop.xlane.xlu0 %1625  ;;  %v1665_v20 = vmul.f32 1.442695, %v1644_v8 }
 0x5db   : > { %4456 = vpow2.f32 %v3087_v17 }
 0x5dc   : > { %v2587_v40 = vmul.f32 1.442695, %v2567_v12 }
 0x5dd   : > { %v3042_v28 = vpop.xlane.xlu1 %3041  ;;  %1693 = vadd.xlane.f32.xlu0 %v6051_v55 }
 0x5de   : > { %4458 = vpow2.f32 %v2587_v40  ;;  %v3069_v43 = vsub.f32 %v5761_v42, %v3042_v28  ;;  %v6075_v60 = vpop.xlane.xlu0 %2039  ;;  %v2079_v28 = vmul.f32 1.442695, %v2058_v51 }
 0x5df   : > { %4460 = vpow2.f32 %v2073_v39 }
 0x5e0   : > { %v6062_v53 = vpop.eup %4450  ;;  %v3089_v5 = vmul.f32 1.442695, %v3069_v43 }
 0x5e1   : > { %v1620_v57 = vpop.xlane.xlu1 %1619  ;;  %2107 = vadd.xlane.f32.xlu0 %v6058_v61  ;;  %1695 = vadd.xlane.f32.xlu1 %v6062_v53  ;;  %v6069_v24 = vpop.eup %4452 }
 0x5e2   : > { %4462 = vpow2.f32 %v3089_v5  ;;  %v1645_v42 = vsub.f32 %v5774_v23, %v1620_v57  ;;  %6895 = vst [vmem:[#allocation49_spill] sm:$0xff] %v6069_v24  ;;  %v2589_v5 = vmul.f32 1.442695, %v2568_v59  ;;  %v3072_v59 = vsub.f32 %v5636_v56, %v6049_v6 }
 0x5e3   : > { %4464 = vpow2.f32 %v2083_v62  ;;  %v3070_v62 = vsub.f32 %v5609_v41, %v6004_v4  ;;  %v1646_v41 = vsub.f32 %v5619_v54, %v6010_v2  ;;  %v2570_v54 = vsub.f32 %v5630_v25, %v6035_v0  ;;  %v6903_v0 = vld [vmem:[#allocation27_spill] sm:$0xff] }
 0x5e4   : > { %v6071_v38 = vpop.eup %4454  ;;  %4466 = vpow2.f32 %v2583_v44  ;;  %v1667_v34 = vmul.f32 1.442695, %v1645_v42 }
 0x5e5   : > { %6896 = vst [vmem:[#allocation50_spill] sm:$0xff] %v6071_v38  ;;  %v2034_v30 = vpop.xlane.xlu1 %2033  ;;  %2617 = vadd.xlane.f32.xlu0 %v6069_v24  ;;  %2109 = vadd.xlane.f32.xlu1 %v6071_v38  ;;  %v6080_v17 = vpop.eup %4456  ;;  %4468 = vpow2.f32 %v3085_v45  ;;  %v3091_v8 = vmul.f32 1.442695, %v3070_v62 }
 0x5e6   : > { %v2059_v23 = vsub.f32 %v5788_v31, %v2034_v30  ;;  %6897 = vst [vmem:[#allocation51_spill] sm:$0xff] %v6080_v17  ;;  %4470 = vpow2.f32 %v1667_v34  ;;  %v6091_v31 = vpop.xlane.xlu0 %2549 }
 0x5e7   : > { %4472 = vpow2.f32 %v1665_v20  ;;  %v1669_v20 = vmul.f32 1.442695, %v1646_v41 }
 0x5e8   : > { %v6082_v19 = vpop.eup %4458  ;;  %v2081_v12 = vmul.f32 1.442695, %v2059_v23 }
 0x5e9   : > { %6898 = vst [vmem:[#allocation52_spill] sm:$0xff] %v6082_v19  ;;  %v2544_v35 = vpop.xlane.xlu1 %2543  ;;  %3119 = vadd.xlane.f32.xlu0 %v6080_v17  ;;  %2619 = vadd.xlane.f32.xlu1 %v6082_v19  ;;  %v6089_v39 = vpop.eup %4460 }
 0x5ea   : > { %v2569_v40 = vsub.f32 %v5800_v11, %v2544_v35  ;;  %6899 = vst [vmem:[#allocation53_spill] sm:$0xff] %v6089_v39  ;;  %4474 = vpow2.f32 %v2081_v12  ;;  %v6107_v7 = vpop.xlane.xlu0 %3051 }
 0x5eb   : > { %4476 = vpow2.f32 %v2079_v28  ;;  %v2593_v28 = vmul.f32 1.442695, %v2570_v54  ;;  %v6908_v54 = vld [vmem:[#allocation22_spill] sm:$0xff] }
 0x5ec   : > { %v6093_v50 = vpop.eup %4462  ;;  %v2591_v3 = vmul.f32 1.442695, %v2569_v40 }
 0x5ed   : > { %v6097_v15 = vpop.xlane.xlu1 %3045  ;;  %3121 = vadd.xlane.f32.xlu1 %v6093_v50  ;;  %2105 = vadd.xlane.f32.xlu0 %v6089_v39  ;;  %v6101_v11 = vpop.eup %4464  ;;  %v6924_v39 = vld [vmem:[#allocation6_spill] sm:$0xff] }
 0x5ee   : > { %v6103_v43 = vpop.eup %4466  ;;  %4478 = vpow2.f32 %v2591_v3  ;;  %v6118_v4 = vpop.xlane.xlu0 %1629 }
 0x5ef   : > { %6900 = vst [vmem:[#allocation54_spill] sm:$0xff] %v6103_v43  ;;  %v6112_v57 = vpop.eup %4468  ;;  %4480 = vpow2.f32 %v2589_v5 }
 0x5f0   : > { %6901 = vst [vmem:[#allocation55_spill] sm:$0xff] %v6112_v57  ;;  %v6114_v44 = vpop.eup %4470 }
 0x5f1   : > { %v1624_v52 = vpop.xlane.xlu1 %1623  ;;  %2615 = vadd.xlane.f32.xlu0 %v6103_v43  ;;  %2115 = vadd.xlane.f32.xlu1 %v6101_v11  ;;  %v6123_v30 = vpop.eup %4472 }
 0x5f2   : > { %v1647_v18 = vsub.f32 %v5823_v58, %v1624_v52 }
 0x5f4   : > { %v1671_v42 = vmul.f32 1.442695, %v1647_v18  ;;  %v6125_v34 = vpop.eup %4474 }
 0x5f5   : > { %v2038_v45 = vpop.xlane.xlu1 %2037  ;;  %3117 = vadd.xlane.f32.xlu0 %v6112_v57  ;;  %1699 = vadd.xlane.f32.xlu1 %v6114_v44  ;;  %v6132_v35 = vpop.eup %4476 }
 0x5f6   : > { %4482 = vpow2.f32 %v1671_v42  ;;  %v2061_v58 = vsub.f32 %v5836_v26, %v2038_v45  ;;  %6902 = vst [vmem:[#allocation56_spill] sm:$0xff] %v6132_v35  ;;  %v2044_v26 = vpop.xlane.xlu0 %2043  ;;  %v3095_v42 = vmul.f32 1.442695, %v3072_v59  ;;  %v6907_v45 = vld [vmem:[#allocation35_spill] sm:$0xff] }
 0x5f7   : > { %4484 = vpow2.f32 %v3091_v8  ;;  %v2064_v3 = vsub.f32 %v6903_v0, %v2044_v26  ;;  %v6906_v8 = vld [vmem:[#allocation30_spill] sm:$0xff] }
 0x5f8   : > { %v2085_v23 = vmul.f32 1.442695, %v2061_v58  ;;  %v6134_v12 = vpop.eup %4478  ;;  %v3071_v56 = vsub.f32 %v6906_v8, %v6097_v15 }
 0x5f9   : > { %v2548_v2 = vpop.xlane.xlu1 %2547  ;;  %1697 = vadd.xlane.f32.xlu0 %v6123_v30  ;;  %2113 = vadd.xlane.f32.xlu1 %v6125_v34  ;;  %v6142_v62 = vpop.eup %4480  ;;  %v2091_v41 = vmul.f32 1.442695, %v2064_v3  ;;  %v6910_v3 = vld [vmem:[#allocation23_spill] sm:$0xff] }
 0x5fa   : > { %4486 = vpow2.f32 %v2085_v23  ;;  %v2571_v51 = vsub.f32 %v5849_v32, %v2548_v2  ;;  %v6904_v32 = vld [vmem:[#allocation33_spill] sm:$0xff]  ;;  %6905 = vst [vmem:[#allocation27_spill] sm:$0xff] %v6142_v62  ;;  %v1648_v2 = vsub.f32 %v6908_v54, %v6060_v22 }
 0x5fb   : > { %4488 = vpow2.f32 %v1669_v20 }
 0x5fc   : > { %v2595_v40 = vmul.f32 1.442695, %v2571_v51  ;;  %v3093_v51 = vmul.f32 1.442695, %v3071_v56  ;;  %v1673_v0 = vmul.f32 1.442695, %v1648_v2  ;;  %v2554_v56 = vpop.xlane.xlu0 %2553 }
 0x5fd   : > { %v3050_v25 = vpop.xlane.xlu1 %3049  ;;  %2111 = vadd.xlane.f32.xlu0 %v6132_v35  ;;  %2623 = vadd.xlane.f32.xlu1 %v6134_v12 }
 0x5fe   : > { %4490 = vpow2.f32 %v2595_v40  ;;  %v3073_v5 = vsub.f32 %v6904_v32, %v3050_v25  ;;  %v6909_v40 = vld [vmem:[#allocation37_spill] sm:$0xff]  ;;  %v2062_v32 = vsub.f32 %v6910_v3, %v6075_v60 }
 0x5ff   : > { %4492 = vpow2.f32 %v2593_v28 }
 0x600   : > { %v6144_v52 = vpop.eup %4482  ;;  %v3097_v18 = vmul.f32 1.442695, %v3073_v5 }
 0x601   : > { %v1628_v6 = vpop.xlane.xlu1 %1627  ;;  %2621 = vadd.xlane.f32.xlu0 %v6142_v62  ;;  %1703 = vadd.xlane.f32.xlu1 %v6144_v52  ;;  %v6151_v23 = vpop.eup %4484 }
 0x602   : > { %4494 = vpow2.f32 %v3097_v18  ;;  %v1649_v58 = vsub.f32 %v6907_v45, %v1628_v6  ;;  %v6911_v18 = vld [vmem:[#allocation39_spill] sm:$0xff]  ;;  %v6912_v45 = vld [vmem:[#allocation24_spill] sm:$0xff] }
 0x603   : > { %4496 = vpow2.f32 %v3095_v42  ;;  %v2572_v60 = vsub.f32 %v6912_v45, %v6091_v31 }
 0x604   : > { %v6153_v20 = vpop.eup %4486  ;;  %4498 = vpow2.f32 %v2091_v41  ;;  %v1675_v15 = vmul.f32 1.442695, %v1649_v58  ;;  %v2087_v41 = vmul.f32 1.442695, %v2062_v32 }
 0x605   : > { %v2042_v26 = vpop.xlane.xlu1 %2041  ;;  %3123 = vadd.xlane.f32.xlu0 %v6151_v23  ;;  %2117 = vadd.xlane.f32.xlu1 %v6153_v20  ;;  %v6160_v59 = vpop.eup %4488  ;;  %4500 = vpow2.f32 %v3093_v51 }
 0x606   : > { %v2063_v28 = vsub.f32 %v6909_v40, %v2042_v26  ;;  %4502 = vpow2.f32 %v1675_v15  ;;  %v2597_v26 = vmul.f32 1.442695, %v2572_v60  ;;  %v6913_v15 = vld [vmem:[#allocation25_spill] sm:$0xff] }
 0x607   : > { %4504 = vpow2.f32 %v1673_v0  ;;  %v3074_v40 = vsub.f32 %v6913_v15, %v6107_v7  ;;  %v6914_v7 = vld [vmem:[#allocation26_spill] sm:$0xff]  ;;  %v6915_v15 = vld [vmem:[#allocation28_spill] sm:$0xff] }
 0x608   : > { %v6162_v25 = vpop.eup %4490  ;;  %v2089_v5 = vmul.f32 1.442695, %v2063_v28  ;;  %v3056_v28 = vpop.xlane.xlu0 %3055 }
 0x609   : > { %v2552_v22 = vpop.xlane.xlu1 %2551  ;;  %1701 = vadd.xlane.f32.xlu0 %v6160_v59  ;;  %2627 = vadd.xlane.f32.xlu1 %v6162_v25  ;;  %v6169_v8 = vpop.eup %4492 }
 0x60a   : > { %v2573_v42 = vsub.f32 %v6911_v18, %v2552_v22  ;;  %4506 = vpow2.f32 %v2089_v5  ;;  %v3099_v5 = vmul.f32 1.442695, %v3074_v40  ;;  %v2574_v40 = vsub.f32 %v6915_v15, %v2554_v56 }
 0x60b   : > { %4508 = vpow2.f32 %v2087_v41  ;;  %v1650_v41 = vsub.f32 %v6914_v7, %v6118_v4 }
 0x60c   : > { %v6171_v6 = vpop.eup %4494  ;;  %v2599_v54 = vmul.f32 1.442695, %v2573_v42  ;;  %v1634_v18 = vpop.xlane.xlu0 %1633 }
 0x60d   : > { %v3054_v58 = vpop.xlane.xlu1 %3053  ;;  %3129 = vadd.xlane.f32.xlu1 %v6171_v6  ;;  %2625 = vadd.xlane.f32.xlu0 %v6169_v8  ;;  %v6177_v2 = vpop.eup %4496 }
 0x60e   : > { %v6179_v51 = vpop.eup %4498  ;;  %4510 = vpow2.f32 %v2599_v54 }
 0x60f   : > { %v6186_v3 = vpop.eup %4500  ;;  %4512 = vpow2.f32 %v2597_v26  ;;  %v1677_v26 = vmul.f32 1.442695, %v1650_v41 }
 0x610   : > { %v6188_v32 = vpop.eup %4502  ;;  %v2048_v4 = vpop.xlane.xlu0 %2047 }
 0x611   : > { %v1632_v0 = vpop.xlane.xlu1 %1631  ;;  %3127 = vadd.xlane.f32.xlu0 %v6177_v2  ;;  %2123 = vadd.xlane.f32.xlu1 %v6179_v51 }
 0x612   : > { %v1651_v31 = vsub.f32 %v5926_v36, %v1632_v0  ;;  %v6195_v36 = vpop.eup %4504 }
 0x614   : > { %v1679_v22 = vmul.f32 1.442695, %v1651_v31  ;;  %v6197_v60 = vpop.eup %4506  ;;  %v6213_v41 = vpop.xlane.xlu0 %2557 }
 0x615   : > { %v2046_v42 = vpop.xlane.xlu1 %2045  ;;  %3125 = vadd.xlane.f32.xlu0 %v6186_v3  ;;  %1707 = vadd.xlane.f32.xlu1 %v6188_v32  ;;  %v6202_v0 = vpop.eup %4508 }
 0x616   : > { %4514 = vpow2.f32 %v1679_v22  ;;  %v2065_v45 = vsub.f32 %v5936_v21, %v2046_v42  ;;  %v2601_v21 = vmul.f32 1.442695, %v2574_v40  ;;  %v6916_v22 = vld [vmem:[#allocation29_spill] sm:$0xff] }
 0x617   : > { %4516 = vpow2.f32 %v3099_v5  ;;  %v3076_v5 = vsub.f32 %v6916_v22, %v3056_v28  ;;  %v6918_v28 = vld [vmem:[#allocation31_spill] sm:$0xff] }
 0x618   : > { %v2093_v54 = vmul.f32 1.442695, %v2065_v45  ;;  %v6204_v31 = vpop.eup %4510  ;;  %v3075_v45 = vsub.f32 %v5916_v48, %v3054_v58  ;;  %v1652_v15 = vsub.f32 %v6918_v28, %v1634_v18  ;;  %v6225_v22 = vpop.xlane.xlu0 %3059  ;;  %v6919_v58 = vld [vmem:[#allocation32_spill] sm:$0xff] }
 0x619   : > { %1705 = vadd.xlane.f32.xlu0 %v6195_v36  ;;  %2121 = vadd.xlane.f32.xlu1 %v6197_v60  ;;  %v6209_v42 = vpop.eup %4512  ;;  %v3103_v56 = vmul.f32 1.442695, %v3076_v5  ;;  %v2066_v5 = vsub.f32 %v6919_v58, %v2048_v4 }
 0x61a   : > { %4518 = vpow2.f32 %v2093_v54  ;;  %v3101_v40 = vmul.f32 1.442695, %v3075_v45  ;;  %v1681_v48 = vmul.f32 1.442695, %v1652_v15 }
 0x61b   : > { %4520 = vpow2.f32 %v1677_v26  ;;  %v2095_v18 = vmul.f32 1.442695, %v2066_v5 }
 0x61c   : > { %4522 = vpow2.f32 %v2601_v21  ;;  %v6229_v21 = vpop.xlane.xlu1 %2555  ;;  %v1638_v24 = vpop.xlane.xlu0 %1637 }
 0x61d   : > { %2119 = vadd.xlane.f32.xlu0 %v6202_v0  ;;  %2631 = vadd.xlane.f32.xlu1 %v6204_v31  ;;  %4524 = vpow2.f32 %v3103_v56  ;;  %v6920_v56 = vld [vmem:[#allocation38_spill] sm:$0xff] }
 0x61e   : > { %4526 = vpow2.f32 %v3101_v40  ;;  %v1654_v45 = vsub.f32 %v6920_v56, %v1638_v24  ;;  %v6921_v40 = vld [vmem:[#allocation8_spill] sm:$0xff] }
 0x61f   : > { %4528 = vpow2.f32 %v1681_v48 }
 0x620   : > { %v6211_v7 = vpop.eup %4514  ;;  %v6237_v28 = vpop.xlane.xlu1 %3057  ;;  %4530 = vpow2.f32 %v2095_v18  ;;  %v1685_v15 = vmul.f32 1.442695, %v1654_v45 }
 0x621   : > { %2629 = vadd.xlane.f32.xlu0 %v6209_v42  ;;  %1711 = vadd.xlane.f32.xlu1 %v6211_v7  ;;  %v6218_v54 = vpop.eup %4516  ;;  %v2052_v56 = vpop.xlane.xlu0 %2051 }
 0x622   : > { %4532 = vpow2.f32 %v1685_v15  ;;  %v2068_v15 = vsub.f32 %v5910_v1, %v2052_v56 }
 0x624   : > { %v6220_v26 = vpop.eup %4518  ;;  %v1636_v4 = vpop.xlane.xlu1 %1635  ;;  %v2099_v57 = vmul.f32 1.442695, %v2068_v15 }
 0x625   : > { %6917 = vst [vmem:[#allocation33_spill] sm:$0xff] %v6220_v26  ;;  %3131 = vadd.xlane.f32.xlu0 %v6218_v54  ;;  %2125 = vadd.xlane.f32.xlu1 %v6220_v26  ;;  %v6227_v19 = vpop.eup %4520  ;;  %v1653_v33 = vsub.f32 %v5962_v37, %v1636_v4  ;;  %v2562_v14 = vpop.xlane.xlu0 %2561  ;;  %v6929_v4 = vld [vmem:[#allocation34_spill] sm:$0xff] }
 0x626   : > { %v6233_v62 = vpop.eup %4522  ;;  %4534 = vpow2.f32 %v2099_v57 }
 0x627   : > { %v6239_v43 = vpop.eup %4524  ;;  %v1683_v38 = vmul.f32 1.442695, %v1653_v33 }
 0x628   : > { %v6242_v17 = vpop.eup %4526  ;;  %v2050_v24 = vpop.xlane.xlu1 %2049 }
 0x629   : > { %1709 = vadd.xlane.f32.xlu0 %v6227_v19  ;;  %v6247_v48 = vpop.eup %4528  ;;  %v3064_v61 = vpop.xlane.xlu0 %3063  ;;  %4536 = vpow2.f32 %v1683_v38 }
 0x62a   : > { %v6250_v58 = vpop.eup %4530 }
 0x62b   : > { %6922 = vst [vmem:[#allocation30_spill] sm:$0xff] %v6250_v58 }
 0x62c   : > { %v6253_v5 = vpop.eup %4532  ;;  %v6255_v18 = vpop.xlane.xlu1 %2559 }
 0x62d   : > { %2633 = vadd.xlane.f32.xlu0 %v6233_v62  ;;  %6923 = vst [vmem:[#allocation35_spill] sm:$0xff] %v6253_v5 }
 0x630   : > { %v6258_v45 = vpop.xlane.xlu1 %3061  ;;  %v6264_v29 = vpop.eup %4534 }
 0x631   : > { %3135 = vadd.xlane.f32.xlu0 %v6239_v43  ;;  %6925 = vst [vmem:[#allocation22_spill] sm:$0xff] %v6264_v29 }
 0x633   : > { %v6269_v37 = vpop.eup %4536 }
 0x634   : > { %v2614_v26 = vpop.xlane.xlu1 %2613  ;;  %6927 = vst [vmem:[#allocation23_spill] sm:$0xff] %v6269_v37 }
 0x635   : > { %3133 = vadd.xlane.f32.xlu0 %v6242_v17 }
 0x636   : > { %2695 = vrot.lane.b32.xlu1 %v6921_v40, %s4752_s18 }
 0x639   : > { %1713 = vadd.xlane.f32.xlu0 %v6247_v48 }
 0x63d   : > { %2127 = vadd.xlane.f32.xlu0 %v6250_v58  ;;  %v1688_v58 = vpop.xlane.xlu1 %1687 }
 0x63e   : > { %4538 = vrcp.f32 %v1688_v58 }
 0x641   : > { %1717 = vadd.xlane.f32.xlu0 %v6253_v5 }
 0x648   : > { %v4539_v57 = vpop.eup %4538 }
 0x649   : > { %v1735_v56 = vmul.f32 %v4539_v57, %v5986_v10 }
 0x656   : > { %v1690_v35 = vpop.xlane.xlu0 %1689 }
 0x657   : > { %4540 = vrcp.f32 %v1690_v35  ;;  %3195 = vrot.lane.b32.xlu0 %v6924_v39, %s4754_s20  ;;  %v2576_v35 = vsub.f32 %v6929_v4, %v6213_v41  ;;  %v6931_v41 = vld [vmem:[#allocation36_spill] sm:$0xff] }
 0x658   : > { %4542 = vrcp.f32 %v2614_v26  ;;  %v3078_v4 = vsub.f32 %v6931_v41, %v6225_v22  ;;  %v2067_v26 = vsub.f32 %v5970_v49, %v2050_v24 }
 0x659   : > { %v2605_v5 = vmul.f32 1.442695, %v2576_v35 }
 0x65a   : > { %2131 = vadd.xlane.f32.xlu1 %v6264_v29  ;;  %v6267_v1 = vpop.xlane.xlu0 %2103  ;;  %v3107_v10 = vmul.f32 1.442695, %v3078_v4  ;;  %v6935_v4 = vld [vmem:[#allocation9_spill] sm:$0xff] }
 0x65b   : > { %6926 = vst [vmem:[#allocation37_spill] sm:$0xff] %v6267_v1 }
 0x65e   : > { %1715 = vadd.xlane.f32.xlu1 %v6269_v37  ;;  %v6272_v33 = vpop.xlane.xlu0 %3115 }
 0x65f   : > { %6928 = vst [vmem:[#allocation39_spill] sm:$0xff] %v6272_v33  ;;  %v2578_v33 = vsub.f32 %v5922_v63, %v2562_v14 }
 0x661   : > { %v4541_v38 = vpop.eup %4540  ;;  %v2609_v1 = vmul.f32 1.442695, %v2578_v33 }
 0x662   : > { %v6276_v58 = vpop.xlane.xlu1 %3113  ;;  %v6278_v39 = vpop.xlane.xlu0 %2101  ;;  %v1736_v15 = vmul.f32 %v4541_v38, %v6008_v27 }
 0x663   : > { %6930 = vst [vmem:[#allocation24_spill] sm:$0xff] %v6276_v58  ;;  %v4543_v63 = vpop.eup %4542 }
 0x664   : > { %v1751_v29 = vpack.c.bf16 %v1736_v15, %v1735_v56 }
 0x666   : > { %v1692_v47 = vpop.xlane.xlu1 %1691  ;;  %4082 = vmatprep.mubr.bf16.mxu1 %v1751_v29  ;;  %v2612_v37 = vpop.xlane.xlu0 %2611 }
 0x667   : > { %4544 = vrcp.f32 %v2612_v37  ;;  %v2097_v37 = vmul.f32 1.442695, %v2067_v26  ;;  %v6936_v26 = vld [vmem:[#allocation40_spill] sm:$0xff] }
 0x668   : > { %4546 = vrcp.f32 %v1692_v47 }
 0x669   : > { %4548 = vpow2.f32 %v2605_v5  ;;  %v3080_v5 = vsub.f32 %v5932_v46, %v3064_v61 }
 0x66a   : > { %v1694_v58 = vpop.xlane.xlu0 %1693 }
 0x66b   : > { %4550 = vrcp.f32 %v1694_v58  ;;  %v3111_v46 = vmul.f32 1.442695, %v3080_v5 }
 0x66c   : > { %4552 = vpow2.f32 %v2609_v1  ;;  %v2660_v1 = vmul.f32 %v4543_v63, %v5981_v9  ;;  %v2575_v63 = vsub.f32 %v6936_v26, %v6229_v21  ;;  %v6939_v21 = vld [vmem:[#allocation11_spill] sm:$0xff] }
 0x66d   : > { %4554 = vpow2.f32 %v3107_v10 }
 0x66e   : > { %v1696_v57 = vpop.xlane.xlu1 %1695  ;;  %v6285_v27 = vpop.xlane.xlu0 %2107  ;;  %4556 = vpow2.f32 %v2097_v37  ;;  %v2603_v5 = vmul.f32 1.442695, %v2575_v63  ;;  %v6938_v37 = vld [vmem:[#allocation12_spill] sm:$0xff] }
 0x66f   : > { %3197 = vrot.lane.b32.xlu1 %v6921_v40, %s4754_s20  ;;  %4558 = vpow2.f32 %v3111_v46 }
 0x671   : > { %v4545_v29 = vpop.eup %4544 }
 0x672   : > { %v6290_v47 = vpop.xlane.xlu1 %2109  ;;  %v6292_v14 = vpop.xlane.xlu0 %2617  ;;  %v2659_v33 = vmul.f32 %v4545_v29, %v6042_v16  ;;  %v6933_v16 = vld [vmem:[#allocation43_spill] sm:$0xff] }
 0x673   : > { %v4547_v22 = vpop.eup %4546  ;;  %v3079_v61 = vsub.f32 %v6933_v16, %v6258_v45  ;;  %v6937_v45 = vld [vmem:[#allocation14_spill] sm:$0xff] }
 0x674   : > { %v6297_v38 = vpop.eup %4548  ;;  %v2675_v24 = vpack.c.bf16 %v2660_v1, %v2659_v33  ;;  %v1737_v40 = vmul.f32 %v4547_v22, %v6040_v13 }
 0x675   : > { %6932 = vst [vmem:[#allocation25_spill] sm:$0xff] %v6297_v38  ;;  %v4551_v49 = vpop.eup %4550 }
 0x676   : > { %v1738_v35 = vmul.f32 %v4551_v49, %v6051_v55  ;;  %v6301_v58 = vpop.xlane.xlu1 %2619  ;;  %2637 = vadd.xlane.f32.xlu0 %v6297_v38  ;;  %v6304_v56 = vpop.xlane.xlu0 %3119  ;;  %4146 = vmatprep.mubr.bf16.mxu0 %v2675_v24  ;;  %v3109_v55 = vmul.f32 1.442695, %v3079_v61  ;;  %v6941_v61 = vld [vmem:[#allocation18_spill] sm:$0xff] }
 0x677   : > { %v6308_v15 = vpop.eup %4552 }
 0x678   : > { %v1752_v9 = vpack.c.bf16 %v1738_v35, %v1737_v40  ;;  %6934 = vst [vmem:[#allocation26_spill] sm:$0xff] %v6308_v15  ;;  %v6314_v10 = vpop.eup %4554  ;;  %4560 = vpow2.f32 %v3109_v55  ;;  %v6940_v40 = vld [vmem:[#allocation41_spill] sm:$0xff] }
 0x679   : > { %v6324_v33 = vpop.eup %4556  ;;  %4562 = vpow2.f32 %v2603_v5  ;;  %v3077_v35 = vsub.f32 %v6940_v40, %v6237_v28  ;;  %v6945_v40 = vld [vmem:[#allocation21_spill] sm:$0xff] }
 0x67a   : > { %v3122_v41 = vpop.xlane.xlu1 %3121  ;;  %2641 = vadd.xlane.f32.xlu0 %v6308_v15  ;;  %4083 = vmatmul.mubr.bf16.vlgmr.msra.gmra.mrb[32].mxu1 %v1752_v9  ;;  %v6311_v13 = vpop.xlane.xlu0 %2105 }
 0x67b   : > { %4099 = vmatpush3.bf16.msra.mxu1 %v6935_v4  ;;  %v6331_v24 = vpop.eup %4558  ;;  %v3105_v55 = vmul.f32 1.442695, %v3077_v35  ;;  %v6942_v4 = vld [vmem:[#allocation42_spill] sm:$0xff] }
 0x67c   : > { %4100 = vmatprep.subr.bf16.mxu1 %v6937_v45  ;;  %v2577_v26 = vsub.f32 %v6942_v4, %v6255_v18 }
 0x67e   : > { %v2116_v29 = vpop.xlane.xlu1 %2115  ;;  %3139 = vadd.xlane.f32.xlu0 %v6314_v10  ;;  %v6320_v22 = vpop.xlane.xlu0 %2615 }
 0x67f   : > { %4101 = vmatpush3.bf16.msra.mxu1 %v6937_v45  ;;  %4564 = vrcp.f32 %v2116_v29  ;;  %v2607_v45 = vmul.f32 1.442695, %v2577_v26 }
 0x680   : > { %4102 = vmatprep.subr.bf16.mxu1 %v6938_v37  ;;  %4566 = vrcp.f32 %v1696_v57  ;;  %v6943_v57 = vld [vmem:[#allocation17_spill] sm:$0xff] }
 0x682   : > { %v1700_v1 = vpop.xlane.xlu1 %1699  ;;  %2129 = vadd.xlane.f32.xlu0 %v6324_v33  ;;  %v6327_v49 = vpop.xlane.xlu0 %3117 }
 0x683   : > { %4103 = vmatpush3.bf16.msra.mxu1 %v6938_v37  ;;  %v6338_v9 = vpop.eup %4560 }
 0x684   : > { %4104 = vmatprep.subr.bf16.mxu1 %v6939_v21  ;;  %v6347_v29 = vpop.eup %4562 }
 0x685   : > { %6944 = vst [vmem:[#allocation28_spill] sm:$0xff] %v6347_v29 }
 0x686   : > { %v2114_v46 = vpop.xlane.xlu1 %2113  ;;  %3143 = vadd.xlane.f32.xlu0 %v6331_v24  ;;  %v1698_v16 = vpop.xlane.xlu0 %1697 }
 0x687   : > { %4568 = vrcp.f32 %v2114_v46  ;;  %4105 = vmatpush3.bf16.msra.mxu1 %v6939_v21 }
 0x688   : > { %4570 = vrcp.f32 %v1698_v16  ;;  %4106 = vmatprep.subr.bf16.mxu1 %v6941_v61 }
 0x689   : > { %4572 = vpow2.f32 %v3105_v55  ;;  %v4565_v21 = vpop.eup %4564 }
 0x68a   : > { %v2624_v63 = vpop.xlane.xlu1 %2623  ;;  %3141 = vadd.xlane.f32.xlu0 %v6338_v9  ;;  %v6343_v28 = vpop.xlane.xlu0 %2111  ;;  %4574 = vpow2.f32 %v2607_v45  ;;  %v6357_v4 = vmul.f32 %v4565_v21, %v6101_v11  ;;  %v6946_v45 = vld [vmem:[#allocation20_spill] sm:$0xff] }
 0x68b   : > { %4107 = vmatpush3.bf16.msra.mxu1 %v6941_v61  ;;  %v4567_v18 = vpop.eup %4566  ;;  %4576 = vrcp.f32 %v3122_v41 }
 0x68c   : > { %4108 = vmatprep.subr.bf16.mxu1 %v6943_v57  ;;  %v1739_v26 = vmul.f32 %v4567_v18, %v6062_v53  ;;  %v6947_v53 = vld [vmem:[#allocation10_spill] sm:$0xff] }
 0x68e   : > { %v1704_v5 = vpop.xlane.xlu1 %1703  ;;  %v6349_v37 = vpop.xlane.xlu0 %2621 }
 0x68f   : > { %4109 = vmatpush3.bf16.msra.mxu1 %v6943_v57 }
 0x690   : > { %4110 = vmatprep.subr.bf16.mxu1 %v6945_v40 }
 0x691   : > { %v4569_v35 = vpop.eup %4568 }
 0x692   : > { %v4571_v46 = vpop.eup %4570  ;;  %v2118_v16 = vpop.xlane.xlu1 %2117  ;;  %v6354_v55 = vmul.f32 %v4569_v35, %v6125_v34 }
 0x693   : > { %v3124_v61 = vpop.xlane.xlu0 %3123  ;;  %4111 = vmatpush3.bf16.msra.mxu1 %v6945_v40  ;;  %2635 = vadd.xlane.f32.xlu1 %v6347_v29  ;;  %v1740_v57 = vmul.f32 %v4571_v46, %v6123_v30  ;;  %v6366_v11 = vpop.eup %4572 }
 0x694   : > { %4578 = vrcp.f32 %v3124_v61  ;;  %4112 = vmatprep.subr.bf16.mxu1 %v6946_v45  ;;  %v6371_v18 = vpop.eup %4574 }
 0x695   : > { %v1753_v15 = vpack.c.bf16 %v1740_v57, %v1739_v26  ;;  %4580 = vrcp.f32 %v1700_v1  ;;  %6948 = vst [vmem:[#allocation29_spill] sm:$0xff] %v6371_v18  ;;  %v4577_v40 = vpop.eup %4576 }
 0x696   : > { %v2628_v34 = vpop.xlane.xlu1 %2627 }
 0x697   : > { %v1702_v35 = vpop.xlane.xlu0 %1701  ;;  %4086 = vmatprep.mubr.bf16.mxu1 %v1753_v15  ;;  %4113 = vmatpush3.bf16.msra.mxu1 %v6946_v45  ;;  %v6375_v15 = vmul.f32 %v4577_v40, %v6093_v50 }
 0x698   : > { %4582 = vrcp.f32 %v1702_v35  ;;  %3137 = vadd.xlane.f32.xlu1 %v6366_v11  ;;  %4162 = vmatprep.subr.bf16.mxu1 %v6947_v53 }
 0x699   : > { %4584 = vrcp.f32 %v2624_v63  ;;  %v6949_v63 = vld [vmem:[#allocation7_spill] sm:$0xff] }
 0x69a   : > { %v3130_v30 = vpop.xlane.xlu1 %3129 }
 0x69b   : > { %v2626_v21 = vpop.xlane.xlu0 %2625 }
 0x69c   : > { %4586 = vrcp.f32 %v2626_v21  ;;  %2639 = vadd.xlane.f32.xlu1 %v6371_v18 }
 0x69e   : > { %v4579_v1 = vpop.eup %4578  ;;  %v2124_v46 = vpop.xlane.xlu1 %2123 }
 0x69f   : > { %v3128_v61 = vpop.xlane.xlu0 %3127  ;;  %v6378_v26 = vmul.f32 %v4579_v1, %v6151_v23  ;;  %v4581_v57 = vpop.eup %4580 }
 0x6a0   : > { %3199 = vrot.lane.b32.xlu0 %v6949_v63, %s4754_s20  ;;  %4588 = vrcp.f32 %v3128_v61  ;;  %v1741_v18 = vmul.f32 %v4581_v57, %v6114_v44 }
 0x6a2   : > { %v4583_v35 = vpop.eup %4582  ;;  %v1708_v21 = vpop.xlane.xlu1 %1707 }
 0x6a3   : > { %v3126_v41 = vpop.xlane.xlu0 %3125  ;;  %v1742_v38 = vmul.f32 %v4583_v35, %v6160_v59  ;;  %v4585_v50 = vpop.eup %4584 }
 0x6a4   : > { %4590 = vrcp.f32 %v3126_v41  ;;  %v6387_v45 = vmul.f32 %v4585_v50, %v6134_v12 }
 0x6a5   : > { %4592 = vrcp.f32 %v2124_v46  ;;  %v1754_v23 = vpack.c.bf16 %v1742_v38, %v1741_v18 }
 0x6a6   : > { %v4587_v40 = vpop.eup %4586  ;;  %4594 = vrcp.f32 %v1704_v5  ;;  %v2122_v1 = vpop.xlane.xlu1 %2121 }
 0x6a7   : > { %v1706_v29 = vpop.xlane.xlu0 %1705  ;;  %4596 = vrcp.f32 %v2122_v1  ;;  %4087 = vmatmul.mubr.bf16.gmra.mrb[36].mxu1 %v1754_v23  ;;  %v6390_v61 = vmul.f32 %v4587_v40, %v6169_v8 }
 0x6a8   : > { %4598 = vrcp.f32 %v1706_v29 }
 0x6a9   : > { %v2678_v44 = vpack.c.bf16 %v6390_v61, %v6387_v45  ;;  %4600 = vrcp.f32 %v2118_v16  ;;  %v6982_v61 = vld [vmem:[#allocation29_spill] sm:$0xff] }
 0x6aa   : > { %v2632_v59 = vpop.xlane.xlu1 %2631  ;;  %v4589_v38 = vpop.eup %4588 }
 0x6ab   : > { %v2120_v41 = vpop.xlane.xlu0 %2119  ;;  %v6400_v29 = vmul.f32 %v4589_v38, %v6177_v2 }
 0x6ac   : > { %4602 = vrcp.f32 %v2120_v41 }
 0x6ad   : > { %2697 = vrot.lane.b32.xlu1 %v6949_v63, %s4752_s18  ;;  %4604 = vrcp.f32 %v2628_v34 }
 0x6ae   : > { %v4591_v5 = vpop.eup %4590  ;;  %v1712_v18 = vpop.xlane.xlu1 %1711 }
 0x6af   : > { %v2630_v12 = vpop.xlane.xlu0 %2629  ;;  %v4593_v46 = vpop.eup %4592  ;;  %v6397_v8 = vmul.f32 %v4591_v5, %v6186_v3 }
 0x6b0   : > { %v4595_v57 = vpop.eup %4594  ;;  %4606 = vrcp.f32 %v2630_v12  ;;  %v6410_v3 = vmul.f32 %v4593_v46, %v6179_v51 }
 0x6b1   : > { %v4597_v16 = vpop.eup %4596  ;;  %v3180_v35 = vpack.c.bf16 %v6400_v29, %v6397_v8  ;;  %4608 = vrcp.f32 %v3130_v30  ;;  %v1743_v2 = vmul.f32 %v4595_v57, %v6144_v52 }
 0x6b2   : > { %v4599_v50 = vpop.eup %4598  ;;  %v6404_v63 = vpop.xlane.xlu1 %2125  ;;  %v6407_v23 = vmul.f32 %v4597_v16, %v6197_v60 }
 0x6b3   : > { %v3132_v34 = vpop.xlane.xlu0 %3131  ;;  %v1744_v40 = vmul.f32 %v4599_v50, %v6195_v36  ;;  %v4601_v1 = vpop.eup %4600 }
 0x6b4   : > { %4610 = vrcp.f32 %v3132_v34  ;;  %v2170_v41 = vpack.c.bf16 %v6410_v3, %v6407_v23  ;;  %v6417_v51 = vmul.f32 %v4601_v1, %v6153_v20 }
 0x6b5   : > { %4612 = vrcp.f32 %v1708_v21  ;;  %v1755_v30 = vpack.c.bf16 %v1744_v40, %v1743_v2 }
 0x6b6   : > { %v4603_v38 = vpop.eup %4602  ;;  %v2696_v5 = vpop.permute.xlu1 %2695 }
 0x6b7   : > { %v1710_v12 = vpop.xlane.xlu0 %1709  ;;  %4090 = vmatprep.mubr.bf16.mxu1 %v1755_v30  ;;  %4142 = vmatprep.subr.bf16.mxu0 %v2696_v5  ;;  %v6420_v52 = vmul.f32 %v4603_v38, %v6202_v0  ;;  %v4605_v36 = vpop.eup %4604  ;;  %v6957_v0 = vld [vmem:[#allocation48_spill] sm:$0xff] }
 0x6b8   : > { %4614 = vrcp.f32 %v1710_v12  ;;  %4143 = vmatpush3.bf16.msra.mxu0 %v2696_v5  ;;  %v6425_v57 = vmul.f32 %v4605_v36, %v6162_v25 }
 0x6b9   : > { %4616 = vrcp.f32 %v2632_v59  ;;  %v2169_v60 = vpack.c.bf16 %v6420_v52, %v6417_v51 }
 0x6ba   : > { %v4607_v21 = vpop.eup %4606 }
 0x6bb   : > { %v2634_v46 = vpop.xlane.xlu0 %2633  ;;  %v6428_v16 = vmul.f32 %v4607_v21, %v6209_v42  ;;  %v4609_v20 = vpop.eup %4608 }
 0x6bc   : > { %4618 = vrcp.f32 %v2634_v46  ;;  %v6433_v59 = vmul.f32 %v4609_v20, %v6171_v6 }
 0x6be   : > { %v4611_v50 = vpop.eup %4610 }
 0x6bf   : > { %v3136_v34 = vpop.xlane.xlu0 %3135  ;;  %v4613_v2 = vpop.eup %4612  ;;  %v6436_v40 = vmul.f32 %v4611_v50, %v6218_v54 }
 0x6c0   : > { %4620 = vrcp.f32 %v3136_v34  ;;  %v1745_v30 = vmul.f32 %v4613_v2, %v6188_v32 }
 0x6c1   : > { %v3181_v25 = vpack.c.bf16 %v6436_v40, %v6433_v59 }
 0x6c2   : > { %v4615_v1 = vpop.eup %4614 }
 0x6c3   : > { %v3134_v42 = vpop.xlane.xlu0 %3133  ;;  %v1746_v38 = vmul.f32 %v4615_v1, %v6227_v19  ;;  %v4617_v5 = vpop.eup %4616 }
 0x6c4   : > { %4622 = vrcp.f32 %v3134_v42  ;;  %v6443_v54 = vmul.f32 %v4617_v5, %v6204_v31 }
 0x6c5   : > { %v1756_v12 = vpack.c.bf16 %v1746_v38, %v1745_v30  ;;  %4624 = vrcp.f32 %v1712_v18 }
 0x6c6   : > { %v4619_v36 = vpop.eup %4618 }
 0x6c7   : > { %4091 = vmatmul.mubr.bf16.gmra.mrb[40].mxu1 %v1756_v12  ;;  %v1714_v6 = vpop.xlane.xlu0 %1713  ;;  %v6446_v21 = vmul.f32 %v4619_v36, %v6233_v62  ;;  %v6951_v36 = vld [vmem:[#allocation46_spill] sm:$0xff] }
 0x6c8   : > { %4626 = vrcp.f32 %v1714_v6 }
 0x6c9   : > { %4628 = vrcp.f32 %v6278_v39  ;;  %v6952_v39 = vld [vmem:[#allocation23_spill] sm:$0xff] }
 0x6ca   : > { %v4621_v32 = vpop.eup %4620 }
 0x6cb   : > { %v6454_v50 = vmul.f32 %v4621_v32, %v6239_v43  ;;  %v2128_v42 = vpop.xlane.xlu0 %2127 }
 0x6ce   : > { %v4623_v20 = vpop.eup %4622 }
 0x6cf   : > { %v6451_v19 = vmul.f32 %v4623_v20, %v6242_v17  ;;  %v4625_v18 = vpop.eup %4624  ;;  %v1718_v30 = vpop.xlane.xlu0 %1717  ;;  %v6950_v17 = vld [vmem:[#allocation37_spill] sm:$0xff]  ;;  %v6953_v20 = vld [vmem:[#allocation35_spill] sm:$0xff] }
 0x6d0   : > { %v1747_v62 = vmul.f32 %v4625_v18, %v6211_v7  ;;  %4630 = vrcp.f32 %v1718_v30 }
 0x6d1   : > { %v3182_v31 = vpack.c.bf16 %v6454_v50, %v6451_v19  ;;  %4632 = vrcp.f32 %v6950_v17  ;;  %v6979_v50 = vld [vmem:[#allocation28_spill] sm:$0xff] }
 0x6d2   : > { %v4627_v34 = vpop.eup %4626 }
 0x6d3   : > { %v1748_v2 = vmul.f32 %v4627_v34, %v6247_v48  ;;  %v4629_v7 = vpop.eup %4628  ;;  %v6954_v34 = vld [vmem:[#allocation44_spill] sm:$0xff] }
 0x6d4   : > { %v2149_v6 = vmul.f32 %v4629_v7, %v6951_v36  ;;  %v3196_v36 = vpop.permute.xlu0 %3195 }
 0x6d5   : > { %v1757_v1 = vpack.c.bf16 %v1748_v2, %v1747_v62 }
 0x6d7   : > { %4094 = vmatprep.mubr.bf16.mxu1 %v1757_v1 }
 0x6da   : > { %v4631_v48 = vpop.eup %4630 }
 0x6db   : > { %v4633_v5 = vpop.eup %4632  ;;  %v1750_v18 = vmul.f32 %v4631_v48, %v6953_v20 }
 0x6dc   : > { %v2150_v62 = vmul.f32 %v4633_v5, %v6954_v34  ;;  %v6963_v34 = vld [vmem:[#allocation16_spill] sm:$0xff] }
 0x6de   : > { %v2165_v1 = vpack.c.bf16 %v2150_v62, %v2149_v6  ;;  %v6964_v62 = vld [vmem:[#allocation30_spill] sm:$0xff] }
 0x6e7   : > { %v2132_v38 = vpop.xlane.xlu1 %2131 }
 0x6eb   : > { %v1716_v43 = vpop.xlane.xlu1 %1715 }
 0x6ec   : > { %4634 = vrcp.f32 %v1716_v43  ;;  %v6956_v43 = vld [vmem:[#allocation56_spill] sm:$0xff] }
 0x6ed   : > { %4636 = vrcp.f32 %v6311_v13 }
 0x6ee   : > { %4638 = vrcp.f32 %v6343_v28 }
 0x6ef   : > { %4640 = vrcp.f32 %v6285_v27 }
 0x6f0   : > { %4642 = vrcp.f32 %v6290_v47  ;;  %v6955_v47 = vld [vmem:[#allocation53_spill] sm:$0xff] }
 0x6f1   : > { %4644 = vrcp.f32 %v2128_v42  ;;  %v6962_v42 = vld [vmem:[#allocation24_spill] sm:$0xff] }
 0x6f2   : > { %4646 = vrcp.f32 %v6404_v63 }
 0x6f3   : > { %4648 = vrcp.f32 %v6962_v42 }
 0x6f4   : > { %4650 = vrcp.f32 %v2132_v38 }
 0x6f6   : > { %v4635_v12 = vpop.eup %4634 }
 0x6f7   : > { %v1749_v32 = vmul.f32 %v4635_v12, %v6952_v39  ;;  %v4637_v13 = vpop.eup %4636  ;;  %v6958_v12 = vld [vmem:[#allocation50_spill] sm:$0xff] }
 0x6f8   : > { %v4639_v28 = vpop.eup %4638  ;;  %v2151_v17 = vmul.f32 %v4637_v13, %v6955_v47  ;;  %v6965_v13 = vld [vmem:[#allocation39_spill] sm:$0xff] }
 0x6f9   : > { %v1758_v2 = vpack.c.bf16 %v1750_v18, %v1749_v32  ;;  %v4641_v27 = vpop.eup %4640  ;;  %v2154_v46 = vmul.f32 %v4639_v28, %v6956_v43  ;;  %v6959_v32 = vld [vmem:[#allocation15_spill] sm:$0xff]  ;;  %4652 = vrcp.f32 %v6965_v13  ;;  %v6974_v13 = vld [vmem:[#allocation54_spill] sm:$0xff] }
 0x6fa   : > { %v4643_v30 = vpop.eup %4642  ;;  %v2152_v7 = vmul.f32 %v4641_v27, %v6957_v0  ;;  %v6960_v0 = vld [vmem:[#allocation13_spill] sm:$0xff]  ;;  %v6967_v28 = vld [vmem:[#allocation19_spill] sm:$0xff] }
 0x6fb   : > { %4095 = vmatmul.mubr.bf16.gmra.mrb[44].mxu1 %v1758_v2  ;;  %v2153_v39 = vmul.f32 %v4643_v30, %v6958_v12  ;;  %v4645_v18 = vpop.eup %4644  ;;  %v3198_v30 = vpop.permute.xlu1 %3197  ;;  %v6968_v43 = vld [vmem:[#allocation47_spill] sm:$0xff]  ;;  %v6970_v12 = vld [vmem:[#allocation45_spill] sm:$0xff] }
 0x6fc   : > { %4114 = vmatprep.mubr.bf16.mxu1 %v2165_v1  ;;  %v2166_v48 = vpack.c.bf16 %v2152_v7, %v2151_v17  ;;  %v2162_v2 = vmul.f32 %v4645_v18, %v6964_v62  ;;  %v6972_v18 = vld [vmem:[#allocation51_spill] sm:$0xff] }
 0x6fd   : > { %v2167_v5 = vpack.c.bf16 %v2154_v46, %v2153_v39  ;;  %v6961_v46 = vpack.c.bf16 %v6357_v4, %v6354_v55  ;;  %v6966_v55 = vld [vmem:[#allocation33_spill] sm:$0xff] }
 0x703   : > { %4115 = vmatmul.mubr.bf16.vlgmr.msra.gmra.mrb[48].mxu1 %v2166_v48  ;;  %v6475_v6 = vpop.xlane.xlu0 %2637 }
 0x704   : > { %4163 = vmatpush3.bf16.msra.mxu1 %v6947_v53  ;;  %4118 = vmatprep.mubr.bf16.mxu1 %v2167_v5  ;;  %v4647_v53 = vpop.eup %4646 }
 0x705   : > { %4164 = vmatprep.subr.bf16.mxu1 %v6959_v32  ;;  %v2161_v4 = vmul.f32 %v4647_v53, %v6966_v55  ;;  %v6975_v55 = vld [vmem:[#allocation27_spill] sm:$0xff] }
 0x707   : > { %v6479_v20 = vpop.xlane.xlu0 %2641  ;;  %v2171_v51 = vpack.c.bf16 %v2162_v2, %v2161_v4 }
 0x708   : > { %4165 = vmatpush3.bf16.msra.mxu1 %v6959_v32 }
 0x709   : > { %4166 = vmatprep.subr.bf16.mxu1 %v6960_v0 }
 0x70b   : > { %4119 = vmatmul.mubr.bf16.gmra.mrb[52].mxu1 %v6961_v46  ;;  %v3140_v63 = vpop.xlane.xlu0 %3139 }
 0x70c   : > { %4167 = vmatpush3.bf16.msra.mxu1 %v6960_v0  ;;  %4122 = vmatprep.mubr.bf16.mxu1 %v2169_v60  ;;  %v4649_v60 = vpop.eup %4648 }
 0x70d   : > { %4168 = vmatprep.subr.bf16.mxu1 %v6963_v34  ;;  %v4651_v27 = vpop.eup %4650  ;;  %v3161_v23 = vmul.f32 %v4649_v60, %v6968_v43 }
 0x70e   : > { %v4653_v47 = vpop.eup %4652 }
 0x70f   : > { %v2130_v1 = vpop.xlane.xlu0 %2129  ;;  %v3162_v39 = vmul.f32 %v4653_v47, %v6970_v12 }
 0x710   : > { %4169 = vmatpush3.bf16.msra.mxu1 %v6963_v34  ;;  %4654 = vrcp.f32 %v2130_v1 }
 0x711   : > { %4170 = vmatprep.subr.bf16.mxu1 %v6967_v28  ;;  %4656 = vrcp.f32 %v6327_v49  ;;  %v6969_v49 = vld [vmem:[#allocation22_spill] sm:$0xff]  ;;  %v3177_v5 = vpack.c.bf16 %v3162_v39, %v3161_v23 }
 0x712   : > { %4658 = vrcp.f32 %v6304_v56  ;;  %v2164_v7 = vmul.f32 %v4651_v27, %v6969_v49 }
 0x713   : > { %4123 = vmatmul.mubr.bf16.gmra.mrb[56].mxu1 %v2170_v41  ;;  %v3144_v52 = vpop.xlane.xlu0 %3143  ;;  %4660 = vrcp.f32 %v6320_v22  ;;  %v6973_v22 = vpack.c.bf16 %v6378_v26, %v6375_v15  ;;  %v6977_v15 = vld [vmem:[#allocation52_spill] sm:$0xff] }
 0x714   : > { %4171 = vmatpush3.bf16.msra.mxu1 %v6967_v28  ;;  %4126 = vmatprep.mubr.bf16.mxu1 %v2171_v51  ;;  %4662 = vrcp.f32 %v6349_v37  ;;  %v6976_v28 = vld [vmem:[#allocation49_spill] sm:$0xff] }
 0x715   : > { %4172 = vmatprep.subr.bf16.mxu1 %v3196_v36  ;;  %4664 = vrcp.f32 %v6292_v14 }
 0x716   : > { %4666 = vrcp.f32 %v6301_v58 }
 0x717   : > { %v3142_v38 = vpop.xlane.xlu0 %3141 }
 0x718   : > { %4173 = vmatpush3.bf16.msra.mxu1 %v3196_v36 }
 0x719   : > { %4174 = vmatprep.subr.bf16.mxu1 %v3198_v30 }
 0x71a   : > { %v4655_v17 = vpop.eup %4654 }
 0x71b   : > { %v3200_v3 = vpop.permute.xlu0 %3199  ;;  %v2163_v41 = vmul.f32 %v4655_v17, %v6324_v33  ;;  %v4657_v48 = vpop.eup %4656  ;;  %v6971_v33 = vld [vmem:[#allocation55_spill] sm:$0xff]  ;;  %v6981_v17 = vpack.c.bf16 %v6446_v21, %v6443_v54 }
 0x71c   : > { %4175 = vmatpush3.bf16.msra.mxu1 %v3198_v30  ;;  %v4659_v36 = vpop.eup %4658  ;;  %v3163_v0 = vmul.f32 %v4657_v48, %v6971_v33  ;;  %v6980_v30 = vld [vmem:[#allocation25_spill] sm:$0xff] }
 0x71d   : > { %4176 = vmatprep.subr.bf16.mxu1 %v3200_v3  ;;  %v2172_v56 = vpack.c.bf16 %v2164_v7, %v2163_v41  ;;  %v3164_v46 = vmul.f32 %v4659_v36, %v6972_v18  ;;  %v4661_v37 = vpop.eup %4660 }
 0x71e   : > { %v4663_v62 = vpop.eup %4662  ;;  %v2661_v1 = vmul.f32 %v4661_v37, %v6974_v13 }
 0x71f   : > { %4127 = vmatmul.mubr.bf16.gmra.mrb[60].mxu1 %v2172_v56  ;;  %v3178_v42 = vpack.c.bf16 %v3164_v46, %v3163_v0  ;;  %v4665_v2 = vpop.eup %4664  ;;  %v2664_v4 = vmul.f32 %v4663_v62, %v6975_v55 }
 0x720   : > { %4177 = vmatpush3.bf16.msra.mxu1 %v3200_v3  ;;  %v2636_v32 = vpop.xlane.xlu1 %2635  ;;  %4178 = vmatprep.mubr.bf16.mxu1 %v3177_v5  ;;  %v4667_v14 = vpop.eup %4666 }
 0x721   : > { %v2663_v26 = vmul.f32 %v4667_v14, %v6977_v15 }
 0x723   : > { %v2677_v27 = vpack.c.bf16 %v2664_v4, %v2663_v26 }
 0x725   : > { %v3138_v53 = vpop.xlane.xlu1 %3137 }
 0x726   : > { %4668 = vrcp.f32 %v3138_v53 }
 0x727   : > { %4670 = vrcp.f32 %v3140_v63  ;;  %4179 = vmatmul.mubr.bf16.vlgmr.msra.gmra.mrb[64].mxu1 %v3178_v42  ;;  %v2662_v63 = vmul.f32 %v4665_v2, %v6976_v28 }
 0x728   : > { %4182 = vmatprep.mubr.bf16.mxu1 %v6973_v22  ;;  %4672 = vrcp.f32 %v3142_v38 }
 0x729   : > { %v2640_v34 = vpop.xlane.xlu1 %2639  ;;  %4674 = vrcp.f32 %v3144_v52  ;;  %v2676_v60 = vpack.c.bf16 %v2662_v63, %v2661_v1 }
 0x72a   : > { %4676 = vrcp.f32 %v2636_v32 }
 0x72b   : > { %4678 = vrcp.f32 %v6475_v6 }
 0x72c   : > { %4680 = vrcp.f32 %v2640_v34 }
 0x72d   : > { %v2698_v58 = vpop.permute.xlu1 %2697  ;;  %4682 = vrcp.f32 %v6479_v20 }
 0x72e   : > { %4144 = vmatprep.subr.bf16.mxu0 %v2698_v58 }
 0x72f   : > { %4145 = vmatpush3.bf16.msra.mxu0 %v2698_v58  ;;  %4183 = vmatmul.mubr.bf16.gmra.mrb[68].mxu1 %v3180_v35 }
 0x730   : > { %v4669_v51 = vpop.eup %4668  ;;  %4186 = vmatprep.mubr.bf16.mxu1 %v3181_v25 }
 0x731   : > { %v4671_v38 = vpop.eup %4670  ;;  %v3173_v52 = vmul.f32 %v4669_v51, %v6366_v11 }
 0x732   : > { %4147 = vmatmul.mubr.bf16.vlgmr.msra.gmra.mrb[36].mxu0 %v2676_v60  ;;  %v3174_v8 = vmul.f32 %v4671_v38, %v6314_v10  ;;  %v4673_v29 = vpop.eup %4672  ;;  %v6978_v10 = vpack.c.bf16 %v6428_v16, %v6425_v57  ;;  %v6983_v57 = vld [vmem:[#allocation26_spill] sm:$0xff] }
 0x733   : > { %4150 = vmatprep.mubr.bf16.mxu0 %v2677_v27  ;;  %v4675_v59 = vpop.eup %4674  ;;  %v3175_v40 = vmul.f32 %v4673_v29, %v6338_v9 }
 0x734   : > { %v3183_v35 = vpack.c.bf16 %v3174_v8, %v3173_v52  ;;  %v4677_v25 = vpop.eup %4676  ;;  %v3176_v11 = vmul.f32 %v4675_v59, %v6331_v24 }
 0x735   : > { %v4679_v6 = vpop.eup %4678 }
 0x736   : > { %v3184_v19 = vpack.c.bf16 %v3176_v11, %v3175_v40  ;;  %v2672_v20 = vmul.f32 %v4679_v6, %v6980_v30  ;;  %v4681_v47 = vpop.eup %4680 }
 0x737   : > { %4187 = vmatmul.mubr.bf16.gmra.mrb[72].mxu1 %v3182_v31  ;;  %v2671_v31 = vmul.f32 %v4677_v25, %v6979_v50  ;;  %v4683_v45 = vpop.eup %4682 }
 0x738   : > { %4190 = vmatprep.mubr.bf16.mxu1 %v3183_v35  ;;  %v2674_v16 = vmul.f32 %v4683_v45, %v6983_v57 }
 0x739   : > { %v2681_v9 = vpack.c.bf16 %v2672_v20, %v2671_v31 }
 0x73a   : > { %4151 = vmatmul.mubr.bf16.gmra.mrb[40].mxu0 %v2678_v44  ;;  %v2673_v44 = vmul.f32 %v4681_v47, %v6982_v61 }
 0x73b   : > { %4154 = vmatprep.mubr.bf16.mxu0 %v6978_v10 }
 0x73c   : > { %v2682_v24 = vpack.c.bf16 %v2674_v16, %v2673_v44 }
 0x73f   : > { %4191 = vmatmul.mubr.bf16.gmra.mrb[76].mxu1 %v3184_v19 }
 0x742   : > { %4155 = vmatmul.mubr.bf16.gmra.mrb[44].mxu0 %v6981_v17 }
 0x743   : > { %4158 = vmatprep.mubr.bf16.mxu0 %v2681_v9 }
 0x74a   : > { %4159 = vmatmul.mubr.bf16.gmra.mrb[48].mxu0 %v2682_v24 }
 0x74d   : > { %v4084_v43 = vpop.f32.mrb[32].mxu1 }
 0x74e   : > { %1859 = vst.msk [vmem:[#allocation2 + $0x10] sm:$0xff] %vm1856_vm5, %v4084_v43  ;;  %v1793_v23 = vpop.f32.mrb[33].mxu1 }
 0x74f   : > { %1857 = vst.msk [vmem:[#allocation2] sm:$0xff] %vm1856_vm5, %v1793_v23  ;;  %v4085_v3 = vpop.f32.mrb[34].mxu1 }
 0x750   : > { %1860 = vst.msk [vmem:[#allocation2 + $0x18] sm:$0xff] %vm1856_vm5, %v4085_v3  ;;  %v1796_v54 = vpop.f32.mrb[35].mxu1 }
 0x751   : > { %1858 = vst.msk [vmem:[#allocation2 + $0x8] sm:$0xff] %vm1856_vm5, %v1796_v54 }
 0x77a   : > { %v4088_v21 = vpop.f32.mrb[36].mxu1 }
 0x77b   : > { %1863 = vst.msk [vmem:[#allocation2 + $0x30] sm:$0xff] %vm1856_vm5, %v4088_v21  ;;  %v1809_v41 = vpop.f32.mrb[37].mxu1 }
 0x77c   : > { %1861 = vst.msk [vmem:[#allocation2 + $0x20] sm:$0xff] %vm1856_vm5, %v1809_v41  ;;  %v4089_v49 = vpop.f32.mrb[38].mxu1 }
 0x77d   : > { %1864 = vst.msk [vmem:[#allocation2 + $0x38] sm:$0xff] %vm1856_vm5, %v4089_v49  ;;  %v1812_v7 = vpop.f32.mrb[39].mxu1 }
 0x77e   : > { %1862 = vst.msk [vmem:[#allocation2 + $0x28] sm:$0xff] %vm1856_vm5, %v1812_v7 }
 0x79a   : > { %v4092_v12 = vpop.f32.mrb[40].mxu1 }
 0x79b   : > { %1867 = vst.msk [vmem:[#allocation2 + $0x50] sm:$0xff] %vm1856_vm5, %v4092_v12  ;;  %v1825_v39 = vpop.f32.mrb[41].mxu1 }
 0x79c   : > { %1865 = vst.msk [vmem:[#allocation2 + $0x40] sm:$0xff] %vm1856_vm5, %v1825_v39  ;;  %v4093_v56 = vpop.f32.mrb[42].mxu1 }
 0x79d   : > { %1868 = vst.msk [vmem:[#allocation2 + $0x58] sm:$0xff] %vm1856_vm5, %v4093_v56  ;;  %v1828_v48 = vpop.f32.mrb[43].mxu1 }
 0x79e   : > { %1866 = vst.msk [vmem:[#allocation2 + $0x48] sm:$0xff] %vm1856_vm5, %v1828_v48 }
 0x7ce   : > { %v4096_v5 = vpop.f32.mrb[44].mxu1 }
 0x7cf   : > { %1871 = vst.msk [vmem:[#allocation2 + $0x70] sm:$0xff] %vm1856_vm5, %v4096_v5  ;;  %v1841_v36 = vpop.f32.mrb[45].mxu1 }
 0x7d0   : > { %1869 = vst.msk [vmem:[#allocation2 + $0x60] sm:$0xff] %vm1856_vm5, %v1841_v36  ;;  %v4097_v32 = vpop.f32.mrb[46].mxu1 }
 0x7d1   : > { %1872 = vst.msk [vmem:[#allocation2 + $0x78] sm:$0xff] %vm1856_vm5, %v4097_v32  ;;  %v1844_v33 = vpop.f32.mrb[47].mxu1 }
 0x7d2   : > { %1870 = vst.msk [vmem:[#allocation2 + $0x68] sm:$0xff] %vm1856_vm5, %v1844_v33 }
 0x7d6   : > { %v4116_v0 = vpop.f32.mrb[48].mxu1 }
 0x7d7   : > { %v6564_v18 = vpop.f32.mrb[49].mxu1 }
 0x7d8   : > { %v4117_v46 = vpop.f32.mrb[50].mxu1 }
 0x7d9   : > { %v6566_v53 = vpop.f32.mrb[51].mxu1 }
 0x7de   : > { %v4120_v42 = vpop.f32.mrb[52].mxu1 }
 0x7df   : > { %v2255_v22 = vpop.f32.mrb[53].mxu1 }
 0x7e0   : > { %v4121_v37 = vpop.f32.mrb[54].mxu1 }
 0x7e1   : > { %v6568_v34 = vpop.f32.mrb[55].mxu1 }
 0x7e6   : > { %v6570_v62 = vpop.f32.mrb[56].mxu1 }
 0x7e7   : > { %v6572_v2 = vpop.f32.mrb[57].mxu1 }
 0x7e8   : > { %v6574_v14 = vpop.f32.mrb[58].mxu1 }
 0x7e9   : > { %v6576_v13 = vpop.f32.mrb[59].mxu1 }
 0x7f2   : > { %v6578_v1 = vpop.f32.mrb[60].mxu1 }
 0x7f3   : > { %v6580_v58 = vpop.f32.mrb[61].mxu1 }
 0x7f4   : > { %v6582_v55 = vpop.f32.mrb[62].mxu1 }
 0x7f5   : > { %v6584_v4 = vpop.f32.mrb[63].mxu1 }
 0x7fa   : > { %v4180_v28 = vpop.f32.mrb[64].mxu1 }
 0x7fb   : > { %v3243_v63 = vpop.f32.mrb[65].mxu1 }
 0x7fc   : > { %v4181_v15 = vpop.f32.mrb[66].mxu1 }
 0x7fd   : > { %v6586_v26 = vpop.f32.mrb[67].mxu1 }
 0x802   : > { %v6588_v51 = vpop.f32.mrb[68].mxu1 }
 0x803   : > { %v3259_v60 = vpop.f32.mrb[69].mxu1 }
 0x804   : > { %v6590_v38 = vpop.f32.mrb[70].mxu1 }
 0x805   : > { %v4148_v27 = vpop.f32.mrb[36].mxu0  ;;  %v3262_v52 = vpop.f32.mrb[71].mxu1 }
 0x806   : > { %2824 = vrot.lane.b32.xlu0 %v4148_v27, %s4752_s18  ;;  %v2741_v8 = vpop.f32.mrb[37].mxu0 }
 0x807   : > { %v4149_v29 = vpop.f32.mrb[38].mxu0 }
 0x808   : > { %v2744_v35 = vpop.f32.mrb[39].mxu0 }
 0x809   : > { %2822 = vrot.lane.b32.xlu1 %v2744_v35, %s4752_s18 }
 0x80a   : > { %2820 = vrot.lane.b32.xlu0 %v2741_v8, %s4752_s18  ;;  %v4188_v59 = vpop.f32.mrb[72].mxu1 }
 0x80b   : > { %v3275_v40 = vpop.f32.mrb[73].mxu1 }
 0x80c   : > { %v4189_v25 = vpop.f32.mrb[74].mxu1 }
 0x80d   : > { %v4152_v10 = vpop.f32.mrb[40].mxu0  ;;  %v3278_v11 = vpop.f32.mrb[75].mxu1 }
 0x80e   : > { %2826 = vrot.lane.b32.xlu0 %v4149_v29, %s4752_s18  ;;  %v2757_v6 = vpop.f32.mrb[41].mxu0 }
 0x80f   : > { %v4153_v19 = vpop.f32.mrb[42].mxu0 }
 0x810   : > { %v2760_v50 = vpop.f32.mrb[43].mxu0 }
 0x812   : > { %2832 = vrot.lane.b32.xlu0 %v4152_v10, %s4752_s18  ;;  %v4192_v31 = vpop.f32.mrb[76].mxu1 }
 0x813   : > { %v3291_v30 = vpop.f32.mrb[77].mxu1 }
 0x814   : > { %v4193_v20 = vpop.f32.mrb[78].mxu1 }
 0x815   : > { %v4156_v47 = vpop.f32.mrb[44].mxu0  ;;  %v3294_v9 = vpop.f32.mrb[79].mxu1 }
 0x816   : > { %2828 = vrot.lane.b32.xlu0 %v2757_v6, %s4752_s18  ;;  %2840 = vrot.lane.b32.xlu1 %v4156_v47, %s4752_s18  ;;  %v2773_v17 = vpop.f32.mrb[45].mxu0 }
 0x817   : > { %v4157_v45 = vpop.f32.mrb[46].mxu0 }
 0x818   : > { %v2776_v61 = vpop.f32.mrb[47].mxu0 }
 0x81a   : > { %2834 = vrot.lane.b32.xlu0 %v4153_v19, %s4752_s18  ;;  %2842 = vrot.lane.b32.xlu1 %v4157_v45, %s4752_s18 }
 0x81d   : > { %v4160_v44 = vpop.f32.mrb[48].mxu0 }
 0x81e   : > { %2830 = vrot.lane.b32.xlu0 %v2760_v50, %s4752_s18  ;;  %2838 = vrot.lane.b32.xlu1 %v2776_v61, %s4752_s18  ;;  %v2789_v57 = vpop.f32.mrb[49].mxu0 }
 0x81f   : > { %v4161_v16 = vpop.f32.mrb[50].mxu0 }
 0x820   : > { %v2792_v24 = vpop.f32.mrb[51].mxu0 }
 0x822   : > { %2836 = vrot.lane.b32.xlu0 %v2773_v17, %s4752_s18  ;;  %2848 = vrot.lane.b32.xlu1 %v4160_v44, %s4752_s18 }
 0x826   : > { %2322 = vrot.lane.b32.xlu0 %v4116_v0, %s4754_s20  ;;  %2844 = vrot.lane.b32.xlu1 %v2789_v57, %s4752_s18 }
 0x82a   : > { %2324 = vrot.lane.b32.xlu0 %v4117_v46, %s4754_s20  ;;  %2850 = vrot.lane.b32.xlu1 %v4161_v16, %s4752_s18 }
 0x82e   : > { %2330 = vrot.lane.b32.xlu0 %v4120_v42, %s4754_s20  ;;  %2846 = vrot.lane.b32.xlu1 %v2792_v24, %s4752_s18  ;;  %s296_s18 = sand.u32 1, %s4738_s28  }
 0x82f   : > { %s6737_s9 = scalar_lea.sflag [#allocation4], %s296_s18 }
 0x832   : > { %2326 = vrot.lane.b32.xlu0 %v2255_v22, %s4754_s20  ;;  %2318 = vrot.lane.b32.xlu1 %v6564_v18, %s4754_s20 }
 0x836   : > { %2332 = vrot.lane.b32.xlu0 %v4121_v37, %s4754_s20  ;;  %2320 = vrot.lane.b32.xlu1 %v6566_v53, %s4754_s20 }
 0x83a   : > { %2328 = vrot.lane.b32.xlu0 %v6568_v34, %s4754_s20  ;;  %2338 = vrot.lane.b32.xlu1 %v6570_v62, %s4754_s20 }
 0x83e   : > { %2334 = vrot.lane.b32.xlu1 %v6572_v2, %s4754_s20  ;;  %3326 = vrot.lane.b32.xlu0 %v4180_v28, %s4753_s19 }
 0x842   : > { %2340 = vrot.lane.b32.xlu1 %v6574_v14, %s4754_s20  ;;  %3322 = vrot.lane.b32.xlu0 %v3243_v63, %s4753_s19 }
 0x846   : > { %2336 = vrot.lane.b32.xlu1 %v6576_v13, %s4754_s20  ;;  %3328 = vrot.lane.b32.xlu0 %v4181_v15, %s4753_s19 }
 0x84a   : > { %2346 = vrot.lane.b32.xlu1 %v6578_v1, %s4754_s20  ;;  %3330 = vrot.lane.b32.xlu0 %v3259_v60, %s4753_s19 }
 0x84e   : > { %2342 = vrot.lane.b32.xlu1 %v6580_v58, %s4754_s20  ;;  %3332 = vrot.lane.b32.xlu0 %v3262_v52, %s4753_s19 }
 0x852   : > { %2348 = vrot.lane.b32.xlu1 %v6582_v55, %s4754_s20  ;;  %3338 = vrot.lane.b32.xlu0 %v3275_v40, %s4753_s19 }
 0x856   : > { %2344 = vrot.lane.b32.xlu1 %v6584_v4, %s4754_s20  ;;  %3334 = vrot.lane.b32.xlu0 %v6588_v51, %s4753_s19 }
 0x85a   : > { %3324 = vrot.lane.b32.xlu1 %v6586_v26, %s4753_s19  ;;  %3336 = vrot.lane.b32.xlu0 %v6590_v38, %s4753_s19 }
 0x85e   : > { %3342 = vrot.lane.b32.xlu1 %v4188_v59, %s4753_s19 }
 0x862   : > { %3344 = vrot.lane.b32.xlu1 %v4189_v25, %s4753_s19 }
 0x866   : > { %3340 = vrot.lane.b32.xlu1 %v3278_v11, %s4753_s19 }
 0x86a   : > { %3350 = vrot.lane.b32.xlu1 %v4192_v31, %s4753_s19 }
 0x86e   : > { %3346 = vrot.lane.b32.xlu1 %v3291_v30, %s4753_s19 }
 0x872   : > { %3348 = vrot.lane.b32.xlu1 %v3294_v9, %s4753_s19 }
 0x876   : > { %3352 = vrot.lane.b32.xlu1 %v4193_v20, %s4753_s19  ;;  %s3636_s19 = sshll.u32 %s296_s18, 4 }
 0x877   : > { %s6715_s20 = scalar_lea.vmem [#allocation3], %s3636_s19 }
 0x878   : > { %v2825_v43 = vpop.permute.xlu0 %2824  ;;  %s3570_s26 = sshll.u32 %s6715_s20, 4  ;;  %s6730_s26 = int_to_ptr.vmem [resolvable:$true] %s3570_s26 }
 0x879   : > { %s4684_s17 = scalar_lea.vmem %s6730_s26, 256  ;;  %p4691_p0 = scmp.lt.s32.totalorder %s6730_s26, %s4689_s22 }
 0x87a   : > { %p4685_p11 = scmp.ne.s32.totalorder %s6730_s26, %s4684_s17  ;;  %p4692_p1 = scmp.lt.s32.totalorder %s4690_s23, %s4684_s17 }
 0x87b   : > { %v2823_v54 = vpop.permute.xlu1 %2822 }
 0x87c   : > { %v2821_v23 = vpop.permute.xlu0 %2820  ;;  %p4686_p12 = pnand %p4685_p11, %p4844_p5  ;;  %p4693_p2 = por %p4692_p1, %p4691_p0 }
 0x87e   : > { %p4687_p13 = pneg %p4686_p12 }
 0x880   : > { %v2827_v3 = vpop.permute.xlu0 %2826  ;;  %p4694_p3 = pnand %p4693_p2, %p4687_p13 }
 0x884   : > { %v2833_v21 = vpop.permute.xlu0 %2832 }
 0x888   : > { %v2841_v41 = vpop.permute.xlu1 %2840  ;;  %v2829_v49 = vpop.permute.xlu0 %2828 }
 0x88c   : > { %v2843_v7 = vpop.permute.xlu1 %2842  ;;  %v2835_v12 = vpop.permute.xlu0 %2834 }
 0x890   : > { %v2839_v39 = vpop.permute.xlu1 %2838  ;;  %v2831_v56 = vpop.permute.xlu0 %2830 }
 0x894   : > { %v2849_v48 = vpop.permute.xlu1 %2848  ;;  %v2837_v5 = vpop.permute.xlu0 %2836 }
 0x898   : > { %v2845_v36 = vpop.permute.xlu1 %2844  ;;  %v2323_v32 = vpop.permute.xlu0 %2322 }
 0x899   : > { %2369 = vst.msk [vmem:[#allocation2 + $0x10] sm:$0xff] %vm2366_vm7, %v2323_v32 }
 0x89a   : > { %2871 = vst.msk [vmem:[#allocation2 + $0x10] sm:$0xff] %vm2868_vm6, %v2825_v43 }
 0x89c   : > { %v2851_v33 = vpop.permute.xlu1 %2850  ;;  %v2325_v0 = vpop.permute.xlu0 %2324 }
 0x89d   : > { %2370 = vst.msk [vmem:[#allocation2 + $0x18] sm:$0xff] %vm2366_vm7, %v2325_v0 }
 0x89e   : > { %2872 = vst.msk [vmem:[#allocation2 + $0x18] sm:$0xff] %vm2868_vm6, %v2827_v3 }
 0x8a0   : > { %v6658_v18 = vpop.permute.xlu1 %2846  ;;  %v2331_v46 = vpop.permute.xlu0 %2330 }
 0x8a1   : > { %2373 = vst.msk [vmem:[#allocation2 + $0x30] sm:$0xff] %vm2366_vm7, %v2331_v46 }
 0x8a2   : > { %2875 = vst.msk [vmem:[#allocation2 + $0x30] sm:$0xff] %vm2868_vm6, %v2833_v21 }
 0x8a4   : > { %v2319_v53 = vpop.permute.xlu1 %2318  ;;  %v2327_v42 = vpop.permute.xlu0 %2326 }
 0x8a5   : > { %2367 = vst.msk [vmem:[#allocation2] sm:$0xff] %vm2366_vm7, %v2319_v53  ;;  %2371 = vst.msk [vmem:[#allocation2 + $0x20] sm:$0xff] %vm2366_vm7, %v2327_v42 }
 0x8a6   : > { %2869 = vst.msk [vmem:[#allocation2] sm:$0xff] %vm2868_vm6, %v2821_v23  ;;  %2873 = vst.msk [vmem:[#allocation2 + $0x20] sm:$0xff] %vm2868_vm6, %v2829_v49 }
 0x8a8   : > { %v2321_v22 = vpop.permute.xlu1 %2320  ;;  %v2333_v37 = vpop.permute.xlu0 %2332 }
 0x8a9   : > { %2368 = vst.msk [vmem:[#allocation2 + $0x8] sm:$0xff] %vm2366_vm7, %v2321_v22  ;;  %2374 = vst.msk [vmem:[#allocation2 + $0x38] sm:$0xff] %vm2366_vm7, %v2333_v37 }
 0x8aa   : > { %2870 = vst.msk [vmem:[#allocation2 + $0x8] sm:$0xff] %vm2868_vm6, %v2823_v54  ;;  %2876 = vst.msk [vmem:[#allocation2 + $0x38] sm:$0xff] %vm2868_vm6, %v2835_v12 }
 0x8ac   : > { %v2339_v34 = vpop.permute.xlu1 %2338  ;;  %v2329_v62 = vpop.permute.xlu0 %2328 }
 0x8ad   : > { %2377 = vst.msk [vmem:[#allocation2 + $0x50] sm:$0xff] %vm2366_vm7, %v2339_v34  ;;  %2372 = vst.msk [vmem:[#allocation2 + $0x28] sm:$0xff] %vm2366_vm7, %v2329_v62 }
 0x8ae   : > { %2874 = vst.msk [vmem:[#allocation2 + $0x28] sm:$0xff] %vm2868_vm6, %v2831_v56  ;;  %2879 = vst.msk [vmem:[#allocation2 + $0x50] sm:$0xff] %vm2868_vm6, %v2841_v41 }
 0x8b0   : > { %v2335_v2 = vpop.permute.xlu1 %2334  ;;  %v3327_v14 = vpop.permute.xlu0 %3326 }
 0x8b1   : > { %2375 = vst.msk [vmem:[#allocation2 + $0x40] sm:$0xff] %vm2366_vm7, %v2335_v2 }
 0x8b2   : > { %3373 = vst.msk [vmem:[#allocation2 + $0x10] sm:$0xff] %vm3370_vm8, %v3327_v14 }
 0x8b3   : > { %2877 = vst.msk [vmem:[#allocation2 + $0x40] sm:$0xff] %vm2868_vm6, %v2837_v5 }
 0x8b4   : > { %v2341_v13 = vpop.permute.xlu1 %2340  ;;  %v3323_v1 = vpop.permute.xlu0 %3322 }
 0x8b5   : > { %2378 = vst.msk [vmem:[#allocation2 + $0x58] sm:$0xff] %vm2366_vm7, %v2341_v13 }
 0x8b6   : > { %3371 = vst.msk [vmem:[#allocation2] sm:$0xff] %vm3370_vm8, %v3323_v1 }
 0x8b7   : > { %2880 = vst.msk [vmem:[#allocation2 + $0x58] sm:$0xff] %vm2868_vm6, %v2843_v7 }
 0x8b8   : > { %v2337_v58 = vpop.permute.xlu1 %2336  ;;  %v3329_v55 = vpop.permute.xlu0 %3328 }
 0x8b9   : > { %2376 = vst.msk [vmem:[#allocation2 + $0x48] sm:$0xff] %vm2366_vm7, %v2337_v58  ;;  %v3389_v38 = vld [vmem:[#allocation2 + $0x10] sm:$0xff] }
 0x8ba   : > { %3374 = vst.msk [vmem:[#allocation2 + $0x18] sm:$0xff] %vm3370_vm8, %v3329_v55  ;;  %v3405_v59 = vmax.f32 %v3389_v38, 0.0 }
 0x8bb   : > { %2878 = vst.msk [vmem:[#allocation2 + $0x48] sm:$0xff] %vm2868_vm6, %v2839_v39 }
 0x8bc   : > { %v2347_v4 = vpop.permute.xlu1 %2346  ;;  %v3331_v28 = vpop.permute.xlu0 %3330  ;;  %v3431_v31 = vrot.slane %v3405_v59, 4 }
 0x8bd   : > { %2381 = vst.msk [vmem:[#allocation2 + $0x70] sm:$0xff] %vm2366_vm7, %v2347_v4  ;;  %v3387_v60 = vld [vmem:[#allocation2] sm:$0xff] }
 0x8be   : > { %3375 = vst.msk [vmem:[#allocation2 + $0x20] sm:$0xff] %vm3370_vm8, %v3331_v28  ;;  %v3403_v35 = vmax.f32 %v3387_v60, 0.0  ;;  %v3432_v44 = vmax.f32 %v3405_v59, %v3431_v31 }
 0x8bf   : > { %2883 = vst.msk [vmem:[#allocation2 + $0x70] sm:$0xff] %vm2868_vm6, %v2849_v48 }
 0x8c0   : > { %v2343_v63 = vpop.permute.xlu1 %2342  ;;  %v3333_v15 = vpop.permute.xlu0 %3332  ;;  %v3419_v19 = vrot.slane %v3403_v35, 4  ;;  %v3433_v12 = vrot.slane %v3432_v44, 2 }
 0x8c1   : > { %2379 = vst.msk [vmem:[#allocation2 + $0x60] sm:$0xff] %vm2366_vm7, %v2343_v63  ;;  %v3390_v8 = vld [vmem:[#allocation2 + $0x18] sm:$0xff] }
 0x8c2   : > { %3376 = vst.msk [vmem:[#allocation2 + $0x28] sm:$0xff] %vm3370_vm8, %v3333_v15  ;;  %v3406_v25 = vmax.f32 %v3390_v8, 0.0  ;;  %v3420_v45 = vmax.f32 %v3403_v35, %v3419_v19  ;;  %v3434_v22 = vmax.f32 %v3432_v44, %v3433_v12 }
 0x8c3   : > { %2881 = vst.msk [vmem:[#allocation2 + $0x60] sm:$0xff] %vm2868_vm6, %v2845_v36 }
 0x8c4   : > { %v2349_v26 = vpop.permute.xlu1 %2348  ;;  %v3339_v51 = vpop.permute.xlu0 %3338  ;;  %v3437_v30 = vrot.slane %v3406_v25, 4  ;;  %v3421_v49 = vrot.slane %v3420_v45, 2 }
 0x8c5   : > { %2382 = vst.msk [vmem:[#allocation2 + $0x78] sm:$0xff] %vm2366_vm7, %v2349_v26  ;;  %v3391_v29 = vld [vmem:[#allocation2 + $0x20] sm:$0xff]  ;;  %v3435_v26 = vrot.slane %v3434_v22, 1 }
 0x8c6   : > { %3379 = vst.msk [vmem:[#allocation2 + $0x40] sm:$0xff] %vm3370_vm8, %v3339_v51  ;;  %v3407_v10 = vmax.f32 %v3391_v29, 0.0  ;;  %v3438_v57 = vmax.f32 %v3406_v25, %v3437_v30 }
 0x8c7   : > { %2884 = vst.msk [vmem:[#allocation2 + $0x78] sm:$0xff] %vm2868_vm6, %v2851_v33 }
 0x8c8   : > { %v2345_v27 = vpop.permute.xlu1 %2344  ;;  %v3335_v52 = vpop.permute.xlu0 %3334  ;;  %v3443_v20 = vrot.slane %v3407_v10, 4  ;;  %v3439_v48 = vrot.slane %v3438_v57, 2 }
 0x8c9   : > { %2380 = vst.msk [vmem:[#allocation2 + $0x68] sm:$0xff] %vm2366_vm7, %v2345_v27  ;;  %v3392_v40 = vld [vmem:[#allocation2 + $0x28] sm:$0xff] }
 0x8ca   : > { %3377 = vst.msk [vmem:[#allocation2 + $0x30] sm:$0xff] %vm3370_vm8, %v3335_v52  ;;  %v3408_v50 = vmax.f32 %v3392_v40, 0.0  ;;  %v3444_v16 = vmax.f32 %v3407_v10, %v3443_v20  ;;  %v3440_v62 = vmax.f32 %v3438_v57, %v3439_v48 }
 0x8cb   : > { %2882 = vst.msk [vmem:[#allocation2 + $0x68] sm:$0xff] %vm2868_vm6, %v6658_v18  ;;  %v3422_v18 = vmax.f32 %v3420_v45, %v3421_v49 }
 0x8cc   : > { %v3325_v11 = vpop.permute.xlu1 %3324  ;;  %v3337_v6 = vpop.permute.xlu0 %3336  ;;  %v3449_v61 = vrot.slane %v3408_v50, 4  ;;  %v3445_v5 = vrot.slane %v3444_v16, 2  ;;  %v3441_v38 = vrot.slane %v3440_v62, 1 }
 0x8cd   : > { %3372 = vst.msk [vmem:[#allocation2 + $0x8] sm:$0xff] %vm3370_vm8, %v3325_v11  ;;  %3378 = vst.msk [vmem:[#allocation2 + $0x38] sm:$0xff] %vm3370_vm8, %v3337_v6  ;;  %v3395_v54 = vld [vmem:[#allocation2 + $0x40] sm:$0xff]  ;;  %v3423_v4 = vrot.slane %v3422_v18, 1  ;;  %v3436_v6 = vmax.f32 %v3434_v22, %v3435_v26 }
 0x8ce   : > { %v3450_v7 = vmax.f32 %v3408_v50, %v3449_v61  ;;  %v3411_v32 = vmax.f32 %v3395_v54, 0.0  ;;  %v3446_v2 = vmax.f32 %v3444_v16, %v3445_v5  ;;  %v3442_v30 = vmax.f32 %v3440_v62, %v3441_v38 }
 0x8cf   : > { %v3424_v25 = vmax.f32 %v3422_v18, %v3423_v4 }
 0x8d0   : > { %v3343_v47 = vpop.permute.xlu1 %3342  ;;  %v3451_v53 = vrot.slane %v3450_v7, 2  ;;  %v3467_v14 = vrot.slane %v3411_v32, 4  ;;  %v3447_v27 = vrot.slane %v3446_v2, 1 }
 0x8d1   : > { %v3393_v9 = vld [vmem:[#allocation2 + $0x30] sm:$0xff]  ;;  %3381 = vst.msk [vmem:[#allocation2 + $0x50] sm:$0xff] %vm3370_vm8, %v3343_v47 }
 0x8d2   : > { %v3409_v17 = vmax.f32 %v3393_v9, 0.0  ;;  %v3452_v63 = vmax.f32 %v3450_v7, %v3451_v53  ;;  %v3468_v35 = vmax.f32 %v3411_v32, %v3467_v14  ;;  %v3448_v20 = vmax.f32 %v3446_v2, %v3447_v27 }
 0x8d4   : > { %v3455_v24 = vrot.slane %v3409_v17, 4  ;;  %v3388_v43 = vld [vmem:[#allocation2 + $0x8] sm:$0xff]  ;;  %v3345_v23 = vpop.permute.xlu1 %3344  ;;  %v3394_v3 = vld [vmem:[#allocation2 + $0x38] sm:$0xff]  ;;  %v3453_v11 = vrot.slane %v3452_v63, 1  ;;  %v3469_v61 = vrot.slane %v3468_v35, 2 }
 0x8d5   : > { %v3404_v21 = vmax.f32 %v3388_v43, 0.0  ;;  %3382 = vst.msk [vmem:[#allocation2 + $0x58] sm:$0xff] %vm3370_vm8, %v3345_v23  ;;  %v3410_v41 = vmax.f32 %v3394_v3, 0.0 }
 0x8d6   : > { %v3456_v39 = vmax.f32 %v3409_v17, %v3455_v24  ;;  %v3454_v24 = vmax.f32 %v3452_v63, %v3453_v11  ;;  %v3470_v32 = vmax.f32 %v3468_v35, %v3469_v61 }
 0x8d7   : > { %v3425_v56 = vrot.slane %v3404_v21, 4  ;;  %v3461_v36 = vrot.slane %v3410_v41, 4 }
 0x8d8   : > { %v3341_v33 = vpop.permute.xlu1 %3340  ;;  %v3397_v0 = vld [vmem:[#allocation2 + $0x50] sm:$0xff]  ;;  %v3457_v37 = vrot.slane %v3456_v39, 2  ;;  %v3471_v62 = vrot.slane %v3470_v32, 1 }
 0x8d9   : > { %3380 = vst.msk [vmem:[#allocation2 + $0x48] sm:$0xff] %vm3370_vm8, %v3341_v33  ;;  %v3426_v46 = vmax.f32 %v3404_v21, %v3425_v56  ;;  %v3462_v42 = vmax.f32 %v3410_v41, %v3461_v36  ;;  %v3413_v13 = vmax.f32 %v3397_v0, 0.0 }
 0x8da   : > { %v3458_v51 = vmax.f32 %v3456_v39, %v3457_v37 }
 0x8db   : > { %v3427_v34 = vrot.slane %v3426_v46, 2  ;;  %v3463_v55 = vrot.slane %v3462_v42, 2  ;;  %v3479_v59 = vrot.slane %v3413_v13, 4 }
 0x8dc   : > { %v3351_v1 = vpop.permute.xlu1 %3350  ;;  %v3398_v58 = vld [vmem:[#allocation2 + $0x58] sm:$0xff]  ;;  %v3459_v19 = vrot.slane %v3458_v51, 1 }
 0x8dd   : > { %3385 = vst.msk [vmem:[#allocation2 + $0x70] sm:$0xff] %vm3370_vm8, %v3351_v1  ;;  %v3428_v28 = vmax.f32 %v3426_v46, %v3427_v34  ;;  %v3414_v15 = vmax.f32 %v3398_v58, 0.0  ;;  %v3464_v29 = vmax.f32 %v3462_v42, %v3463_v55  ;;  %v3480_v44 = vmax.f32 %v3413_v13, %v3479_v59 }
 0x8de   : > { %v3460_v3 = vmax.f32 %v3458_v51, %v3459_v19 }
 0x8df   : > { %v3429_v60 = vrot.slane %v3428_v28, 1  ;;  %v3485_v50 = vrot.slane %v3414_v15, 4  ;;  %v3465_v45 = vrot.slane %v3464_v29, 1  ;;  %v3481_v56 = vrot.slane %v3480_v44, 2 }
 0x8e0   : > { %v3396_v52 = vld [vmem:[#allocation2 + $0x48] sm:$0xff]  ;;  %v3347_v8 = vpop.permute.xlu1 %3346 }
 0x8e1   : > { %v3412_v40 = vmax.f32 %v3396_v52, 0.0  ;;  %3383 = vst.msk [vmem:[#allocation2 + $0x60] sm:$0xff] %vm3370_vm8, %v3347_v8  ;;  %v3430_v10 = vmax.f32 %v3428_v28, %v3429_v60  ;;  %v3486_v54 = vmax.f32 %v3414_v15, %v3485_v50  ;;  %v3466_v39 = vmax.f32 %v3464_v29, %v3465_v45 }
 0x8e2   : > { %v3482_v22 = vmax.f32 %v3480_v44, %v3481_v56  ;;  %v3472_v15 = vmax.f32 %v3470_v32, %v3471_v62 }
 0x8e3   : > { %v3473_v31 = vrot.slane %v3412_v40, 4  ;;  %v3532_v47 = vsel %vm3531_vm9, %v3430_v10, %v3424_v25  ;;  %v3487_v0 = vrot.slane %v3486_v54, 2 }
 0x8e4   : > { %v3349_v9 = vpop.permute.xlu1 %3348  ;;  %v3401_v17 = vld [vmem:[#allocation2 + $0x70] sm:$0xff]  ;;  %v3534_v57 = vsel %vm3533_vm10, %v3436_v6, %v3532_v47  ;;  %v3483_v4 = vrot.slane %v3482_v22, 1 }
 0x8e5   : > { %3384 = vst.msk [vmem:[#allocation2 + $0x68] sm:$0xff] %vm3370_vm8, %v3349_v9  ;;  %v3417_v16 = vmax.f32 %v3401_v17, 0.0  ;;  %v3474_v43 = vmax.f32 %v3412_v40, %v3473_v31  ;;  %v3536_v23 = vsel %vm3535_vm14, %v3442_v30, %v3534_v57  ;;  %v3488_v14 = vmax.f32 %v3486_v54, %v3487_v0 }
 0x8e6   : > { %v3538_v21 = vsel %vm3537_vm11, %v3448_v20, %v3536_v23  ;;  %v3484_v29 = vmax.f32 %v3482_v22, %v3483_v4 }
 0x8e7   : > { %v3475_v41 = vrot.slane %v3474_v43, 2  ;;  %v3540_v49 = vsel %vm3539_vm12, %v3454_v24, %v3538_v21  ;;  %v3503_v48 = vrot.slane %v3417_v16, 4  ;;  %v3489_v60 = vrot.slane %v3488_v14, 1 }
 0x8e8   : > { %v3353_v7 = vpop.permute.xlu1 %3352  ;;  %v3399_v12 = vld [vmem:[#allocation2 + $0x60] sm:$0xff]  ;;  %v3542_v5 = vsel %vm3541_vm13, %v3460_v3, %v3540_v49 }
 0x8e9   : > { %3386 = vst.msk [vmem:[#allocation2 + $0x78] sm:$0xff] %vm3370_vm8, %v3353_v7  ;;  %v3415_v36 = vmax.f32 %v3399_v12, 0.0  ;;  %v3476_v33 = vmax.f32 %v3474_v43, %v3475_v41  ;;  %v3544_v18 = vsel %vm3543_vm15, %v3466_v39, %v3542_v5  ;;  %v3504_v37 = vmax.f32 %v3417_v16, %v3503_v48 }
 0x8ea   : > { %3554 = vst [vmem:[%s6715_s20] sm:$0xff] %v3544_v18  ;;  %v3490_v11 = vmax.f32 %v3488_v14, %v3489_v60 }
 0x8eb   : > { %v3477_v46 = vrot.slane %v3476_v33, 1  ;;  %v3491_v53 = vrot.slane %v3415_v36, 4  ;;  %v3505_v28 = vrot.slane %v3504_v37, 2 }
 0x8ec   : > { %v3400_v42 = vld [vmem:[#allocation2 + $0x68] sm:$0xff] }
 0x8ed   : > { %v3416_v34 = vmax.f32 %v3400_v42, 0.0  ;;  %v3492_v2 = vmax.f32 %v3415_v36, %v3491_v53  ;;  %v3478_v13 = vmax.f32 %v3476_v33, %v3477_v46  ;;  %v3506_v35 = vmax.f32 %v3504_v37, %v3505_v28 }
 0x8ef   : > { %v3493_v1 = vrot.slane %v3492_v2, 2  ;;  %v3497_v58 = vrot.slane %v3416_v34, 4  ;;  %v3545_v8 = vsel %vm3531_vm9, %v3478_v13, %v3472_v15  ;;  %v3507_v50 = vrot.slane %v3506_v35, 1 }
 0x8f0   : > { %v3402_v55 = vld [vmem:[#allocation2 + $0x78] sm:$0xff]  ;;  %v3546_v10 = vsel %vm3533_vm10, %v3484_v29, %v3545_v8 }
 0x8f1   : > { %v3418_v63 = vmax.f32 %v3402_v55, 0.0  ;;  %v3494_v26 = vmax.f32 %v3492_v2, %v3493_v1  ;;  %v3498_v51 = vmax.f32 %v3416_v34, %v3497_v58  ;;  %v3547_v20 = vsel %vm3535_vm14, %v3490_v11, %v3546_v10 }
 0x8f2   : > { %v3508_v45 = vmax.f32 %v3506_v35, %v3507_v50 }
 0x8f3   : > { %v3495_v38 = vrot.slane %v3494_v26, 1  ;;  %v3499_v27 = vrot.slane %v3498_v51, 2  ;;  %v3509_v52 = vrot.slane %v3418_v63, 4 }
 0x8f5   : > { %v3500_v59 = vmax.f32 %v3498_v51, %v3499_v27  ;;  %v3510_v40 = vmax.f32 %v3418_v63, %v3509_v52  ;;  %v3496_v25 = vmax.f32 %v3494_v26, %v3495_v38 }
 0x8f7   : > { %v3501_v6 = vrot.slane %v3500_v59, 1  ;;  %v3511_v19 = vrot.slane %v3510_v40, 2  ;;  %v3548_v47 = vsel %vm3537_vm11, %v3496_v25, %v3547_v20 }
 0x8f9   : > { %v3502_v31 = vmax.f32 %v3500_v59, %v3501_v6  ;;  %v3512_v30 = vmax.f32 %v3510_v40, %v3511_v19 }
 0x8fb   : > { %v3513_v9 = vrot.slane %v3512_v30, 1  ;;  %v3549_v17 = vsel %vm3539_vm12, %v3502_v31, %v3548_v47 }
 0x8fc   : > { %v3550_v44 = vsel %vm3541_vm13, %v3508_v45, %v3549_v17 }
 0x8fd   : > { %v3514_v61 = vmax.f32 %v3512_v30, %v3513_v9 }
 0x8ff   : > { %v3551_v57 = vsel %vm3543_vm15, %v3514_v61, %v3550_v44 }
 0x900   : > { %3555 = vst [vmem:[%s6715_s20 + $0x8] sm:$0xff] %v3551_v57 }
 0x901   : > { %4697 = shalt.err (!%p4694_p3)
}
 0x902   : > { %s4698_s24 = scalar_lea.hbm %s6728_s13, 256  ;;  %s4702_s20 = scalar_lea.hbm %s6786_s8, 512 }
 0x903   : > { %p4699_p4 = scmp.ne.s32.totalorder %s6728_s13, %s4698_s24  ;;  %p4703_p9 = scmp.lt.u32.totalorder %s6728_s13, %s6786_s8 }
 0x904   : > { %p4704_p10 = scmp.lt.u32.totalorder %s4702_s20, %s4698_s24  ;;  %p4706_p12 = scmp.lt.u32.totalorder %s4698_s24, %s6728_s13 }
 0x905   : > { %p4700_p7 = pnand %p4699_p4, %p4844_p5 }
 0x906   : > { %p4705_p11 = por %p4704_p10, %p4703_p9 }
 0x907   : > { %p4701_p8 = pneg %p4700_p7 }
 0x908   : > { %p4707_p13 = por %p4706_p12, %p4705_p11 }
 0x90a   : > { %p4708_p0 = pnand %p4707_p13, %p4701_p8 }
 0x90c   : > { %4711 = shalt.err (!%p4708_p0)
}
 0x90d   : > { %s4759_s12 = smov 128   ;;  %s4760_s17 = smov 8  }
 0x90e   : > { %4314 = dma.vmem_to_hbm [thread:$0]  (%p4844_p5), %s6730_s26, 256, %s6728_s13, %s6737_s9, %s4759_s12, %s4759_s12, %s4760_s17  }
 0x90f PF: > { %p4320_p1 = scmp.ge.s32.totalorder %s4746_s30, 2  ;;  %s3585_s21 = sand.u32 1, %s4734_s27  }
 0x910   : > { %s3586_s22 = scalar_lea.sflag [#allocation4], %s3585_s21 }
 0x911   : > { %p4317_p2 = pnand %p4320_p1, %p4848_p6 }
 0x913   : > { %4729 = dma.done.wait (!%p4317_p2), %s3586_s22, 256  }
 0x914   : > { %4731 = vsyncadd (!%p4317_p2), %s3586_s22, 4294967040  ;;  %p18_p3 = scmp.ge.s32.totalorder %s4831_s11, 4   ;;  %s6984_s27 = smov %s4738_s28 }
 0x915   : > { %s6985_s28 = smov %s4742_s29  ;;  %s6986_s29 = smov %s4842_s14 }
 0x916   : > { %s6987_s30 = smov %s4831_s11  ;;  %20 = sbr.rel (!%p18_p3) target bundleno = 3 (0x3), region = 87 }
 0x91d   :  { %3591 = vsyncpa [#allocation4], 1 }
 0x91e   :  { %3593 = vsyncpa [#allocation4 + $0x1], 1 }

</bundles_post_ra>
